<compile_context>
chip_gen: v7x
topology: tpu7x:2x2x1
jax: 0.10.0
libtpu: 0.0.40
codegen_flags: <defaults>
</compile_context>

<pallas_src>
import math
from functools import partial

import jax
import jax.numpy as jnp
from jax import lax
from jax.experimental import pallas as pl
from jax.experimental.pallas import tpu as pltpu


def _round_up(x: int, m: int) -> int:
    return ((x + m - 1) // m) * m


def _flash_sdpa_kernel(q_ref, k_ref, v_ref, o_ref,
                       qs_sc, m_sc, l_sc, acc_sc,
                       *, scale: float, keep_scale: float,
                       sk_valid: int, mask_k: bool):
    # q_ref: [tq, D], k_ref: [tk, D], v_ref: [tk, Dv], o_ref: [tq, Dv]
    ki = pl.program_id(2)

    @pl.when(ki == 0)
    def _init():
        m_sc[...] = jnp.full_like(m_sc, -jnp.inf)
        l_sc[...] = jnp.zeros_like(l_sc)
        acc_sc[...] = jnp.zeros_like(acc_sc)
        # Hoisted out of the Sk loop: 1/inv_scale_factor folded into q and the
        # bf16 cast done once per q tile (reused for all Sk/tk steps).
        qs_sc[...] = (q_ref[...] * scale).astype(qs_sc.dtype)

    # s = q @ k^T expressed directly as a contraction over D — no transpose of
    # the K tile is materialized.  bf16 operands, f32 accumulation.
    k_bf = k_ref[...].astype(jnp.bfloat16)
    s = lax.dot_general(
        qs_sc[...], k_bf,
        dimension_numbers=(((1,), (1,)), ((), ())),
        preferred_element_type=jnp.float32,
    )

    if mask_k:
        # Key columns beyond the true Sk (zero padding in the wrapper) are
        # excluded from the softmax.
        col = ki * s.shape[-1] + lax.broadcasted_iota(jnp.int32, s.shape, 1)
        s = jnp.where(col < sk_valid, s, -jnp.inf)

    # Online (streaming) softmax update.
    m_prev = m_sc[...]
    m_new = jnp.maximum(m_prev, jnp.max(s, axis=-1, keepdims=True))
    alpha = jnp.exp(m_prev - m_new)
    p = jnp.exp(s - m_new)

    l_sc[...] = alpha * l_sc[...] + jnp.sum(p, axis=-1, keepdims=True)
    acc_sc[...] = alpha * acc_sc[...] + jnp.dot(
        p.astype(jnp.bfloat16), v_ref[...].astype(jnp.bfloat16),
        preferred_element_type=jnp.float32,
    )
    m_sc[...] = m_new

    @pl.when(ki == pl.num_programs(2) - 1)
    def _finalize():
        # EUP reciprocal; dropout keep-scale folded into the same per-row scale.
        inv = pl.reciprocal(l_sc[...], approx=True)
        if keep_scale != 1.0:
            inv = inv * keep_scale
        o_ref[...] = (acc_sc[...] * inv).astype(o_ref.dtype)


def sdpa_pallas(q, k, v, *, inv_scale_factor: float, dropout_p: float = 0.0,
                tq: int = 256, tk: int = 256):
    """q: [B,H,Sq,D], k: [B,H,Sk,D], v: [B,H,Sk,Dv] -> [B,H,Sq,Dv]."""
    # Dropout mask is not implemented; forbid non-zero p rather than silently
    # producing a wrongly scaled result.
    assert dropout_p == 0.0, "dropout_p > 0 not supported (mask not implemented)"
    keep_scale = 1.0 if dropout_p == 0.0 else 1.0 / (1.0 - dropout_p)

    B, H, Sq, D = q.shape
    _, _, Sk, Dk = k.shape
    _, _, Skv, Dv = v.shape
    assert Dk == D and k.shape[:2] == (B, H) and v.shape[:3] == (B, H, Sk)
    assert Skv == Sk

    # Fixed-size tiles (sublane multiples of 8); ragged Sq/Sk are zero-padded
    # up to a tile multiple and the padded key columns masked in-kernel.
    tq_eff = min(tq, _round_up(Sq, 8))
    tk_eff = min(tk, _round_up(Sk, 8))
    Sq_pad = _round_up(Sq, tq_eff)
    Sk_pad = _round_up(Sk, tk_eff)
    mask_k = Sk_pad != Sk

    # Flatten (B, H) into a single parallel grid axis; pad ragged seq lengths.
    BH = B * H
    q3 = q.reshape(BH, Sq, D)
    k3 = k.reshape(BH, Sk, D)
    v3 = v.reshape(BH, Sk, Dv)
    if Sq_pad != Sq:
        q3 = jnp.pad(q3, ((0, 0), (0, Sq_pad - Sq), (0, 0)))
    if Sk_pad != Sk:
        k3 = jnp.pad(k3, ((0, 0), (0, Sk_pad - Sk), (0, 0)))
        v3 = jnp.pad(v3, ((0, 0), (0, Sk_pad - Sk), (0, 0)))

    grid = (BH, Sq_pad // tq_eff, Sk_pad // tk_eff)

    q_spec = pl.BlockSpec((pl.Squeezed(), tq_eff, D), lambda bh, qi, ki: (bh, qi, 0))
    k_spec = pl.BlockSpec((pl.Squeezed(), tk_eff, D), lambda bh, qi, ki: (bh, ki, 0))
    v_spec = pl.BlockSpec((pl.Squeezed(), tk_eff, Dv), lambda bh, qi, ki: (bh, ki, 0))
    o_spec = pl.BlockSpec((pl.Squeezed(), tq_eff, Dv), lambda bh, qi, ki: (bh, qi, 0))

    kernel = partial(
        _flash_sdpa_kernel,
        scale=1.0 / float(inv_scale_factor),
        keep_scale=float(keep_scale),
        sk_valid=int(Sk),
        mask_k=bool(mask_k),
    )

    # Size the scoped-VMEM request from the real footprint (double-buffered IO
    # tiles + resident scratch) with generous headroom, capped well below the
    # 64 MiB physical VMEM of a v7x TensorCore.
    itemsize = jnp.dtype(q.dtype).itemsize
    io_bytes = 2 * (tq_eff * D + tk_eff * D + tk_eff * Dv + tq_eff * Dv) * itemsize
    scratch_bytes = tq_eff * D * 2 + tq_eff * Dv * 4 + 2 * tq_eff * 4
    vmem_limit = min(2 * (io_bytes + scratch_bytes) + (8 << 20), 32 << 20)

    out3 = pl.pallas_call(
        kernel,
        out_shape=jax.ShapeDtypeStruct((BH, Sq_pad, Dv), q.dtype),
        grid_spec=pltpu.PrefetchScalarGridSpec(
            num_scalar_prefetch=0,
            grid=grid,
            in_specs=[q_spec, k_spec, v_spec],
            out_specs=o_spec,
            scratch_shapes=[
                pltpu.VMEM((tq_eff, D), jnp.bfloat16),   # scaled bf16 q tile
                pltpu.VMEM((tq_eff, 1), jnp.float32),    # running max m
                pltpu.VMEM((tq_eff, 1), jnp.float32),    # running sum l
                pltpu.VMEM((tq_eff, Dv), jnp.float32),   # output accumulator
            ],
        ),
        compiler_params=pltpu.CompilerParams(
            dimension_semantics=("parallel", "parallel", "arbitrary"),
            vmem_limit_bytes=int(vmem_limit),
        ),
    )(q3, k3, v3)

    out3 = out3[:, :Sq, :]
    return out3.reshape(B, H, Sq, Dv)


def sdpa_ref(q, k, v, *, inv_scale_factor: float):
    qk = jnp.einsum("bhqd,bhkd->bhqk", q, k) / inv_scale_factor
    softmax_qk = jax.nn.softmax(qk, axis=-1)
    return jnp.einsum("bhqk,bhkv->bhqv", softmax_qk, v)


if __name__ == "__main__":
    dropout_p = 0.0
    key = jax.random.PRNGKey(0)

    # --- Test 1: lane-dense / MXU-friendly shapes, multi-step Sk reduction ---
    B, H, Sq, Sk, D, Dv = 2, 4, 512, 512, 128, 128
    inv_scale_factor = math.sqrt(D)
    kq, kk, kv, key = jax.random.split(key, 4)
    q = jax.random.normal(kq, (B, H, Sq, D), dtype=jnp.float32)
    k = jax.random.normal(kk, (B, H, Sk, D), dtype=jnp.float32)
    v = jax.random.normal(kv, (B, H, Sk, Dv), dtype=jnp.float32)

    out = sdpa_pallas(q, k, v, inv_scale_factor=inv_scale_factor,
                      dropout_p=dropout_p)
    out = jax.block_until_ready(out)
    ref = sdpa_ref(q, k, v, inv_scale_factor=inv_scale_factor)
    assert out.shape == (B, H, Sq, Dv)
    # bf16 MXU operands (f32 accumulation) -> wider tolerance than pure f32.
    assert jnp.allclose(out, ref, atol=2.5e-2, rtol=2.5e-2), (
        float(jnp.max(jnp.abs(out - ref)))
    )

    # --- Test 2: ragged (non-tile-multiple) sequence lengths exercise the
    #             pad + in-kernel key masking path ---
    B2, H2, Sq2, Sk2, D2, Dv2 = 1, 2, 100, 75, 64, 64
    inv_scale_factor2 = math.sqrt(D2)
    kq2, kk2, kv2, key = jax.random.split(key, 4)
    q2 = jax.random.normal(kq2, (B2, H2, Sq2, D2), dtype=jnp.float32)
    k2 = jax.random.normal(kk2, (B2, H2, Sk2, D2), dtype=jnp.float32)
    v2 = jax.random.normal(kv2, (B2, H2, Sk2, Dv2), dtype=jnp.float32)

    out2 = sdpa_pallas(q2, k2, v2, inv_scale_factor=inv_scale_factor2,
                       dropout_p=dropout_p)
    out2 = jax.block_until_ready(out2)
    ref2 = sdpa_ref(q2, k2, v2, inv_scale_factor=inv_scale_factor2)
    assert out2.shape == (B2, H2, Sq2, Dv2)
    assert jnp.allclose(out2, ref2, atol=2.5e-2, rtol=2.5e-2), (
        float(jnp.max(jnp.abs(out2 - ref2)))
    )

    print("KERNEL_OK")
</pallas_src>

<mosaic_0001>
module attributes {stable_mosaic.version = 11 : i64} {
  func.func @_flash_sdpa_kernel(%arg0: i32, %arg1: i32, %arg2: i32, %arg3: memref<1x256x128xf32, #tpu.memory_space<vmem>>, %arg4: memref<1x256x128xf32, #tpu.memory_space<vmem>>, %arg5: memref<1x256x128xf32, #tpu.memory_space<vmem>>, %arg6: memref<1x256x128xf32, #tpu.memory_space<vmem>>, %arg7: memref<256x128xbf16, #tpu.memory_space<vmem>>, %arg8: memref<256x1xf32, #tpu.memory_space<vmem>>, %arg9: memref<256x1xf32, #tpu.memory_space<vmem>>, %arg10: memref<256x128xf32, #tpu.memory_space<vmem>>) attributes {dimension_semantics = [#tpu.dimension_semantics<parallel>, #tpu.dimension_semantics<parallel>, #tpu.dimension_semantics<arbitrary>], iteration_bounds = array<i64: 8, 2, 2>, scalar_prefetch = 0 : i64, scratch_operands = 4 : i64, tpu.core_type = #tpu.core_type<tc>, window_params = [{transform_indices = @transform_0, window_bounds = array<i64: 1, 256, 128>}, {transform_indices = @transform_1, window_bounds = array<i64: 1, 256, 128>}, {transform_indices = @transform_2, window_bounds = array<i64: 1, 256, 128>}, {transform_indices = @transform_3, window_bounds = array<i64: 1, 256, 128>}]} {
    %c0_i32 = arith.constant 0 : i32
    %0 = arith.cmpi eq, %arg2, %c0_i32 : i32
    %1 = arith.extui %0 : i1 to i32
    %c0_i32_0 = arith.constant 0 : i32
    %2 = arith.cmpi ne, %1, %c0_i32_0 : i32
    scf.if %2 {
      %cst_24 = arith.constant 0xFF800000 : f32
      %37 = vector.broadcast %cst_24 : f32 to vector<256x1xf32>
      %c0_25 = arith.constant 0 : index
      %c0_26 = arith.constant 0 : index
      %38 = vector.load %arg8[%c0_25, %c0_26] : memref<256x1xf32, #tpu.memory_space<vmem>>, vector<256x1xf32>
      tpu.vector_store %arg8[%c0_25, %c0_26], %37 {strides = array<i32>} : memref<256x1xf32, #tpu.memory_space<vmem>>, vector<256x1xf32>,
      %cst_27 = arith.constant 0.000000e+00 : f32
      %39 = vector.broadcast %cst_27 : f32 to vector<256x1xf32>
      %c0_28 = arith.constant 0 : index
      %c0_29 = arith.constant 0 : index
      %40 = vector.load %arg9[%c0_28, %c0_29] : memref<256x1xf32, #tpu.memory_space<vmem>>, vector<256x1xf32>
      tpu.vector_store %arg9[%c0_28, %c0_29], %39 {strides = array<i32>} : memref<256x1xf32, #tpu.memory_space<vmem>>, vector<256x1xf32>,
      %cst_30 = arith.constant 0.000000e+00 : f32
      %41 = vector.broadcast %cst_30 : f32 to vector<256x128xf32>
      %c0_31 = arith.constant 0 : index
      %c0_32 = arith.constant 0 : index
      %42 = vector.load %arg10[%c0_31, %c0_32] : memref<256x128xf32, #tpu.memory_space<vmem>>, vector<256x128xf32>
      tpu.vector_store %arg10[%c0_31, %c0_32], %41 {strides = array<i32>} : memref<256x128xf32, #tpu.memory_space<vmem>>, vector<256x128xf32>,
      %c0_33 = arith.constant 0 : index
      %c0_34 = arith.constant 0 : index
      %c0_35 = arith.constant 0 : index
      %43 = vector.load %arg3[%c0_33, %c0_34, %c0_35] : memref<1x256x128xf32, #tpu.memory_space<vmem>>, vector<1x256x128xf32>
      %44 = vector.shape_cast %43 : vector<1x256x128xf32> to vector<256x128xf32>
      %cst_36 = arith.constant 0.0883883461 : f32
      %45 = vector.broadcast %cst_36 : f32 to vector<256x128xf32>
      %46 = arith.mulf %44, %45 : vector<256x128xf32>
      %47 = arith.truncf %46 : vector<256x128xf32> to vector<256x128xbf16>
      %c0_37 = arith.constant 0 : index
      %c0_38 = arith.constant 0 : index
      %48 = vector.load %arg7[%c0_37, %c0_38] : memref<256x128xbf16, #tpu.memory_space<vmem>>, vector<256x128xbf16>
      tpu.vector_store %arg7[%c0_37, %c0_38], %47 {strides = array<i32>} : memref<256x128xbf16, #tpu.memory_space<vmem>>, vector<256x128xbf16>,
    } else {
    }
    %c0 = arith.constant 0 : index
    %c0_1 = arith.constant 0 : index
    %c0_2 = arith.constant 0 : index
    %3 = vector.load %arg4[%c0, %c0_1, %c0_2] : memref<1x256x128xf32, #tpu.memory_space<vmem>>, vector<1x256x128xf32>
    %4 = vector.shape_cast %3 : vector<1x256x128xf32> to vector<256x128xf32>
    %5 = arith.truncf %4 : vector<256x128xf32> to vector<256x128xbf16>
    %c0_3 = arith.constant 0 : index
    %c0_4 = arith.constant 0 : index
    %6 = vector.load %arg7[%c0_3, %c0_4] : memref<256x128xbf16, #tpu.memory_space<vmem>>, vector<256x128xbf16>
    %cst = arith.constant dense<0.000000e+00> : vector<256x256xf32>
    %7 = tpu.matmul %6, %5, %cst {dimension_numbers = #tpu.dot_dimension_numbers<[1], [1], [0], [0], [0, 0, 1, 0], [], []>} : vector<256x128xbf16>, vector<256x128xbf16>, vector<256x256xf32> -> vector<256x256xf32>
    %c0_5 = arith.constant 0 : index
    %c0_6 = arith.constant 0 : index
    %8 = vector.load %arg8[%c0_5, %c0_6] : memref<256x1xf32, #tpu.memory_space<vmem>>, vector<256x1xf32>
    %cst_7 = arith.constant dense<0xFF800000> : vector<256xf32>
    %9 = vector.multi_reduction <maximumf>, %7, %cst_7 [1] : vector<256x256xf32> to vector<256xf32>
    %10 = vector.shape_cast %9 : vector<256xf32> to vector<256x1xf32>
    %11 = arith.maximumf %8, %10 : vector<256x1xf32>
    %12 = arith.subf %8, %11 : vector<256x1xf32>
    %13 = math.exp %12 : vector<256x1xf32>
    %14 = vector.broadcast %11 : vector<256x1xf32> to vector<256x256xf32>
    %15 = arith.subf %7, %14 : vector<256x256xf32>
    %16 = math.exp %15 : vector<256x256xf32>
    %c0_8 = arith.constant 0 : index
    %c0_9 = arith.constant 0 : index
    %17 = vector.load %arg9[%c0_8, %c0_9] : memref<256x1xf32, #tpu.memory_space<vmem>>, vector<256x1xf32>
    %18 = arith.mulf %13, %17 : vector<256x1xf32>
    %cst_10 = arith.constant dense<0.000000e+00> : vector<256xf32>
    %19 = vector.multi_reduction <add>, %16, %cst_10 [1] : vector<256x256xf32> to vector<256xf32>
    %20 = vector.shape_cast %19 : vector<256xf32> to vector<256x1xf32>
    %21 = arith.addf %18, %20 : vector<256x1xf32>
    %c0_11 = arith.constant 0 : index
    %c0_12 = arith.constant 0 : index
    %22 = vector.load %arg9[%c0_11, %c0_12] : memref<256x1xf32, #tpu.memory_space<vmem>>, vector<256x1xf32>
    tpu.vector_store %arg9[%c0_11, %c0_12], %21 {strides = array<i32>} : memref<256x1xf32, #tpu.memory_space<vmem>>, vector<256x1xf32>,
    %c0_13 = arith.constant 0 : index
    %c0_14 = arith.constant 0 : index
    %23 = vector.load %arg10[%c0_13, %c0_14] : memref<256x128xf32, #tpu.memory_space<vmem>>, vector<256x128xf32>
    %24 = vector.broadcast %13 : vector<256x1xf32> to vector<256x128xf32>
    %25 = arith.mulf %24, %23 : vector<256x128xf32>
    %26 = arith.truncf %16 : vector<256x256xf32> to vector<256x256xbf16>
    %c0_15 = arith.constant 0 : index
    %c0_16 = arith.constant 0 : index
    %c0_17 = arith.constant 0 : index
    %27 = vector.load %arg5[%c0_15, %c0_16, %c0_17] : memref<1x256x128xf32, #tpu.memory_space<vmem>>, vector<1x256x128xf32>
    %28 = vector.shape_cast %27 : vector<1x256x128xf32> to vector<256x128xf32>
    %29 = arith.truncf %28 : vector<256x128xf32> to vector<256x128xbf16>
    %cst_18 = arith.constant dense<0.000000e+00> : vector<256x128xf32>
    %30 = tpu.matmul %26, %29, %cst_18 {dimension_numbers = #tpu.dot_dimension_numbers<[1], [0], [0], [1], [0, 0, 1, 1], [], []>} : vector<256x256xbf16>, vector<256x128xbf16>, vector<256x128xf32> -> vector<256x128xf32>
    %31 = arith.addf %25, %30 : vector<256x128xf32>
    %c0_19 = arith.constant 0 : index
    %c0_20 = arith.constant 0 : index
    %32 = vector.load %arg10[%c0_19, %c0_20] : memref<256x128xf32, #tpu.memory_space<vmem>>, vector<256x128xf32>
    tpu.vector_store %arg10[%c0_19, %c0_20], %31 {strides = array<i32>} : memref<256x128xf32, #tpu.memory_space<vmem>>, vector<256x128xf32>,
    %c0_21 = arith.constant 0 : index
    %c0_22 = arith.constant 0 : index
    %33 = vector.load %arg8[%c0_21, %c0_22] : memref<256x1xf32, #tpu.memory_space<vmem>>, vector<256x1xf32>
    tpu.vector_store %arg8[%c0_21, %c0_22], %11 {strides = array<i32>} : memref<256x1xf32, #tpu.memory_space<vmem>>, vector<256x1xf32>,
    %c1_i32 = arith.constant 1 : i32
    %34 = arith.cmpi eq, %arg2, %c1_i32 : i32
    %35 = arith.extui %34 : i1 to i32
    %c0_i32_23 = arith.constant 0 : i32
    %36 = arith.cmpi ne, %35, %c0_i32_23 : i32
    scf.if %36 {
      %c0_24 = arith.constant 0 : index
      %c0_25 = arith.constant 0 : index
      %37 = vector.load %arg9[%c0_24, %c0_25] : memref<256x1xf32, #tpu.memory_space<vmem>>, vector<256x1xf32>
      %38 = tpu.reciprocal %37 {approx = true} : vector<256x1xf32> -> vector<256x1xf32>
      %c0_26 = arith.constant 0 : index
      %c0_27 = arith.constant 0 : index
      %39 = vector.load %arg10[%c0_26, %c0_27] : memref<256x128xf32, #tpu.memory_space<vmem>>, vector<256x128xf32>
      %40 = vector.broadcast %38 : vector<256x1xf32> to vector<256x128xf32>
      %41 = arith.mulf %39, %40 : vector<256x128xf32>
      %c0_28 = arith.constant 0 : index
      %c0_29 = arith.constant 0 : index
      %c0_30 = arith.constant 0 : index
      %42 = vector.load %arg6[%c0_28, %c0_29, %c0_30] : memref<1x256x128xf32, #tpu.memory_space<vmem>>, vector<1x256x128xf32>
      %43 = vector.shape_cast %42 : vector<1x256x128xf32> to vector<256x128xf32>
      %44 = vector.shape_cast %41 : vector<256x128xf32> to vector<1x256x128xf32>
      tpu.vector_store %arg6[%c0_28, %c0_29, %c0_30], %44 {strides = array<i32>} : memref<1x256x128xf32, #tpu.memory_space<vmem>>, vector<1x256x128xf32>,
    } else {
    }
    return
  }
  func.func @transform_0(%arg0: i32, %arg1: i32, %arg2: i32) -> (i32, i32, i32) {
    %c0_i32 = arith.constant 0 : i32
    %c0_i32_0 = arith.constant 0 : i32
    return %arg0, %arg1, %c0_i32 : i32, i32, i32
  }
  func.func @transform_1(%arg0: i32, %arg1: i32, %arg2: i32) -> (i32, i32, i32) {
    %c0_i32 = arith.constant 0 : i32
    %c0_i32_0 = arith.constant 0 : i32
    return %arg0, %arg2, %c0_i32 : i32, i32, i32
  }
  func.func @transform_2(%arg0: i32, %arg1: i32, %arg2: i32) -> (i32, i32, i32) {
    %c0_i32 = arith.constant 0 : i32
    %c0_i32_0 = arith.constant 0 : i32
    return %arg0, %arg2, %c0_i32 : i32, i32, i32
  }
  func.func @transform_3(%arg0: i32, %arg1: i32, %arg2: i32) -> (i32, i32, i32) {
    %c0_i32 = arith.constant 0 : i32
    %c0_i32_0 = arith.constant 0 : i32
    return %arg0, %arg1, %c0_i32 : i32, i32, i32
  }
}

</mosaic_0001>

<bundles_post_ra>
// kernel: tpu_custom_call.1
= control target key start
LH: loop header
LB: loop body
LE: loop exit
PB: predicated region body
PF: predicated region fallthrough
CT: control target
= control target key end

     0   :  { %s5175_s0 = inlined_call_operand.hbm [shape: f32[8,512,128], index: 0, kind: input, shape index: {}]   ;;  %s5176_s1 = inlined_call_operand.hbm [shape: f32[8,512,128], index: 1, kind: input, shape index: {}]   ;;  %s5177_s2 = inlined_call_operand.hbm [shape: f32[8,512,128], index: 2, kind: input, shape index: {}]   ;;  %s5178_s3 = inlined_call_operand.hbm [shape: f32[8,512,128], index: 3, kind: output, shape index: {}]  }
   0x1   :  { %5296 = sst [smem:[#allocation102_spill]] %s5176_s1 }
   0x2   :  { %5297 = sst [smem:[#allocation103_spill]] %s5178_s3 }
   0x3   :  { %8 = vsyncpa [#allocation7], 0 }
   0x4   :  { %10 = vsyncpa [#allocation7 + $0x1], 0 }
   0x5   :  { %11 = vsyncpa [#allocation10], 0 }
   0x6   :  { %13 = vsyncpa [#allocation10 + $0x1], 0 }
   0x7   :  { %14 = vsyncpa [#allocation8], 0 }
   0x8   :  { %16 = vsyncpa [#allocation8 + $0x1], 0  ;;  %s3488_s12 = smov 0   ;;  %s3490_s13 = smov 0  }
   0x9   :  { %s3492_s14 = smov 0   ;;  %s3494_s15 = smov 0  }
   0xa   :  { %s3496_s16 = smov 0   ;;  %s3498_s17 = smov 0  }
   0xb   :  { %s3500_s18 = smov 0   ;;  %s3502_s19 = smov 0  }
   0xc   :  { %s3504_s20 = smov 0   ;;  %s3506_s21 = smov 0  }
   0xd   :  { %s3508_s22 = smov 0   ;;  %s3510_s23 = smov 0  }
   0xe   :  { %s3512_s24 = smov 0  }
   0xf LB: > { %5298 = sst [smem:[#allocation16_spill]] %s3410_s13  ;;  %s3552_s25 = sadd.s32 4294967295, %s3454_s24   ;;  %s3454_s24 = sphi %s3512_s24, %s22_s24   ;;  %s3450_s23 = sphi %s3510_s23, %s5580_s23   ;;  %s3446_s22 = sphi %s3508_s22, %s5570_s22   ;;  %s3442_s21 = sphi %s3506_s21, %s5579_s21   ;;  %s3438_s20 = sphi %s3504_s20, %s5578_s20   ;;  %s3434_s19 = sphi %s3502_s19, %s5569_s19   ;;  %s3430_s18 = sphi %s3500_s18, %s5577_s18   ;;  %s3426_s17 = sphi %s3498_s17, %s5576_s17   ;;  %s3422_s16 = sphi %s3496_s16, %s5575_s16   ;;  %s3418_s15 = sphi %s3494_s15, %s5568_s15   ;;  %s3414_s14 = sphi %s3492_s14, %s5574_s14   ;;  %s3410_s13 = sphi %s3490_s13, %s5573_s13   ;;  %s3406_s12 = sphi %s3488_s12, %s5567_s12  }
  0x10   : > { %5299 = sst [smem:[#allocation17_spill]] %s3418_s15  ;;  %s34_s26 = sadd.s32 1, %s3442_s21 }
  0x11   : > { %5300 = sst [smem:[#allocation18_spill]] %s3422_s16  ;;  %p3555_p0 = scmp.ge.s32.totalorder %s34_s26, 2 }
  0x12   : > { %5301 = sst [smem:[#allocation19_spill]] %s3430_s18  ;;  %p5184_p1 = scmp.eq.s32.totalorder %s3454_s24, 0 }
  0x13   : > { %5302 = sst [smem:[#allocation20_spill]] %s3434_s19  ;;  %p5185_p2 = scmp.eq.s32.totalorder %s3552_s25, 0 }
  0x14   : > { %5303 = sst [smem:[#allocation21_spill]] %s3438_s20  ;;  %s5582_s26 = smov (%p3555_p0, %s34_s26), 0 }
  0x15   : > { %5304 = sst [smem:[#allocation22_spill]] %s3446_s22  ;;  %p85_p3 = scmp.ne.s32.totalorder %s3414_s14, %s3410_s13 }
  0x16   : > { %5305 = sst [smem:[#allocation23_spill]] %s3552_s25  ;;  %p91_p4 = scmp.ne.s32.totalorder %s3410_s13, %s3406_s12 }
  0x17   : > { %p3572_p5 = por %p85_p3, %p5184_p1  ;;  %p5183_p7 = scmp.lt.s32.totalorder %s3454_s24, 32 }
  0x18   : > { %p3578_p6 = por %p91_p4, %p5185_p2  ;;  %s5180_s5 = sshll.u32 %s3450_s23, 6 }
  0x19   : > { %s194_s6 = sand.u32 1, %s3454_s24   ;;  %s196_s7 = sand.u32 1, %s3414_s14  }
  0x1a   : > { %s5308_s4 = scalar_select %p3578_p6, 1, 0 }
  0x1b   : > { %s2645_s8 = sshll.u32 %s196_s7, 8  ;;  %s2646_s9 = sshll.u32 %s3442_s21, 5 }
  0x1c   : > { %5309 = sst [smem:[#allocation24_spill]] %s5308_s4  ;;  %s204_s10 = sadd.s32 %s2646_s9, %s5180_s5 }
  0x1d   : > { %s2648_s11 = sshll.u32 %s204_s10, 7  ;;  %s198_s12 = scalar_lea.vmem [#allocation9], %s2645_s8 }
  0x1e   : > { %s207_s29 = sshll.u32 %s198_s12, 4  ;;  %s5310_s1 = sld [smem:[#allocation102_spill]]  ;;  %s3594_s29 = int_to_ptr.vmem [resolvable:$true] %s207_s29 }
  0x1f   : > { %p3600_p8 = pnand %p5183_p7, %p3572_p5  ;;  %s3609_s3 = scalar_lea.hbm %s5177_s2, %s2648_s11 }
  0x20   : > { %s221_s28 = scalar_lea.vmem [#allocation11], %s2645_s8  ;;  %s3613_s19 = scalar_lea.sflag [#allocation10], %s194_s6 }
  0x21   : > { %s3611_s5 = sshll.u32 %s221_s28, 4  ;;  %p3224_p10 = pneg %p3600_p8  ;;  %s3651_s5 = int_to_ptr.vmem [resolvable:$true] %s3611_s5 }
  0x24   : > { %s3592_s20 = scalar_lea.hbm %s5310_s1, %s2648_s11  ;;  %s3227_s4 = scalar_lea.hbm %s5310_s1, 65536 }
  0x25   : > { %s3222_s30 = scalar_lea.hbm %s3592_s20, 4096  ;;  %p3228_p13 = scmp.lt.u32.totalorder %s3592_s20, %s5310_s1 }
  0x26   : > { %p3223_p9 = scmp.ne.s32.totalorder %s3592_s20, %s3222_s30  ;;  %p3229_p3 = scmp.lt.u32.totalorder %s3227_s4, %s3222_s30 }
  0x27   : > { %p3231_p5 = scmp.lt.u32.totalorder %s3222_s30, %s3592_s20 }
  0x28   : > { %p3225_p11 = pnand %p3224_p10, %p3223_p9  ;;  %p3230_p4 = por %p3229_p3, %p3228_p13 }
  0x2a   : > { %p3226_p12 = pneg %p3225_p11  ;;  %p3232_p7 = por %p3231_p5, %p3230_p4 }
  0x2c   : > { %p3233_p1 = pnand %p3232_p7, %p3226_p12 }
  0x2e   : > { %3236 = shalt.err (!%p3233_p1)
}
  0x2f   : > { %s3237_s6 = scalar_lea.vmem %s3594_s29, 4096  ;;  %s3456_s18 = smov [#allocation9]  }
  0x30   : > { %p3238_p9 = scmp.ne.s32.totalorder %s3594_s29, %s3237_s6  ;;  %s3242_s8 = sshll.u32 %s3456_s18, 4  ;;  %s3243_s8 = int_to_ptr.vmem [resolvable:$false] %s3242_s8 }
  0x31   : > { %s3244_s9 = scalar_lea.vmem %s3243_s8, 8192  ;;  %p3245_p6 = scmp.lt.s32.totalorder %s3594_s29, %s3243_s8 }
  0x32   : > { %p3240_p11 = pnand %p3238_p9, %p3224_p10  ;;  %p3246_p13 = scmp.lt.s32.totalorder %s3244_s9, %s3237_s6 }
  0x34   : > { %p3241_p2 = pneg %p3240_p11  ;;  %p3247_p3 = por %p3246_p13, %p3245_p6 }
  0x36   : > { %p3248_p4 = pnand %p3247_p3, %p3241_p2 }
  0x38   : > { %3251 = shalt.err (!%p3248_p4)
}
  0x39   : > { %s5187_s4 = smov 128   ;;  %s5189_s12 = smov 8  }
  0x3a   : > { %2840 = dma.hbm_to_vmem [thread:$0]  (!%p3600_p8), %s3592_s20, 4096, %s3594_s29, %s3613_s19, %s5187_s4, %s5187_s4, %s5189_s12  }
  0x3b   : > { %p2653_p1 = scmp.ge.s32.totalorder %s3454_s24, 1  ;;  %p238_p2 = scmp.lt.s32.totalorder %s3454_s24, 33 }
  0x3c   : > { %s2638_s30 = sadd.s32 4294967294, %s3454_s24   ;;  %s37_s10 = sadd.s32 1, %s3446_s22 }
  0x3d   : > { %p3646_p6 = pnand %p2653_p1, %p238_p2  ;;  %s5584_s10 = smov (!%p3555_p0, %s37_s10), %s3446_s22 }
  0x3e   : > { %p57_p7 = scmp.ne.s32.totalorder %s3426_s17, %s3422_s16  ;;  %p63_p12 = scmp.ne.s32.totalorder %s3422_s16, %s3418_s15 }
  0x3f   : > { %s5312_s28 = scalar_select %p3646_p6, 1, 0 }
  0x40   : > { %p39_p5 = scmp.ge.s32.totalorder %s5584_s10, 2  ;;  %p145_p9 = scmp.eq.s32.totalorder %s3552_s25, 31 }
  0x41   : > { %5313 = sst [smem:[#allocation25_spill]] %s5312_s28  ;;  %s50_s20 = sadd.s32 1, %s3426_s17 }
  0x42   : > { %p5314_p11 = scmp.eq.s32.totalorder %s3552_s25, 0  ;;  %s5586_s10 = smov (%p39_p5, %s5584_s10), 0 }
  0x43   : > { %5317 = sst [smem:[#allocation27_spill]] %s5586_s10  ;;  %s5318_s27 = sadd.s32 1, %s3450_s23 }
  0x44   : > { %p3669_p13 = por %p5314_p11, %p63_p12  ;;  %s5588_s27 = smov (!%p39_p5, %s5318_s27), %s3450_s23 }
  0x45   : > { %p5319_p0 = scmp.eq.s32.totalorder %s3454_s24, 0  ;;  %p3684_p4 = por %p145_p9, %p57_p7 }
  0x46   : > { %s5315_s29 = scalar_select %p3669_p13, 1, 0 }
  0x47   : > { %p3680_p3 = por %p5319_p0, %p57_p7  ;;  %p43_p1 = scmp.ge.s32.totalorder %s5588_s27, 8 }
  0x48   : > { %5316 = sst [smem:[#allocation26_spill]] %s5315_s29  ;;  %p151_p2 = scmp.eq.s32.totalorder %s2638_s30, 31 }
  0x49   : > { %s5321_s6 = scalar_select %p3684_p4, 1, 0 }
  0x4a   : > { %s46_s18 = ssub.s32 %s3446_s22, %s5586_s10  ;;  %s5204_s8 = sand.u32 1, %s3426_s17  }
  0x4b   : > { %5322 = sst [smem:[#allocation28_spill]] %s5321_s6  ;;  %s5590_s27 = smov (%p43_p1, %s5588_s27), 0 }
  0x4c   : > { %5323 = sst [smem:[#allocation29_spill]] %s5590_s27  ;;  %p3696_p5 = por %p151_p2, %p63_p12 }
  0x4d   : > { %s2642_s4 = sshll.u32 %s3446_s22, 5  ;;  %s45_s12 = ssub.s32 %s3450_s23, %s5590_s27 }
  0x4e   : > { %s5324_s9 = scalar_select %p3696_p5, 1, 0 }
  0x4f   : > { %s2641_s1 = sshll.u32 %s5204_s8, 8  ;;  %s47_s30 = sor.u32 %s46_s18, %s45_s12 }
  0x50   : > { %5325 = sst [smem:[#allocation30_spill]] %s5324_s9  ;;  %s5326_s10 = ssub.s32 %s3442_s21, %s5582_s26 }
  0x51   : > { %s75_s6 = sor.u32 %s5326_s10, %s45_s12  ;;  %p48_p7 = scmp.eq.s32.totalorder %s47_s30, 0 }
  0x52   : > { %p76_p9 = scmp.eq.s32.totalorder %s75_s6, 0  ;;  %s5327_s15 = sshll.u32 %s3450_s23, 6 }
  0x53   : > { %s181_s13 = sadd.s32 %s5327_s15, %s2642_s4  ;;  %s5328_s9 = sadd.s32 1, %s3414_s14 }
  0x54   : > { %s3711_s25 = scalar_select %p48_p7, %s3426_s17, %s50_s20  }
  0x55   : > { %s3716_s29 = scalar_select %p76_p9, %s3414_s14, %s5328_s9  }
  0x56   : > { %s2644_s22 = sshll.u32 %s181_s13, 7  ;;  %s175_s27 = scalar_lea.vmem [#allocation6], %s2641_s1 }
  0x57   : > { %s184_s16 = sshll.u32 %s175_s27, 4  ;;  %s3721_s18 = scalar_lea.hbm %s5175_s0, %s2644_s22  ;;  %s3723_s16 = int_to_ptr.vmem [resolvable:$true] %s184_s16 }
  0x58   : > { %p5329_p12 = scmp.lt.s32.totalorder %s3454_s24, 32  ;;  %s3252_s4 = scalar_lea.hbm %s3609_s3, 4096 }
  0x59   : > { %p3253_p0 = scmp.ne.s32.totalorder %s3609_s3, %s3252_s4  ;;  %s3257_s12 = scalar_lea.hbm %s5177_s2, 65536 }
  0x5a   : > { %p3729_p11 = pnand %p5329_p12, %p3680_p3  ;;  %p3258_p7 = scmp.lt.u32.totalorder %s3609_s3, %s5177_s2 }
  0x5b   : > { %p3255_p1 = pnand %p3253_p0, %p3224_p10  ;;  %p3259_p9 = scmp.lt.u32.totalorder %s3257_s12, %s3252_s4 }
  0x5c   : > { %p3261_p3 = scmp.lt.u32.totalorder %s3252_s4, %s3609_s3 }
  0x5d   : > { %p3256_p2 = pneg %p3255_p1  ;;  %p3260_p5 = por %p3259_p9, %p3258_p7 }
  0x5f   : > { %p3262_p12 = por %p3261_p3, %p3260_p5 }
  0x61   : > { %p3263_p4 = pnand %p3262_p12, %p3256_p2 }
  0x63   : > { %3266 = shalt.err (!%p3263_p4)
}
  0x64   : > { %s3267_s10 = scalar_lea.vmem %s3651_s5, 4096  ;;  %s3459_s20 = smov [#allocation11]  }
  0x65   : > { %p3268_p0 = scmp.ne.s32.totalorder %s3651_s5, %s3267_s10  ;;  %s3272_s27 = sshll.u32 %s3459_s20, 4  ;;  %s3273_s27 = int_to_ptr.vmem [resolvable:$false] %s3272_s27 }
  0x66   : > { %s3274_s11 = scalar_lea.vmem %s3273_s27, 8192  ;;  %p3275_p6 = scmp.lt.s32.totalorder %s3651_s5, %s3273_s27 }
  0x67   : > { %p3270_p1 = pnand %p3268_p0, %p3224_p10  ;;  %p3276_p7 = scmp.lt.s32.totalorder %s3274_s11, %s3267_s10 }
  0x69   : > { %p3271_p13 = pneg %p3270_p1  ;;  %p3277_p9 = por %p3276_p7, %p3275_p6 }
  0x6b   : > { %p3278_p5 = pnand %p3277_p9, %p3271_p13 }
  0x6d   : > { %3281 = shalt.err (!%p3278_p5)
}
  0x6e   : > { %s5331_s6 = smov 8   ;;  %s5332_s8 = smov 128  }
  0x6f   : > { %2843 = dma.hbm_to_vmem [thread:$0]  (!%p3600_p8), %s3609_s3, 4096, %s3651_s5, %s3613_s19, %s5332_s8, %s5332_s8, %s5331_s6  }
  0x70   : > { %s5333_s9 = sand.u32 1, %s3426_s17   ;;  %s3282_s4 = scalar_lea.hbm %s3721_s18, 4096 }
  0x71   : > { %s3762_s30 = scalar_lea.sflag [#allocation7], %s5333_s9  ;;  %p3283_p10 = scmp.ne.s32.totalorder %s3721_s18, %s3282_s4 }
  0x72   : > { %p3284_p6 = pneg %p3729_p11  ;;  %s3287_s13 = scalar_lea.hbm %s5175_s0, 65536 }
  0x73   : > { %p3288_p2 = scmp.lt.u32.totalorder %s3721_s18, %s5175_s0  ;;  %p3289_p8 = scmp.lt.u32.totalorder %s3287_s13, %s3282_s4 }
  0x74   : > { %p3285_p13 = pnand %p3284_p6, %p3283_p10  ;;  %p3291_p12 = scmp.lt.u32.totalorder %s3282_s4, %s3721_s18 }
  0x75   : > { %p3290_p3 = por %p3289_p8, %p3288_p2 }
  0x76   : > { %p3286_p4 = pneg %p3285_p13 }
  0x77   : > { %p3292_p0 = por %p3291_p12, %p3290_p3 }
  0x79   : > { %p3293_p1 = pnand %p3292_p0, %p3286_p4 }
  0x7b   : > { %3296 = shalt.err (!%p3293_p1)
}
  0x7c   : > { %s3297_s19 = scalar_lea.vmem %s3723_s16, 4096  ;;  %s3460_s5 = smov [#allocation6]  }
  0x7d   : > { %p3298_p7 = scmp.ne.s32.totalorder %s3723_s16, %s3297_s19  ;;  %s3302_s3 = sshll.u32 %s3460_s5, 4  ;;  %s3303_s3 = int_to_ptr.vmem [resolvable:$false] %s3302_s3 }
  0x7e   : > { %s3304_s28 = scalar_lea.vmem %s3303_s3, 8192  ;;  %p3305_p10 = scmp.lt.s32.totalorder %s3723_s16, %s3303_s3 }
  0x7f   : > { %p3300_p9 = pnand %p3298_p7, %p3284_p6  ;;  %p3306_p13 = scmp.lt.s32.totalorder %s3304_s28, %s3297_s19 }
  0x81   : > { %p3301_p5 = pneg %p3300_p9  ;;  %p3307_p2 = por %p3306_p13, %p3305_p10 }
  0x83   : > { %p3308_p8 = pnand %p3307_p2, %p3301_p5 }
  0x85   : > { %3311 = shalt.err (!%p3308_p8)
}
  0x86   : > { %2837 = dma.hbm_to_vmem [thread:$0]  (!%p3729_p11), %s3721_s18, 4096, %s3723_s16, %s3762_s30, %s5332_s8, %s5332_s8, %s5331_s6  }
  0x87   : > { %s5334_s10 = sld [smem:[#allocation25_spill]] }
  0x8d   : > { %p5335_p6 = scmp.ne.s32.totalorder %s5334_s10, 0 }
  0x8f   : > { %242 = sbr.rel (%p5335_p6) target bundleno = 1425 (0x591), region = 32 }
  0x96   : > { %s5336_s20 = sld [smem:[#allocation18_spill]]  ;;  %s5337_s27 = sld [smem:[#allocation26_spill]] }
  0x9c   : > { %s3796_s11 = sand.u32 1, %s5336_s20   ;;  %p5338_p4 = scmp.ne.s32.totalorder %s5337_s27, 0 }
  0x9d   : > { %s2654_s9 = sshll.u32 %s3796_s11, 8  ;;  %s245_s4 = scalar_lea.sflag [#allocation7], %s3796_s11 }
  0x9e   : > { %s3800_s7 = scalar_lea.vmem [#allocation6], %s2654_s9 }
  0x9f   : > { %3393 = dma.done.wait (%p5338_p4), %s245_s4, 4096  }
  0xa0   : > { %3395 = vsyncadd (%p5338_p4), %s245_s4, 4294963200  ;;  %s5339_s15 = sld [smem:[#allocation23_spill]]  ;;  %s5340_s16 = sld [smem:[#allocation16_spill]] }
  0xa1   : > { %s5341_s18 = sld [smem:[#allocation24_spill]] }
  0xa6   : > { %s253_s6 = sand.u32 1, %s5339_s15   ;;  %s255_s8 = sand.u32 1, %s5340_s16  }
  0xa7   : > { %s2655_s30 = sshll.u32 %s255_s8, 8  ;;  %s254_s1 = scalar_lea.sflag [#allocation10], %s253_s6 }
  0xa8   : > { %s3808_s13 = scalar_lea.vmem [#allocation9], %s2655_s30  ;;  %p5342_p11 = scmp.ne.s32.totalorder %s5341_s18, 0 }
  0xaa   : > { %3397 = dma.done.wait (%p5342_p11), %s254_s1, 8192  }
  0xab   : > { %3399 = vsyncadd (%p5342_p11), %s254_s1, 4294959104  ;;  %s3814_s12 = scalar_lea.vmem [#allocation11], %s2655_s30  ;;  %s3816_s22 = scalar_lea.vmem [#allocation12], %s2654_s9 }
  0xac   : > { %s5343_s19 = sld [smem:[#allocation19_spill]] }
  0xb2   : > { %p2658_p3 = scmp.ne.s32.totalorder %s5343_s19, 0 }
  0xb3   : > { %vm308_vm0 = vcmask (!%p2658_p3), 7168   ;;  %v3820_v0 = vld [vmem:[%s3800_s7] sm:$0xff] (!%p2658_p3)  ;;  %v3823_v1 = vld [vmem:[%s3800_s7 + $0x8] sm:$0xff] (!%p2658_p3)  ;;  %v3826_v2 = vld [vmem:[%s3800_s7 + $0x10] sm:$0xff] (!%p2658_p3)  ;;  %v3461_v3 = vmov (!%p2658_p3), -inf   ;;  %v3462_v4 = vmov (!%p2658_p3), 0.0  }
  0xb4   : > { %307 = sbr.rel (%p2658_p3) target bundleno = 236 (0xec), region = 48  ;;  %309 = vst.msk [vmem:[#allocation3] sm:$0xff] (!%p2658_p3), %vm308_vm0, %v3461_v3  ;;  %310 = vst.msk [vmem:[#allocation3 + $0x8] sm:$0xff] (!%p2658_p3), %vm308_vm0, %v3461_v3  ;;  %v437_v5 = vmul.f32 (!%p2658_p3), 0.088388346, %v3820_v0  ;;  %v408_v7 = vld [vmem:[%s3800_s7 + $0x18] sm:$0xff] (!%p2658_p3) }
  0xb5   : > { %311 = vst.msk [vmem:[#allocation3 + $0x10] sm:$0xff] (!%p2658_p3), %vm308_vm0, %v3461_v3  ;;  %312 = vst.msk [vmem:[#allocation3 + $0x18] sm:$0xff] (!%p2658_p3), %vm308_vm0, %v3461_v3  ;;  %v438_v6 = vmul.f32 (!%p2658_p3), 0.088388346, %v3823_v1  ;;  %v409_v8 = vld [vmem:[%s3800_s7 + $0x20] sm:$0xff] (!%p2658_p3)  ;;  %v410_v11 = vld [vmem:[%s3800_s7 + $0x28] sm:$0xff] (!%p2658_p3) }
  0xb6   : > { %313 = vst.msk [vmem:[#allocation3 + $0x20] sm:$0xff] (!%p2658_p3), %vm308_vm0, %v3461_v3  ;;  %314 = vst.msk [vmem:[#allocation3 + $0x28] sm:$0xff] (!%p2658_p3), %vm308_vm0, %v3461_v3  ;;  %v439_v9 = vmul.f32 (!%p2658_p3), 0.088388346, %v3826_v2  ;;  %v440_v10 = vmul.f32 (!%p2658_p3), 0.088388346, %v408_v7 }
  0xb7   : > { %315 = vst.msk [vmem:[#allocation3 + $0x30] sm:$0xff] (!%p2658_p3), %vm308_vm0, %v3461_v3  ;;  %316 = vst.msk [vmem:[#allocation3 + $0x38] sm:$0xff] (!%p2658_p3), %vm308_vm0, %v3461_v3  ;;  %v411_v12 = vld [vmem:[%s3800_s7 + $0x30] sm:$0xff] (!%p2658_p3)  ;;  %v469_v13 = vpack.c.bf16 (!%p2658_p3), %v438_v6, %v437_v5  ;;  %v441_v14 = vmul.f32 (!%p2658_p3), 0.088388346, %v409_v8  ;;  %v412_v16 = vld [vmem:[%s3800_s7 + $0x38] sm:$0xff] (!%p2658_p3) }
  0xb8   : > { %317 = vst.msk [vmem:[#allocation3 + $0x40] sm:$0xff] (!%p2658_p3), %vm308_vm0, %v3461_v3  ;;  %318 = vst.msk [vmem:[#allocation3 + $0x48] sm:$0xff] (!%p2658_p3), %vm308_vm0, %v3461_v3  ;;  %v442_v15 = vmul.f32 (!%p2658_p3), 0.088388346, %v410_v11  ;;  %v413_v17 = vld [vmem:[%s3800_s7 + $0x40] sm:$0xff] (!%p2658_p3)  ;;  %v470_v18 = vpack.c.bf16 (!%p2658_p3), %v440_v10, %v439_v9  ;;  %v414_v21 = vld [vmem:[%s3800_s7 + $0x48] sm:$0xff] (!%p2658_p3) }
  0xb9   : > { %319 = vst.msk [vmem:[#allocation3 + $0x50] sm:$0xff] (!%p2658_p3), %vm308_vm0, %v3461_v3  ;;  %320 = vst.msk [vmem:[#allocation3 + $0x58] sm:$0xff] (!%p2658_p3), %vm308_vm0, %v3461_v3  ;;  %v443_v19 = vmul.f32 (!%p2658_p3), 0.088388346, %v411_v12  ;;  %v444_v20 = vmul.f32 (!%p2658_p3), 0.088388346, %v412_v16 }
  0xba   : > { %321 = vst.msk [vmem:[#allocation3 + $0x60] sm:$0xff] (!%p2658_p3), %vm308_vm0, %v3461_v3  ;;  %322 = vst.msk [vmem:[#allocation3 + $0x68] sm:$0xff] (!%p2658_p3), %vm308_vm0, %v3461_v3  ;;  %v415_v22 = vld [vmem:[%s3800_s7 + $0x50] sm:$0xff] (!%p2658_p3)  ;;  %v471_v23 = vpack.c.bf16 (!%p2658_p3), %v442_v15, %v441_v14  ;;  %v445_v24 = vmul.f32 (!%p2658_p3), 0.088388346, %v413_v17  ;;  %v416_v26 = vld [vmem:[%s3800_s7 + $0x58] sm:$0xff] (!%p2658_p3) }
  0xbb   : > { %323 = vst.msk [vmem:[#allocation3 + $0x70] sm:$0xff] %vm308_vm0, %v3461_v3  ;;  %324 = vst.msk [vmem:[#allocation3 + $0x78] sm:$0xff] %vm308_vm0, %v3461_v3  ;;  %v446_v25 = vmul.f32 0.088388346, %v414_v21  ;;  %v417_v27 = vld [vmem:[%s3800_s7 + $0x60] sm:$0xff]  ;;  %v472_v28 = vpack.c.bf16 %v444_v20, %v443_v19  ;;  %v418_v31 = vld [vmem:[%s3800_s7 + $0x68] sm:$0xff] }
  0xbc   : > { %325 = vst.msk [vmem:[#allocation3 + $0x80] sm:$0xff] %vm308_vm0, %v3461_v3  ;;  %326 = vst.msk [vmem:[#allocation3 + $0x88] sm:$0xff] %vm308_vm0, %v3461_v3  ;;  %v447_v29 = vmul.f32 0.088388346, %v415_v22  ;;  %v448_v30 = vmul.f32 0.088388346, %v416_v26 }
  0xbd   : > { %327 = vst.msk [vmem:[#allocation3 + $0x90] sm:$0xff] %vm308_vm0, %v3461_v3  ;;  %328 = vst.msk [vmem:[#allocation3 + $0x98] sm:$0xff] %vm308_vm0, %v3461_v3  ;;  %v419_v32 = vld [vmem:[%s3800_s7 + $0x70] sm:$0xff]  ;;  %v473_v33 = vpack.c.bf16 %v446_v25, %v445_v24  ;;  %v449_v34 = vmul.f32 0.088388346, %v417_v27  ;;  %v420_v36 = vld [vmem:[%s3800_s7 + $0x78] sm:$0xff] }
  0xbe   : > { %329 = vst.msk [vmem:[#allocation3 + $0xa0] sm:$0xff] %vm308_vm0, %v3461_v3  ;;  %330 = vst.msk [vmem:[#allocation3 + $0xa8] sm:$0xff] %vm308_vm0, %v3461_v3  ;;  %v450_v35 = vmul.f32 0.088388346, %v418_v31  ;;  %v421_v37 = vld [vmem:[%s3800_s7 + $0x80] sm:$0xff]  ;;  %v474_v38 = vpack.c.bf16 %v448_v30, %v447_v29  ;;  %v422_v41 = vld [vmem:[%s3800_s7 + $0x88] sm:$0xff] }
  0xbf   : > { %331 = vst.msk [vmem:[#allocation3 + $0xb0] sm:$0xff] %vm308_vm0, %v3461_v3  ;;  %332 = vst.msk [vmem:[#allocation3 + $0xb8] sm:$0xff] %vm308_vm0, %v3461_v3  ;;  %v451_v39 = vmul.f32 0.088388346, %v419_v32  ;;  %v452_v40 = vmul.f32 0.088388346, %v420_v36 }
  0xc0   : > { %333 = vst.msk [vmem:[#allocation3 + $0xc0] sm:$0xff] %vm308_vm0, %v3461_v3  ;;  %334 = vst.msk [vmem:[#allocation3 + $0xc8] sm:$0xff] %vm308_vm0, %v3461_v3  ;;  %v423_v42 = vld [vmem:[%s3800_s7 + $0x90] sm:$0xff]  ;;  %v475_v43 = vpack.c.bf16 %v450_v35, %v449_v34  ;;  %v453_v44 = vmul.f32 0.088388346, %v421_v37  ;;  %v424_v46 = vld [vmem:[%s3800_s7 + $0x98] sm:$0xff] }
  0xc1   : > { %335 = vst.msk [vmem:[#allocation3 + $0xd0] sm:$0xff] %vm308_vm0, %v3461_v3  ;;  %336 = vst.msk [vmem:[#allocation3 + $0xd8] sm:$0xff] %vm308_vm0, %v3461_v3  ;;  %v454_v45 = vmul.f32 0.088388346, %v422_v41  ;;  %v425_v47 = vld [vmem:[%s3800_s7 + $0xa0] sm:$0xff]  ;;  %v476_v48 = vpack.c.bf16 %v452_v40, %v451_v39  ;;  %v426_v51 = vld [vmem:[%s3800_s7 + $0xa8] sm:$0xff] }
  0xc2   : > { %337 = vst.msk [vmem:[#allocation3 + $0xe0] sm:$0xff] %vm308_vm0, %v3461_v3  ;;  %338 = vst.msk [vmem:[#allocation3 + $0xe8] sm:$0xff] %vm308_vm0, %v3461_v3  ;;  %v455_v49 = vmul.f32 0.088388346, %v423_v42  ;;  %v456_v50 = vmul.f32 0.088388346, %v424_v46 }
  0xc3   : > { %339 = vst.msk [vmem:[#allocation3 + $0xf0] sm:$0xff] %vm308_vm0, %v3461_v3  ;;  %340 = vst.msk [vmem:[#allocation3 + $0xf8] sm:$0xff] %vm308_vm0, %v3461_v3  ;;  %v427_v52 = vld [vmem:[%s3800_s7 + $0xb0] sm:$0xff]  ;;  %v477_v53 = vpack.c.bf16 %v454_v45, %v453_v44  ;;  %v457_v54 = vmul.f32 0.088388346, %v425_v47  ;;  %v428_v56 = vld [vmem:[%s3800_s7 + $0xb8] sm:$0xff] }
  0xc4   : > { %341 = vst.msk [vmem:[#allocation4] sm:$0xff] %vm308_vm0, %v3462_v4  ;;  %342 = vst.msk [vmem:[#allocation4 + $0x8] sm:$0xff] %vm308_vm0, %v3462_v4  ;;  %v458_v55 = vmul.f32 0.088388346, %v426_v51  ;;  %v429_v57 = vld [vmem:[%s3800_s7 + $0xc0] sm:$0xff]  ;;  %v478_v58 = vpack.c.bf16 %v456_v50, %v455_v49  ;;  %v430_v61 = vld [vmem:[%s3800_s7 + $0xc8] sm:$0xff] }
  0xc5   : > { %343 = vst.msk [vmem:[#allocation4 + $0x10] sm:$0xff] %vm308_vm0, %v3462_v4  ;;  %344 = vst.msk [vmem:[#allocation4 + $0x18] sm:$0xff] %vm308_vm0, %v3462_v4  ;;  %v459_v59 = vmul.f32 0.088388346, %v427_v52  ;;  %v460_v60 = vmul.f32 0.088388346, %v428_v56 }
  0xc6   : > { %345 = vst.msk [vmem:[#allocation4 + $0x20] sm:$0xff] %vm308_vm0, %v3462_v4  ;;  %346 = vst.msk [vmem:[#allocation4 + $0x28] sm:$0xff] %vm308_vm0, %v3462_v4  ;;  %v431_v62 = vld [vmem:[%s3800_s7 + $0xd0] sm:$0xff]  ;;  %v479_v63 = vpack.c.bf16 %v458_v55, %v457_v54  ;;  %v461_v0 = vmul.f32 0.088388346, %v429_v57  ;;  %v432_v2 = vld [vmem:[%s3800_s7 + $0xd8] sm:$0xff] }
  0xc7   : > { %347 = vst.msk [vmem:[#allocation4 + $0x30] sm:$0xff] %vm308_vm0, %v3462_v4  ;;  %348 = vst.msk [vmem:[#allocation4 + $0x38] sm:$0xff] %vm308_vm0, %v3462_v4  ;;  %v462_v1 = vmul.f32 0.088388346, %v430_v61  ;;  %v433_v3 = vld [vmem:[%s3800_s7 + $0xe0] sm:$0xff]  ;;  %v434_v7 = vld [vmem:[%s3800_s7 + $0xe8] sm:$0xff] }
  0xc8   : > { %349 = vst.msk [vmem:[#allocation4 + $0x40] sm:$0xff] %vm308_vm0, %v3462_v4  ;;  %350 = vst.msk [vmem:[#allocation4 + $0x48] sm:$0xff] %vm308_vm0, %v3462_v4  ;;  %v463_v5 = vmul.f32 0.088388346, %v431_v62  ;;  %v464_v6 = vmul.f32 0.088388346, %v432_v2 }
  0xc9   : > { %351 = vst.msk [vmem:[#allocation4 + $0x50] sm:$0xff] %vm308_vm0, %v3462_v4  ;;  %352 = vst.msk [vmem:[#allocation4 + $0x58] sm:$0xff] %vm308_vm0, %v3462_v4  ;;  %v435_v8 = vld [vmem:[%s3800_s7 + $0xf0] sm:$0xff]  ;;  %v481_v9 = vpack.c.bf16 %v462_v1, %v461_v0  ;;  %v465_v10 = vmul.f32 0.088388346, %v433_v3  ;;  %v436_v12 = vld [vmem:[%s3800_s7 + $0xf8] sm:$0xff] }
  0xca   : > { %353 = vst.msk [vmem:[#allocation4 + $0x60] sm:$0xff] %vm308_vm0, %v3462_v4  ;;  %354 = vst.msk [vmem:[#allocation4 + $0x68] sm:$0xff] %vm308_vm0, %v3462_v4  ;;  %v466_v11 = vmul.f32 0.088388346, %v434_v7  ;;  %v467_v14 = vmul.f32 0.088388346, %v435_v8 }
  0xcb   : > { %355 = vst.msk [vmem:[#allocation4 + $0x70] sm:$0xff] %vm308_vm0, %v3462_v4  ;;  %356 = vst.msk [vmem:[#allocation4 + $0x78] sm:$0xff] %vm308_vm0, %v3462_v4  ;;  %v468_v15 = vmul.f32 0.088388346, %v436_v12 }
  0xcc   : > { %357 = vst.msk [vmem:[#allocation4 + $0x80] sm:$0xff] %vm308_vm0, %v3462_v4  ;;  %358 = vst.msk [vmem:[#allocation4 + $0x88] sm:$0xff] %vm308_vm0, %v3462_v4  ;;  %v483_v16 = vpack.c.bf16 %v466_v11, %v465_v10 }
  0xcd   : > { %359 = vst.msk [vmem:[#allocation4 + $0x90] sm:$0xff] %vm308_vm0, %v3462_v4  ;;  %360 = vst.msk [vmem:[#allocation4 + $0x98] sm:$0xff] %vm308_vm0, %v3462_v4  ;;  %v484_v17 = vpack.c.bf16 %v468_v15, %v467_v14 }
  0xce   : > { %361 = vst.msk [vmem:[#allocation4 + $0xa0] sm:$0xff] %vm308_vm0, %v3462_v4  ;;  %362 = vst.msk [vmem:[#allocation4 + $0xa8] sm:$0xff] %vm308_vm0, %v3462_v4 }
  0xcf   : > { %363 = vst.msk [vmem:[#allocation4 + $0xb0] sm:$0xff] %vm308_vm0, %v3462_v4  ;;  %364 = vst.msk [vmem:[#allocation4 + $0xb8] sm:$0xff] %vm308_vm0, %v3462_v4 }
  0xd0   : > { %365 = vst.msk [vmem:[#allocation4 + $0xc0] sm:$0xff] %vm308_vm0, %v3462_v4  ;;  %366 = vst.msk [vmem:[#allocation4 + $0xc8] sm:$0xff] %vm308_vm0, %v3462_v4 }
  0xd1   : > { %367 = vst.msk [vmem:[#allocation4 + $0xd0] sm:$0xff] %vm308_vm0, %v3462_v4  ;;  %368 = vst.msk [vmem:[#allocation4 + $0xd8] sm:$0xff] %vm308_vm0, %v3462_v4 }
  0xd2   : > { %369 = vst.msk [vmem:[#allocation4 + $0xe0] sm:$0xff] %vm308_vm0, %v3462_v4  ;;  %370 = vst.msk [vmem:[#allocation4 + $0xe8] sm:$0xff] %vm308_vm0, %v3462_v4 }
  0xd3   : > { %371 = vst.msk [vmem:[#allocation4 + $0xf0] sm:$0xff] %vm308_vm0, %v3462_v4  ;;  %372 = vst.msk [vmem:[#allocation4 + $0xf8] sm:$0xff] %vm308_vm0, %v3462_v4 }
  0xd4   : > { %373 = vst [vmem:[#allocation5] sm:$0xff] %v3462_v4  ;;  %374 = vst [vmem:[#allocation5 + $0x8] sm:$0xff] %v3462_v4 }
  0xd5   : > { %375 = vst [vmem:[#allocation5 + $0x10] sm:$0xff] %v3462_v4  ;;  %376 = vst [vmem:[#allocation5 + $0x18] sm:$0xff] %v3462_v4 }
  0xd6   : > { %377 = vst [vmem:[#allocation5 + $0x20] sm:$0xff] %v3462_v4  ;;  %378 = vst [vmem:[#allocation5 + $0x28] sm:$0xff] %v3462_v4 }
  0xd7   : > { %379 = vst [vmem:[#allocation5 + $0x30] sm:$0xff] %v3462_v4  ;;  %380 = vst [vmem:[#allocation5 + $0x38] sm:$0xff] %v3462_v4 }
  0xd8   : > { %381 = vst [vmem:[#allocation5 + $0x40] sm:$0xff] %v3462_v4  ;;  %382 = vst [vmem:[#allocation5 + $0x48] sm:$0xff] %v3462_v4 }
  0xd9   : > { %383 = vst [vmem:[#allocation5 + $0x50] sm:$0xff] %v3462_v4  ;;  %384 = vst [vmem:[#allocation5 + $0x58] sm:$0xff] %v3462_v4 }
  0xda   : > { %385 = vst [vmem:[#allocation5 + $0x60] sm:$0xff] %v3462_v4  ;;  %386 = vst [vmem:[#allocation5 + $0x68] sm:$0xff] %v3462_v4 }
  0xdb   : > { %387 = vst [vmem:[#allocation5 + $0x70] sm:$0xff] %v3462_v4  ;;  %388 = vst [vmem:[#allocation5 + $0x78] sm:$0xff] %v3462_v4 }
  0xdc   : > { %389 = vst [vmem:[#allocation5 + $0x80] sm:$0xff] %v3462_v4  ;;  %390 = vst [vmem:[#allocation5 + $0x88] sm:$0xff] %v3462_v4 }
  0xdd   : > { %391 = vst [vmem:[#allocation5 + $0x90] sm:$0xff] %v3462_v4  ;;  %392 = vst [vmem:[#allocation5 + $0x98] sm:$0xff] %v3462_v4 }
  0xde   : > { %393 = vst [vmem:[#allocation5 + $0xa0] sm:$0xff] %v3462_v4  ;;  %394 = vst [vmem:[#allocation5 + $0xa8] sm:$0xff] %v3462_v4 }
  0xdf   : > { %395 = vst [vmem:[#allocation5 + $0xb0] sm:$0xff] %v3462_v4  ;;  %396 = vst [vmem:[#allocation5 + $0xb8] sm:$0xff] %v3462_v4 }
  0xe0   : > { %397 = vst [vmem:[#allocation5 + $0xc0] sm:$0xff] %v3462_v4  ;;  %398 = vst [vmem:[#allocation5 + $0xc8] sm:$0xff] %v3462_v4 }
  0xe1   : > { %399 = vst [vmem:[#allocation5 + $0xd0] sm:$0xff] %v3462_v4  ;;  %400 = vst [vmem:[#allocation5 + $0xd8] sm:$0xff] %v3462_v4 }
  0xe2   : > { %401 = vst [vmem:[#allocation5 + $0xe0] sm:$0xff] %v3462_v4  ;;  %402 = vst [vmem:[#allocation5 + $0xe8] sm:$0xff] %v3462_v4 }
  0xe3   : > { %403 = vst [vmem:[#allocation5 + $0xf0] sm:$0xff] %v3462_v4  ;;  %404 = vst [vmem:[#allocation5 + $0xf8] sm:$0xff] %v3462_v4  ;;  %v480_v4 = vpack.c.bf16 %v460_v60, %v459_v59 }
  0xe4   : > { %485 = vst [vmem:[#allocation2] sm:$0xff] %v469_v13  ;;  %486 = vst [vmem:[#allocation2 + $0x8] sm:$0xff] %v470_v18  ;;  %v482_v13 = vpack.c.bf16 %v464_v6, %v463_v5 }
  0xe5   : > { %487 = vst [vmem:[#allocation2 + $0x10] sm:$0xff] %v471_v23  ;;  %488 = vst [vmem:[#allocation2 + $0x18] sm:$0xff] %v472_v28 }
  0xe6   : > { %489 = vst [vmem:[#allocation2 + $0x20] sm:$0xff] %v473_v33  ;;  %490 = vst [vmem:[#allocation2 + $0x28] sm:$0xff] %v474_v38 }
  0xe7   : > { %491 = vst [vmem:[#allocation2 + $0x30] sm:$0xff] %v475_v43  ;;  %492 = vst [vmem:[#allocation2 + $0x38] sm:$0xff] %v476_v48 }
  0xe8   : > { %493 = vst [vmem:[#allocation2 + $0x40] sm:$0xff] %v477_v53  ;;  %494 = vst [vmem:[#allocation2 + $0x48] sm:$0xff] %v478_v58 }
  0xe9   : > { %495 = vst [vmem:[#allocation2 + $0x50] sm:$0xff] %v479_v63  ;;  %496 = vst [vmem:[#allocation2 + $0x58] sm:$0xff] %v480_v4 }
  0xea   : > { %497 = vst [vmem:[#allocation2 + $0x60] sm:$0xff] %v481_v9  ;;  %498 = vst [vmem:[#allocation2 + $0x68] sm:$0xff] %v482_v13 }
  0xeb   : > { %499 = vst [vmem:[#allocation2 + $0x70] sm:$0xff] %v483_v16  ;;  %500 = vst [vmem:[#allocation2 + $0x78] sm:$0xff] %v484_v17 }
  0xec PF: > { %v517_v18 = vld [vmem:[%s3808_s13 + $0x80] sm:$0xff]  ;;  %v518_v19 = vld [vmem:[%s3808_s13 + $0x88] sm:$0xff]  ;;  %v519_v23 = vld [vmem:[%s3808_s13 + $0x90] sm:$0xff]  ;;  %vm1558_vm1 = vcmask 7168   ;;  %s5556_s5 = sld [smem:[#allocation19_spill]] }
  0xed   : > { %v501_v20 = vld [vmem:[%s3808_s13] sm:$0xff]  ;;  %v541_v21 = vpack.c.bf16 %v518_v19, %v517_v18  ;;  %v502_v22 = vld [vmem:[%s3808_s13 + $0x8] sm:$0xff]  ;;  %v520_v24 = vld [vmem:[%s3808_s13 + $0x98] sm:$0xff] }
  0xee   : > { %v533_v25 = vpack.c.bf16 %v502_v22, %v501_v20  ;;  %v542_v26 = vpack.c.bf16 %v520_v24, %v519_v23  ;;  %v503_v27 = vld [vmem:[%s3808_s13 + $0x10] sm:$0xff]  ;;  %v504_v28 = vld [vmem:[%s3808_s13 + $0x18] sm:$0xff]  ;;  %v521_v29 = vld [vmem:[%s3808_s13 + $0xa0] sm:$0xff] }
  0xef   : > { %2666 = vmatprep.subr.bf16.mxu0 %v541_v21  ;;  %v522_v30 = vld [vmem:[%s3808_s13 + $0xa8] sm:$0xff]  ;;  %v534_v31 = vpack.c.bf16 %v504_v28, %v503_v27  ;;  %v549_v33 = vld [vmem:[#allocation2] sm:$0xff]  ;;  %v523_v36 = vld [vmem:[%s3808_s13 + $0xb0] sm:$0xff] }
  0xf0   : > { %2667 = vmatpush3.bf16.xpose.msra.mxu0 %v533_v25  ;;  %v543_v32 = vpack.c.bf16 %v522_v30, %v521_v29  ;;  %2682 = vmatprep.mubr.bf16.mxu0 %v549_v33  ;;  %v505_v34 = vld [vmem:[%s3808_s13 + $0x20] sm:$0xff]  ;;  %v506_v35 = vld [vmem:[%s3808_s13 + $0x28] sm:$0xff]  ;;  %v524_v37 = vld [vmem:[%s3808_s13 + $0xb8] sm:$0xff] }
  0xf1   : > { %2668 = vmatprep.subr.bf16.mxu0 %v542_v26  ;;  %v535_v38 = vpack.c.bf16 %v506_v35, %v505_v34  ;;  %v544_v39 = vpack.c.bf16 %v524_v37, %v523_v36  ;;  %v507_v40 = vld [vmem:[%s3808_s13 + $0x30] sm:$0xff]  ;;  %v508_v41 = vld [vmem:[%s3808_s13 + $0x38] sm:$0xff]  ;;  %v525_v42 = vld [vmem:[%s3808_s13 + $0xc0] sm:$0xff]  ;;  %v3463_v35 = vmov 0  }
  0xf2   : > { %v526_v43 = vld [vmem:[%s3808_s13 + $0xc8] sm:$0xff]  ;;  %v536_v44 = vpack.c.bf16 %v508_v41, %v507_v40  ;;  %v509_v46 = vld [vmem:[%s3808_s13 + $0x40] sm:$0xff]  ;;  %v527_v48 = vld [vmem:[%s3808_s13 + $0xd0] sm:$0xff]  ;;  %2962 = vset.pattern.permute.xlu0 %v3463_v35  ;;  %2963 = vset.pattern.permute.xlu1 %v3463_v35  ;;  %p2659_p12 = scmp.ne.s32.totalorder %s5556_s5, 1 }
  0xf3   : > { %v545_v45 = vpack.c.bf16 %v526_v43, %v525_v42  ;;  %v510_v47 = vld [vmem:[%s3808_s13 + $0x48] sm:$0xff]  ;;  %v528_v49 = vld [vmem:[%s3808_s13 + $0xd8] sm:$0xff]  ;;  %v511_v52 = vld [vmem:[%s3808_s13 + $0x50] sm:$0xff] }
  0xf4   : > { %v537_v50 = vpack.c.bf16 %v510_v47, %v509_v46  ;;  %v546_v51 = vpack.c.bf16 %v528_v49, %v527_v48  ;;  %v512_v53 = vld [vmem:[%s3808_s13 + $0x58] sm:$0xff]  ;;  %v529_v54 = vld [vmem:[%s3808_s13 + $0xe0] sm:$0xff]  ;;  %v530_v55 = vld [vmem:[%s3808_s13 + $0xe8] sm:$0xff] }
  0xf5   : > { %v538_v56 = vpack.c.bf16 %v512_v53, %v511_v52  ;;  %v547_v57 = vpack.c.bf16 %v530_v55, %v529_v54  ;;  %v513_v58 = vld [vmem:[%s3808_s13 + $0x60] sm:$0xff]  ;;  %v514_v59 = vld [vmem:[%s3808_s13 + $0x68] sm:$0xff]  ;;  %v531_v60 = vld [vmem:[%s3808_s13 + $0xf0] sm:$0xff] }
  0xf6   : > { %v532_v61 = vld [vmem:[%s3808_s13 + $0xf8] sm:$0xff]  ;;  %v539_v62 = vpack.c.bf16 %v514_v59, %v513_v58  ;;  %v515_v0 = vld [vmem:[%s3808_s13 + $0x70] sm:$0xff]  ;;  %v550_v3 = vld [vmem:[#allocation2 + $0x8] sm:$0xff] }
  0xf7   : > { %v548_v63 = vpack.c.bf16 %v532_v61, %v531_v60  ;;  %v516_v1 = vld [vmem:[%s3808_s13 + $0x78] sm:$0xff]  ;;  %v551_v4 = vld [vmem:[#allocation2 + $0x10] sm:$0xff]  ;;  %v553_v6 = vld [vmem:[#allocation2 + $0x20] sm:$0xff] }
  0xf8   : > { %2669 = vmatpush3.bf16.xpose.msra.mxu0 %v534_v31  ;;  %v540_v2 = vpack.c.bf16 %v516_v1, %v515_v0  ;;  %v552_v5 = vld [vmem:[#allocation2 + $0x18] sm:$0xff]  ;;  %v554_v7 = vld [vmem:[#allocation2 + $0x28] sm:$0xff]  ;;  %v555_v8 = vld [vmem:[#allocation2 + $0x30] sm:$0xff] }
  0xf9   : > { %2670 = vmatprep.subr.bf16.mxu0 %v543_v32  ;;  %v556_v9 = vld [vmem:[#allocation2 + $0x38] sm:$0xff]  ;;  %v557_v10 = vld [vmem:[#allocation2 + $0x40] sm:$0xff]  ;;  %v558_v11 = vld [vmem:[#allocation2 + $0x48] sm:$0xff] }
  0xfa   : > { %v559_v12 = vld [vmem:[#allocation2 + $0x50] sm:$0xff]  ;;  %v560_v13 = vld [vmem:[#allocation2 + $0x58] sm:$0xff]  ;;  %v561_v14 = vld [vmem:[#allocation2 + $0x60] sm:$0xff] }
  0xfb   : > { %v562_v15 = vld [vmem:[#allocation2 + $0x68] sm:$0xff]  ;;  %v563_v16 = vld [vmem:[#allocation2 + $0x70] sm:$0xff]  ;;  %v564_v17 = vld [vmem:[#allocation2 + $0x78] sm:$0xff] }
 0x100   : > { %2671 = vmatpush3.bf16.xpose.msra.mxu0 %v535_v38 }
 0x101   : > { %2672 = vmatprep.subr.bf16.mxu0 %v544_v39 }
 0x108   : > { %2673 = vmatpush3.bf16.xpose.msra.mxu0 %v536_v44 }
 0x109   : > { %2674 = vmatprep.subr.bf16.mxu0 %v545_v45 }
 0x110   : > { %2675 = vmatpush3.bf16.xpose.msra.mxu0 %v537_v50 }
 0x111   : > { %2676 = vmatprep.subr.bf16.mxu0 %v546_v51 }
 0x118   : > { %2677 = vmatpush3.bf16.xpose.msra.mxu0 %v538_v56 }
 0x119   : > { %2678 = vmatprep.subr.bf16.mxu0 %v547_v57 }
 0x120   : > { %2679 = vmatpush3.bf16.xpose.msra.mxu0 %v539_v62 }
 0x121   : > { %2680 = vmatprep.subr.bf16.mxu0 %v548_v63 }
 0x128   : > { %2681 = vmatpush3.bf16.xpose.msra.mxu0 %v540_v2 }
 0x12f   : > { %2683 = vmatmul.mubr.bf16.vlgmr.msra.gmra.mrb[0].mxu0 %v549_v33 }
 0x130   : > { %2684 = vmatprep.mubr.bf16.mxu0 %v550_v3 }
 0x137   : > { %2685 = vmatmul.mubr.bf16.gmra.mrb[4].mxu0 %v550_v3 }
 0x138   : > { %2686 = vmatprep.mubr.bf16.mxu0 %v551_v4 }
 0x13f   : > { %2687 = vmatmul.mubr.bf16.gmra.mrb[8].mxu0 %v551_v4 }
 0x140   : > { %2688 = vmatprep.mubr.bf16.mxu0 %v552_v5 }
 0x147   : > { %2689 = vmatmul.mubr.bf16.gmra.mrb[12].mxu0 %v552_v5 }
 0x148   : > { %2690 = vmatprep.mubr.bf16.mxu0 %v553_v6 }
 0x14f   : > { %2691 = vmatmul.mubr.bf16.gmra.mrb[16].mxu0 %v553_v6 }
 0x150   : > { %2692 = vmatprep.mubr.bf16.mxu0 %v554_v7 }
 0x157   : > { %2693 = vmatmul.mubr.bf16.gmra.mrb[20].mxu0 %v554_v7 }
 0x158   : > { %2694 = vmatprep.mubr.bf16.mxu0 %v555_v8 }
 0x15f   : > { %2695 = vmatmul.mubr.bf16.gmra.mrb[24].mxu0 %v555_v8 }
 0x160   : > { %2696 = vmatprep.mubr.bf16.mxu0 %v556_v9 }
 0x167   : > { %2697 = vmatmul.mubr.bf16.gmra.mrb[28].mxu0 %v556_v9 }
 0x168   : > { %2698 = vmatprep.mubr.bf16.mxu0 %v557_v10 }
 0x16f   : > { %2699 = vmatmul.mubr.bf16.gmra.mrb[32].mxu0 %v557_v10 }
 0x170   : > { %2700 = vmatprep.mubr.bf16.mxu0 %v558_v11 }
 0x177   : > { %2701 = vmatmul.mubr.bf16.gmra.mrb[36].mxu0 %v558_v11 }
 0x178   : > { %2702 = vmatprep.mubr.bf16.mxu0 %v559_v12 }
 0x17f   : > { %2703 = vmatmul.mubr.bf16.gmra.mrb[40].mxu0 %v559_v12 }
 0x180   : > { %2704 = vmatprep.mubr.bf16.mxu0 %v560_v13 }
 0x187   : > { %2705 = vmatmul.mubr.bf16.gmra.mrb[44].mxu0 %v560_v13 }
 0x188   : > { %2706 = vmatprep.mubr.bf16.mxu0 %v561_v14 }
 0x18f   : > { %2707 = vmatmul.mubr.bf16.gmra.mrb[48].mxu0 %v561_v14 }
 0x190   : > { %2708 = vmatprep.mubr.bf16.mxu0 %v562_v15 }
 0x197   : > { %2709 = vmatmul.mubr.bf16.gmra.mrb[52].mxu0 %v562_v15 }
 0x198   : > { %2710 = vmatprep.mubr.bf16.mxu0 %v563_v16 }
 0x19f   : > { %2711 = vmatmul.mubr.bf16.gmra.mrb[56].mxu0 %v563_v16 }
 0x1a0   : > { %2712 = vmatprep.mubr.bf16.mxu0 %v564_v17 }
 0x1a7   : > { %2713 = vmatmul.mubr.bf16.gmra.mrb[60].mxu0 %v564_v17 }
 0x202   : > { %v4020_v18 = vpop.f32.mrb[0].mxu0 }
 0x203   : > { %v4022_v19 = vpop.f32.mrb[1].mxu0 }
 0x204   : > { %v4024_v20 = vpop.f32.mrb[2].mxu0  ;;  %v790_v21 = vmax.f32 %v4020_v18, %v4022_v19 }
 0x205   : > { %v4028_v22 = vpop.f32.mrb[3].mxu0 }
 0x206   : > { %791 = vmax.xlane.f32.xlu0 %v790_v21  ;;  %v793_v23 = vmax.f32 %v4024_v20, %v4028_v22 }
 0x20a   : > { %794 = vmax.xlane.f32.xlu0 %v793_v23  ;;  %v4032_v24 = vpop.f32.mrb[4].mxu0 }
 0x20b   : > { %v4034_v25 = vpop.f32.mrb[5].mxu0 }
 0x20c   : > { %v4036_v26 = vpop.f32.mrb[6].mxu0  ;;  %v796_v27 = vmax.f32 %v4032_v24, %v4034_v25 }
 0x20d   : > { %v4040_v28 = vpop.f32.mrb[7].mxu0 }
 0x20e   : > { %797 = vmax.xlane.f32.xlu1 %v796_v27  ;;  %v799_v29 = vmax.f32 %v4036_v26, %v4040_v28 }
 0x212   : > { %800 = vmax.xlane.f32.xlu1 %v799_v29  ;;  %v4044_v30 = vpop.f32.mrb[8].mxu0 }
 0x213   : > { %v4046_v31 = vpop.f32.mrb[9].mxu0 }
 0x214   : > { %v4048_v32 = vpop.f32.mrb[10].mxu0  ;;  %v802_v33 = vmax.f32 %v4044_v30, %v4046_v31 }
 0x215   : > { %v4052_v34 = vpop.f32.mrb[11].mxu0 }
 0x216   : > { %803 = vmax.xlane.f32.xlu0 %v802_v33  ;;  %v805_v36 = vmax.f32 %v4048_v32, %v4052_v34 }
 0x218   : > { %806 = vmax.xlane.f32.xlu1 %v805_v36 }
 0x21a   : > { %v4056_v37 = vpop.f32.mrb[12].mxu0 }
 0x21b   : > { %v4058_v38 = vpop.f32.mrb[13].mxu0 }
 0x21c   : > { %v4060_v39 = vpop.f32.mrb[14].mxu0  ;;  %v808_v40 = vmax.f32 %v4056_v37, %v4058_v38 }
 0x21d   : > { %v4064_v41 = vpop.f32.mrb[15].mxu0 }
 0x21e   : > { %809 = vmax.xlane.f32.xlu0 %v808_v40  ;;  %v811_v42 = vmax.f32 %v4060_v39, %v4064_v41 }
 0x220   : > { %812 = vmax.xlane.f32.xlu1 %v811_v42 }
 0x222   : > { %v4068_v43 = vpop.f32.mrb[16].mxu0 }
 0x223   : > { %v4070_v44 = vpop.f32.mrb[17].mxu0 }
 0x224   : > { %v4072_v45 = vpop.f32.mrb[18].mxu0  ;;  %v814_v46 = vmax.f32 %v4068_v43, %v4070_v44 }
 0x225   : > { %v4076_v47 = vpop.f32.mrb[19].mxu0 }
 0x226   : > { %815 = vmax.xlane.f32.xlu0 %v814_v46  ;;  %v817_v48 = vmax.f32 %v4072_v45, %v4076_v47 }
 0x228   : > { %818 = vmax.xlane.f32.xlu1 %v817_v48 }
 0x22a   : > { %v4080_v49 = vpop.f32.mrb[20].mxu0 }
 0x22b   : > { %v4082_v50 = vpop.f32.mrb[21].mxu0 }
 0x22c   : > { %v4084_v51 = vpop.f32.mrb[22].mxu0  ;;  %v820_v52 = vmax.f32 %v4080_v49, %v4082_v50 }
 0x22d   : > { %v4088_v53 = vpop.f32.mrb[23].mxu0 }
 0x22e   : > { %821 = vmax.xlane.f32.xlu0 %v820_v52  ;;  %v823_v54 = vmax.f32 %v4084_v51, %v4088_v53 }
 0x230   : > { %824 = vmax.xlane.f32.xlu1 %v823_v54 }
 0x232   : > { %v4092_v55 = vpop.f32.mrb[24].mxu0 }
 0x233   : > { %5344 = vst [vmem:[#allocation31_spill] sm:$0xff] %v4092_v55  ;;  %v4094_v56 = vpop.f32.mrb[25].mxu0 }
 0x234   : > { %5345 = vst [vmem:[#allocation32_spill] sm:$0xff] %v4094_v56  ;;  %v4096_v57 = vpop.f32.mrb[26].mxu0  ;;  %v826_v58 = vmax.f32 %v4092_v55, %v4094_v56 }
 0x235   : > { %5346 = vst [vmem:[#allocation33_spill] sm:$0xff] %v4096_v57  ;;  %v4100_v59 = vpop.f32.mrb[27].mxu0 }
 0x236   : > { %5347 = vst [vmem:[#allocation34_spill] sm:$0xff] %v4100_v59  ;;  %827 = vmax.xlane.f32.xlu0 %v826_v58  ;;  %v829_v60 = vmax.f32 %v4096_v57, %v4100_v59  ;;  %v4382_v59 = vld [vmem:[#allocation3 + $0x70] sm:$0xff]  ;;  %v4384_v57 = vld [vmem:[#allocation3 + $0x78] sm:$0xff] }
 0x237   : > { %5390 = vst [vmem:[#allocation77_spill] sm:$0xff] %v4382_v59  ;;  %5391 = vst [vmem:[#allocation78_spill] sm:$0xff] %v4384_v57 }
 0x238   : > { %830 = vmax.xlane.f32.xlu1 %v829_v60 }
 0x23a   : > { %v4104_v61 = vpop.f32.mrb[28].mxu0 }
 0x23b   : > { %5348 = vst [vmem:[#allocation35_spill] sm:$0xff] %v4104_v61  ;;  %v4106_v62 = vpop.f32.mrb[29].mxu0 }
 0x23c   : > { %5349 = vst [vmem:[#allocation36_spill] sm:$0xff] %v4106_v62  ;;  %v4108_v63 = vpop.f32.mrb[30].mxu0  ;;  %v832_v0 = vmax.f32 %v4104_v61, %v4106_v62 }
 0x23d   : > { %5350 = vst [vmem:[#allocation37_spill] sm:$0xff] %v4108_v63  ;;  %v4112_v1 = vpop.f32.mrb[31].mxu0 }
 0x23e   : > { %5351 = vst [vmem:[#allocation38_spill] sm:$0xff] %v4112_v1  ;;  %833 = vmax.xlane.f32.xlu0 %v832_v0  ;;  %v835_v2 = vmax.f32 %v4108_v63, %v4112_v1  ;;  %v4366_v1 = vld [vmem:[#allocation3 + $0x68] sm:$0xff] }
 0x23f   : > { %5389 = vst [vmem:[#allocation76_spill] sm:$0xff] %v4366_v1 }
 0x240   : > { %836 = vmax.xlane.f32.xlu1 %v835_v2 }
 0x242   : > { %v4116_v3 = vpop.f32.mrb[32].mxu0 }
 0x243   : > { %5352 = vst [vmem:[#allocation39_spill] sm:$0xff] %v4116_v3  ;;  %v4118_v4 = vpop.f32.mrb[33].mxu0 }
 0x244   : > { %5353 = vst [vmem:[#allocation40_spill] sm:$0xff] %v4118_v4  ;;  %v4120_v5 = vpop.f32.mrb[34].mxu0  ;;  %v838_v6 = vmax.f32 %v4116_v3, %v4118_v4 }
 0x245   : > { %5354 = vst [vmem:[#allocation41_spill] sm:$0xff] %v4120_v5  ;;  %v4124_v7 = vpop.f32.mrb[35].mxu0 }
 0x246   : > { %5355 = vst [vmem:[#allocation42_spill] sm:$0xff] %v4124_v7  ;;  %839 = vmax.xlane.f32.xlu0 %v838_v6  ;;  %v841_v8 = vmax.f32 %v4120_v5, %v4124_v7  ;;  %v1862_v7 = vld [vmem:[%s3814_s12 + $0x78] sm:$0xff] }
 0x248   : > { %842 = vmax.xlane.f32.xlu1 %v841_v8 }
 0x24a   : > { %v4128_v9 = vpop.f32.mrb[36].mxu0 }
 0x24b   : > { %5356 = vst [vmem:[#allocation43_spill] sm:$0xff] %v4128_v9  ;;  %v4130_v10 = vpop.f32.mrb[37].mxu0 }
 0x24c   : > { %5357 = vst [vmem:[#allocation44_spill] sm:$0xff] %v4130_v10  ;;  %v4132_v11 = vpop.f32.mrb[38].mxu0  ;;  %v844_v12 = vmax.f32 %v4128_v9, %v4130_v10 }
 0x24d   : > { %5358 = vst [vmem:[#allocation45_spill] sm:$0xff] %v4132_v11  ;;  %v4136_v13 = vpop.f32.mrb[39].mxu0 }
 0x24e   : > { %5359 = vst [vmem:[#allocation46_spill] sm:$0xff] %v4136_v13  ;;  %845 = vmax.xlane.f32.xlu0 %v844_v12  ;;  %v847_v14 = vmax.f32 %v4132_v11, %v4136_v13  ;;  %v1851_v13 = vld [vmem:[%s3814_s12 + $0x20] sm:$0xff] }
 0x250   : > { %848 = vmax.xlane.f32.xlu1 %v847_v14 }
 0x252   : > { %v4140_v15 = vpop.f32.mrb[40].mxu0 }
 0x253   : > { %5360 = vst [vmem:[#allocation47_spill] sm:$0xff] %v4140_v15  ;;  %v4142_v16 = vpop.f32.mrb[41].mxu0 }
 0x254   : > { %5361 = vst [vmem:[#allocation48_spill] sm:$0xff] %v4142_v16  ;;  %v4144_v17 = vpop.f32.mrb[42].mxu0  ;;  %v850_v21 = vmax.f32 %v4140_v15, %v4142_v16  ;;  %v1849_v16 = vld [vmem:[%s3814_s12 + $0x10] sm:$0xff]  ;;  %v1850_v15 = vld [vmem:[%s3814_s12 + $0x18] sm:$0xff] }
 0x255   : > { %5362 = vst [vmem:[#allocation49_spill] sm:$0xff] %v4144_v17  ;;  %v4148_v23 = vpop.f32.mrb[43].mxu0 }
 0x256   : > { %5363 = vst [vmem:[#allocation50_spill] sm:$0xff] %v4148_v23  ;;  %851 = vmax.xlane.f32.xlu1 %v850_v21  ;;  %v853_v27 = vmax.f32 %v4144_v17, %v4148_v23 }
 0x258   : > { %854 = vmax.xlane.f32.xlu0 %v853_v27 }
 0x25a   : > { %v4152_v29 = vpop.f32.mrb[44].mxu0 }
 0x25b   : > { %5364 = vst [vmem:[#allocation51_spill] sm:$0xff] %v4152_v29  ;;  %v4154_v33 = vpop.f32.mrb[45].mxu0 }
 0x25c   : > { %5365 = vst [vmem:[#allocation52_spill] sm:$0xff] %v4154_v33  ;;  %v4156_v35 = vpop.f32.mrb[46].mxu0  ;;  %v856_v36 = vmax.f32 %v4152_v29, %v4154_v33  ;;  %v1848_v33 = vld [vmem:[%s3814_s12 + $0x8] sm:$0xff] }
 0x25d   : > { %5366 = vst [vmem:[#allocation53_spill] sm:$0xff] %v4156_v35  ;;  %v4160_v40 = vpop.f32.mrb[47].mxu0 }
 0x25e   : > { %5367 = vst [vmem:[#allocation54_spill] sm:$0xff] %v4160_v40  ;;  %857 = vmax.xlane.f32.xlu1 %v856_v36  ;;  %v859_v42 = vmax.f32 %v4156_v35, %v4160_v40 }
 0x260   : > { %860 = vmax.xlane.f32.xlu0 %v859_v42 }
 0x262   : > { %v4164_v46 = vpop.f32.mrb[48].mxu0 }
 0x263   : > { %5368 = vst [vmem:[#allocation55_spill] sm:$0xff] %v4164_v46  ;;  %v4166_v48 = vpop.f32.mrb[49].mxu0 }
 0x264   : > { %5369 = vst [vmem:[#allocation56_spill] sm:$0xff] %v4166_v48  ;;  %v4168_v52 = vpop.f32.mrb[50].mxu0  ;;  %v862_v54 = vmax.f32 %v4164_v46, %v4166_v48  ;;  %v1864_v48 = vld [vmem:[%s3814_s12 + $0x88] sm:$0xff]  ;;  %v1847_v46 = vld [vmem:[%s3814_s12] sm:$0xff] }
 0x265   : > { %5370 = vst [vmem:[#allocation57_spill] sm:$0xff] %v4168_v52  ;;  %v4172_v58 = vpop.f32.mrb[51].mxu0  ;;  %v1879_v29 = vpack.c.bf16 %v1848_v33, %v1847_v46  ;;  %v1852_v33 = vld [vmem:[%s3814_s12 + $0x28] sm:$0xff] }
 0x266   : > { %5371 = vst [vmem:[#allocation58_spill] sm:$0xff] %v4172_v58  ;;  %863 = vmax.xlane.f32.xlu0 %v862_v54  ;;  %v865_v60 = vmax.f32 %v4168_v52, %v4172_v58  ;;  %v1881_v46 = vpack.c.bf16 %v1852_v33, %v1851_v13  ;;  %v4243_v33 = vld [vmem:[#allocation3 + $0x10] sm:$0xff]  ;;  %v4271_v58 = vld [vmem:[#allocation3 + $0x20] sm:$0xff] }
 0x268   : > { %866 = vmax.xlane.f32.xlu1 %v865_v60 }
 0x26a   : > { %v4176_v0 = vpop.f32.mrb[52].mxu0 }
 0x26b   : > { %5372 = vst [vmem:[#allocation59_spill] sm:$0xff] %v4176_v0  ;;  %v4178_v2 = vpop.f32.mrb[53].mxu0 }
 0x26c   : > { %5373 = vst [vmem:[#allocation60_spill] sm:$0xff] %v4178_v2  ;;  %v4180_v6 = vpop.f32.mrb[54].mxu0  ;;  %v868_v8 = vmax.f32 %v4176_v0, %v4178_v2  ;;  %v4220_v0 = vld [vmem:[#allocation3] sm:$0xff] }
 0x26d   : > { %5374 = vst [vmem:[#allocation61_spill] sm:$0xff] %v4180_v6  ;;  %v4184_v12 = vpop.f32.mrb[55].mxu0 }
 0x26e   : > { %5375 = vst [vmem:[#allocation62_spill] sm:$0xff] %v4184_v12  ;;  %869 = vmax.xlane.f32.xlu1 %v868_v8  ;;  %v871_v14 = vmax.f32 %v4180_v6, %v4184_v12  ;;  %v1880_v12 = vpack.c.bf16 %v1850_v15, %v1849_v16  ;;  %v4229_v15 = vld [vmem:[#allocation3 + $0x8] sm:$0xff]  ;;  %v4257_v16 = vld [vmem:[#allocation3 + $0x18] sm:$0xff] }
 0x270   : > { %872 = vmax.xlane.f32.xlu0 %v871_v14 }
 0x272   : > { %v4188_v21 = vpop.f32.mrb[56].mxu0 }
 0x273   : > { %5376 = vst [vmem:[#allocation63_spill] sm:$0xff] %v4188_v21  ;;  %v4190_v27 = vpop.f32.mrb[57].mxu0 }
 0x274   : > { %5377 = vst [vmem:[#allocation64_spill] sm:$0xff] %v4190_v27  ;;  %v4192_v36 = vpop.f32.mrb[58].mxu0  ;;  %v874_v42 = vmax.f32 %v4188_v21, %v4190_v27 }
 0x275   : > { %5378 = vst [vmem:[#allocation65_spill] sm:$0xff] %v4192_v36  ;;  %v4196_v54 = vpop.f32.mrb[59].mxu0 }
 0x276   : > { %5379 = vst [vmem:[#allocation66_spill] sm:$0xff] %v4196_v54  ;;  %v877_v60 = vmax.f32 %v4192_v36, %v4196_v54  ;;  %875 = vmax.xlane.f32.xlu0 %v874_v42  ;;  %v1863_v42 = vld [vmem:[%s3814_s12 + $0x80] sm:$0xff]  ;;  %v1865_v54 = vld [vmem:[%s3814_s12 + $0x90] sm:$0xff]  ;;  %v1866_v36 = vld [vmem:[%s3814_s12 + $0x98] sm:$0xff] }
 0x277   : > { %v1888_v27 = vpack.c.bf16 %v1866_v36, %v1865_v54 }
 0x278   : > { %878 = vmax.xlane.f32.xlu1 %v877_v60  ;;  %v1887_v60 = vpack.c.bf16 %v1864_v48, %v1863_v42  ;;  %v1867_v48 = vld [vmem:[%s3814_s12 + $0xa0] sm:$0xff]  ;;  %v1868_v42 = vld [vmem:[%s3814_s12 + $0xa8] sm:$0xff] }
 0x279   : > { %v1889_v6 = vpack.c.bf16 %v1868_v42, %v1867_v48 }
 0x27a   : > { %v4200_v8 = vpop.f32.mrb[60].mxu0  ;;  %2714 = vmatprep.subr.bf16.mxu1 %v1887_v60  ;;  %v1854_v60 = vld [vmem:[%s3814_s12 + $0x38] sm:$0xff] }
 0x27b   : > { %5380 = vst [vmem:[#allocation67_spill] sm:$0xff] %v4200_v8  ;;  %v4202_v14 = vpop.f32.mrb[61].mxu0  ;;  %2715 = vmatpush3.bf16.msra.mxu1 %v1879_v29 }
 0x27c   : > { %5381 = vst [vmem:[#allocation68_spill] sm:$0xff] %v4202_v14  ;;  %v4204_v2 = vpop.f32.mrb[62].mxu0  ;;  %2716 = vmatprep.subr.bf16.mxu1 %v1888_v27  ;;  %v1870_v27 = vld [vmem:[%s3814_s12 + $0xb8] sm:$0xff] }
 0x27d   : > { %5382 = vst [vmem:[#allocation69_spill] sm:$0xff] %v4204_v2  ;;  %v4208_v21 = vpop.f32.mrb[63].mxu0 }
 0x27e   : > { %5383 = vst [vmem:[#allocation70_spill] sm:$0xff] %v4208_v21 }
 0x27f   : > { %2717 = vmatpush3.bf16.msra.mxu1 %v1880_v12  ;;  %v1869_v12 = vld [vmem:[%s3814_s12 + $0xb0] sm:$0xff] }
 0x280   : > { %2718 = vmatprep.subr.bf16.mxu1 %v1889_v6  ;;  %v1890_v54 = vpack.c.bf16 %v1870_v27, %v1869_v12  ;;  %v1853_v6 = vld [vmem:[%s3814_s12 + $0x30] sm:$0xff]  ;;  %v1872_v12 = vld [vmem:[%s3814_s12 + $0xc8] sm:$0xff] }
 0x281   : > { %v1882_v42 = vpack.c.bf16 %v1854_v60, %v1853_v6  ;;  %v1855_v6 = vld [vmem:[%s3814_s12 + $0x40] sm:$0xff]  ;;  %v1856_v60 = vld [vmem:[%s3814_s12 + $0x48] sm:$0xff] }
 0x283   : > { %2719 = vmatpush3.bf16.msra.mxu1 %v1881_v46  ;;  %v1871_v46 = vld [vmem:[%s3814_s12 + $0xc0] sm:$0xff] }
 0x284   : > { %2720 = vmatprep.subr.bf16.mxu1 %v1890_v54 }
 0x287   : > { %2721 = vmatpush3.bf16.msra.mxu1 %v1882_v42  ;;  %v1873_v42 = vld [vmem:[%s3814_s12 + $0xd0] sm:$0xff] }
 0x293   : > { %v792_v29 = vpop.xlane.xlu0 %791 }
 0x294   : > { %v4227_v36 = vmax.f32 %v4220_v0, %v792_v29  ;;  %v1883_v29 = vpack.c.bf16 %v1856_v60, %v1855_v6  ;;  %v1857_v6 = vld [vmem:[%s3814_s12 + $0x50] sm:$0xff]  ;;  %v1858_v60 = vld [vmem:[%s3814_s12 + $0x58] sm:$0xff] }
 0x295   : > { %v1884_v11 = vpack.c.bf16 %v1858_v60, %v1857_v6  ;;  %v1860_v60 = vld [vmem:[%s3814_s12 + $0x68] sm:$0xff] }
 0x296   : > { %2120 = vst.msk [vmem:[#allocation3] sm:$0xff] %vm1558_vm1, %v4227_v36  ;;  %1016 = vperm.xlu0 %2962, %v4227_v36  }
 0x297   : > { %v795_v13 = vpop.xlane.xlu0 %794 }
 0x298   : > { %v4241_v48 = vmax.f32 %v4229_v15, %v795_v13  ;;  %v1891_v13 = vpack.c.bf16 %v1872_v12, %v1871_v46  ;;  %v1874_v46 = vld [vmem:[%s3814_s12 + $0xd8] sm:$0xff] }
 0x29a   : > { %2121 = vst.msk [vmem:[#allocation3 + $0x8] sm:$0xff] %vm1558_vm1, %v4241_v48  ;;  %1021 = vperm.xlu1 %2963, %v4241_v48   ;;  %2722 = vmatprep.subr.bf16.mxu1 %v1891_v13 }
 0x29b   : > { %v798_v27 = vpop.xlane.xlu1 %797  ;;  %2723 = vmatpush3.bf16.msra.mxu1 %v1883_v29  ;;  %v1875_v29 = vld [vmem:[%s3814_s12 + $0xe0] sm:$0xff] }
 0x29c   : > { %v4255_v54 = vmax.f32 %v4243_v33, %v798_v27  ;;  %v1892_v27 = vpack.c.bf16 %v1874_v46, %v1873_v42  ;;  %v1876_v42 = vld [vmem:[%s3814_s12 + $0xe8] sm:$0xff] }
 0x29d   : > { %v1893_v6 = vpack.c.bf16 %v1876_v42, %v1875_v29  ;;  %v1877_v29 = vld [vmem:[%s3814_s12 + $0xf0] sm:$0xff]  ;;  %v1878_v42 = vld [vmem:[%s3814_s12 + $0xf8] sm:$0xff] }
 0x29e   : > { %2122 = vst.msk [vmem:[#allocation3 + $0x10] sm:$0xff] %vm1558_vm1, %v4255_v54  ;;  %1026 = vperm.xlu1 %2963, %v4255_v54   ;;  %2724 = vmatprep.subr.bf16.mxu1 %v1892_v27  ;;  %v1859_v27 = vld [vmem:[%s3814_s12 + $0x60] sm:$0xff]  ;;  %v1894_v35 = vpack.c.bf16 %v1878_v42, %v1877_v29 }
 0x29f   : > { %v801_v12 = vpop.xlane.xlu1 %800  ;;  %2725 = vmatpush3.bf16.msra.mxu1 %v1884_v11  ;;  %v1885_v10 = vpack.c.bf16 %v1860_v60, %v1859_v27  ;;  %v4303_v60 = vld [vmem:[#allocation3 + $0x30] sm:$0xff]  ;;  %v4346_v11 = vld [vmem:[#allocation3 + $0x58] sm:$0xff] }
 0x2a0   : > { %v4269_v13 = vmax.f32 %v4257_v16, %v801_v12  ;;  %v4280_v12 = vld [vmem:[#allocation3 + $0x28] sm:$0xff]  ;;  %2726 = vmatprep.subr.bf16.mxu1 %v1893_v6  ;;  %5385 = vst [vmem:[#allocation72_spill] sm:$0xff] %v4346_v11 }
 0x2a2   : > { %2123 = vst.msk [vmem:[#allocation3 + $0x18] sm:$0xff] %vm1558_vm1, %v4269_v13  ;;  %1031 = vperm.xlu1 %2963, %v4269_v13  }
 0x2a3   : > { %v804_v46 = vpop.xlane.xlu0 %803  ;;  %2727 = vmatpush3.bf16.msra.mxu1 %v1885_v10  ;;  %v4306_v10 = vld [vmem:[#allocation3 + $0x38] sm:$0xff] }
 0x2a4   : > { %v4285_v52 = vmax.f32 %v4271_v58, %v804_v46  ;;  %v1861_v46 = vld [vmem:[%s3814_s12 + $0x70] sm:$0xff]  ;;  %2728 = vmatprep.subr.bf16.mxu1 %v1894_v35 }
 0x2a5   : > { %v807_v9 = vpop.xlane.xlu1 %806  ;;  %v1886_v27 = vpack.c.bf16 %v1862_v7, %v1861_v46  ;;  %v4323_v46 = vld [vmem:[#allocation3 + $0x40] sm:$0xff] }
 0x2a6   : > { %2124 = vst.msk [vmem:[#allocation3 + $0x20] sm:$0xff] %vm1558_vm1, %v4285_v52  ;;  %v4292_v40 = vmax.f32 %v4280_v12, %v807_v9  ;;  %1036 = vperm.xlu0 %2962, %v4285_v52  }
 0x2a7   : > { %2729 = vmatpush3.bf16.msra.mxu1 %v1886_v27 }
 0x2a8   : > { %2125 = vst.msk [vmem:[#allocation3 + $0x28] sm:$0xff] %vm1558_vm1, %v4292_v40 }
 0x2aa   : > { %1041 = vperm.xlu0 %2962, %v4292_v40  }
 0x2ab   : > { %v810_v9 = vpop.xlane.xlu0 %809 }
 0x2ac   : > { %v4309_v29 = vmax.f32 %v4303_v60, %v810_v9  ;;  %v4326_v9 = vld [vmem:[#allocation3 + $0x48] sm:$0xff] }
 0x2ad   : > { %v813_v42 = vpop.xlane.xlu1 %812 }
 0x2ae   : > { %2126 = vst.msk [vmem:[#allocation3 + $0x30] sm:$0xff] %vm1558_vm1, %v4309_v29  ;;  %v4316_v7 = vmax.f32 %v4306_v10, %v813_v42  ;;  %1046 = vperm.xlu1 %2963, %v4309_v29  }
 0x2b0   : > { %2127 = vst.msk [vmem:[#allocation3 + $0x38] sm:$0xff] %vm1558_vm1, %v4316_v7 }
 0x2b2   : > { %1051 = vperm.xlu1 %2963, %v4316_v7  }
 0x2b3   : > { %v816_v27 = vpop.xlane.xlu0 %815 }
 0x2b4   : > { %v4329_v6 = vmax.f32 %v4323_v46, %v816_v27  ;;  %v4343_v27 = vld [vmem:[#allocation3 + $0x50] sm:$0xff] }
 0x2b5   : > { %v819_v42 = vpop.xlane.xlu1 %818  ;;  %5384 = vst [vmem:[#allocation71_spill] sm:$0xff] %v4343_v27 }
 0x2b6   : > { %2128 = vst.msk [vmem:[#allocation3 + $0x40] sm:$0xff] %vm1558_vm1, %v4329_v6  ;;  %v4336_v35 = vmax.f32 %v4326_v9, %v819_v42  ;;  %1056 = vperm.xlu0 %2962, %v4329_v6  }
 0x2b8   : > { %2129 = vst.msk [vmem:[#allocation3 + $0x48] sm:$0xff] %vm1558_vm1, %v4336_v35 }
 0x2ba   : > { %1061 = vperm.xlu0 %2962, %v4336_v35  }
 0x2bb   : > { %v822_v23 = vpop.xlane.xlu0 %821 }
 0x2bc   : > { %v4349_v17 = vmax.f32 %v4343_v27, %v822_v23  ;;  %v4363_v23 = vld [vmem:[#allocation3 + $0x60] sm:$0xff] }
 0x2bd   : > { %v825_v42 = vpop.xlane.xlu1 %824  ;;  %5388 = vst [vmem:[#allocation75_spill] sm:$0xff] %v4363_v23 }
 0x2be   : > { %5386 = vst [vmem:[#allocation73_spill] sm:$0xff] %v4349_v17  ;;  %2130 = vst.msk [vmem:[#allocation3 + $0x50] sm:$0xff] %vm1558_vm1, %v4349_v17  ;;  %v4356_v5 = vmax.f32 %v4346_v11, %v825_v42  ;;  %1066 = vperm.xlu1 %2963, %v4349_v17  }
 0x2c0   : > { %5387 = vst [vmem:[#allocation74_spill] sm:$0xff] %v4356_v5  ;;  %2131 = vst.msk [vmem:[#allocation3 + $0x58] sm:$0xff] %vm1558_vm1, %v4356_v5 }
 0x2c2   : > { %1071 = vperm.xlu1 %2963, %v4356_v5  }
 0x2c3   : > { %v828_v4 = vpop.xlane.xlu0 %827 }
 0x2c4   : > { %v4369_v3 = vmax.f32 %v4363_v23, %v828_v4  ;;  %v4402_v23 = vld [vmem:[#allocation3 + $0x88] sm:$0xff] }
 0x2c5   : > { %v831_v42 = vpop.xlane.xlu1 %830  ;;  %5394 = vst [vmem:[#allocation81_spill] sm:$0xff] %v4402_v23 }
 0x2c6   : > { %2132 = vst.msk [vmem:[#allocation3 + $0x60] sm:$0xff] %vm1558_vm1, %v4369_v3  ;;  %v4376_v63 = vmax.f32 %v4366_v1, %v831_v42  ;;  %v4400_v1 = vld [vmem:[#allocation3 + $0x80] sm:$0xff] }
 0x2c7   : > { %5393 = vst [vmem:[#allocation80_spill] sm:$0xff] %v4400_v1 }
 0x2c8   : > { %2133 = vst.msk [vmem:[#allocation3 + $0x68] sm:$0xff] %vm1558_vm1, %v4376_v63 }
 0x2cb   : > { %v834_v4 = vpop.xlane.xlu0 %833 }
 0x2cc   : > { %v4387_v56 = vmax.f32 %v4382_v59, %v834_v4  ;;  %v4423_v59 = vld [vmem:[#allocation3 + $0x98] sm:$0xff] }
 0x2cd   : > { %v837_v62 = vpop.xlane.xlu1 %836  ;;  %5398 = vst [vmem:[#allocation84_spill] sm:$0xff] %v4423_v59 }
 0x2ce   : > { %5392 = vst [vmem:[#allocation79_spill] sm:$0xff] %v4387_v56  ;;  %2134 = vst.msk [vmem:[#allocation3 + $0x70] sm:$0xff] %vm1558_vm1, %v4387_v56  ;;  %v4394_v42 = vmax.f32 %v4384_v57, %v837_v62  ;;  %v4421_v57 = vld [vmem:[#allocation3 + $0x90] sm:$0xff] }
 0x2cf   : > { %5397 = vst [vmem:[#allocation83_spill] sm:$0xff] %v4421_v57 }
 0x2d0   : > { %2135 = vst.msk [vmem:[#allocation3 + $0x78] sm:$0xff] %vm1558_vm1, %v4394_v42 }
 0x2d3   : > { %v840_v4 = vpop.xlane.xlu0 %839 }
 0x2d4   : > { %v4405_v5 = vmax.f32 %v4400_v1, %v840_v4  ;;  %v5396_v4 = vmax.f32 %v4204_v2, %v4208_v21  ;;  %v4439_v21 = vld [vmem:[#allocation3 + $0xa0] sm:$0xff]  ;;  %v4441_v2 = vld [vmem:[#allocation3 + $0xa8] sm:$0xff] }
 0x2d5   : > { %v843_v55 = vpop.xlane.xlu1 %842  ;;  %5399 = vst [vmem:[#allocation85_spill] sm:$0xff] %v4439_v21  ;;  %5400 = vst [vmem:[#allocation86_spill] sm:$0xff] %v4441_v2 }
 0x2d6   : > { %5395 = vst [vmem:[#allocation82_spill] sm:$0xff] %v4405_v5  ;;  %2136 = vst.msk [vmem:[#allocation3 + $0x80] sm:$0xff] %vm1558_vm1, %v4405_v5  ;;  %v4412_v62 = vmax.f32 %v4402_v23, %v843_v55 }
 0x2d8   : > { %2137 = vst.msk [vmem:[#allocation3 + $0x88] sm:$0xff] %vm1558_vm1, %v4412_v62 }
 0x2d9   : > { %884 = vmax.xlane.f32.xlu0 %v5396_v4 }
 0x2db   : > { %v846_v11 = vpop.xlane.xlu0 %845 }
 0x2dc   : > { %v4426_v1 = vmax.f32 %v4421_v57, %v846_v11  ;;  %v5401_v57 = vmax.f32 %v4200_v8, %v4202_v14  ;;  %v4462_v14 = vld [vmem:[#allocation3 + $0xb8] sm:$0xff]  ;;  %v4482_v8 = vld [vmem:[#allocation3 + $0xc8] sm:$0xff] }
 0x2dd   : > { %v849_v55 = vpop.xlane.xlu1 %848  ;;  %5404 = vst [vmem:[#allocation89_spill] sm:$0xff] %v4462_v14  ;;  %5408 = vst [vmem:[#allocation93_spill] sm:$0xff] %v4482_v8 }
 0x2de   : > { %2138 = vst.msk [vmem:[#allocation3 + $0x90] sm:$0xff] %vm1558_vm1, %v4426_v1  ;;  %v4433_v61 = vmax.f32 %v4423_v59, %v849_v55 }
 0x2e0   : > { %2139 = vst.msk [vmem:[#allocation3 + $0x98] sm:$0xff] %vm1558_vm1, %v4433_v61 }
 0x2e3   : > { %v852_v11 = vpop.xlane.xlu1 %851 }
 0x2e4   : > { %v4444_v23 = vmax.f32 %v4439_v21, %v852_v11  ;;  %v4460_v11 = vld [vmem:[#allocation3 + $0xb0] sm:$0xff] }
 0x2e5   : > { %v855_v17 = vpop.xlane.xlu0 %854  ;;  %5403 = vst [vmem:[#allocation88_spill] sm:$0xff] %v4460_v11 }
 0x2e6   : > { %881 = vmax.xlane.f32.xlu1 %v5401_v57  ;;  %2140 = vst.msk [vmem:[#allocation3 + $0xa0] sm:$0xff] %vm1558_vm1, %v4444_v23  ;;  %v4454_v4 = vmax.f32 %v4441_v2, %v855_v17 }
 0x2e8   : > { %5402 = vst [vmem:[#allocation87_spill] sm:$0xff] %v4454_v4  ;;  %2141 = vst.msk [vmem:[#allocation3 + $0xa8] sm:$0xff] %vm1558_vm1, %v4454_v4 }
 0x2eb   : > { %v858_v27 = vpop.xlane.xlu1 %857 }
 0x2ec   : > { %v4465_v57 = vmax.f32 %v4460_v11, %v858_v27  ;;  %v4479_v27 = vld [vmem:[#allocation3 + $0xc0] sm:$0xff] }
 0x2ed   : > { %v861_v55 = vpop.xlane.xlu0 %860  ;;  %5407 = vst [vmem:[#allocation92_spill] sm:$0xff] %v4479_v27 }
 0x2ee   : > { %5405 = vst [vmem:[#allocation90_spill] sm:$0xff] %v4465_v57  ;;  %2142 = vst.msk [vmem:[#allocation3 + $0xb0] sm:$0xff] %vm1558_vm1, %v4465_v57  ;;  %v4472_v17 = vmax.f32 %v4462_v14, %v861_v55 }
 0x2ef   : > { %1076 = vperm.xlu0 %2962, %v4369_v3  }
 0x2f0   : > { %5406 = vst [vmem:[#allocation91_spill] sm:$0xff] %v4472_v17  ;;  %2143 = vst.msk [vmem:[#allocation3 + $0xb8] sm:$0xff] %vm1558_vm1, %v4472_v17 }
 0x2f3   : > { %1081 = vperm.xlu0 %2962, %v4376_v63   ;;  %v864_v2 = vpop.xlane.xlu0 %863 }
 0x2f4   : > { %v4485_v11 = vmax.f32 %v4479_v27, %v864_v2  ;;  %v4500_v2 = vld [vmem:[#allocation3 + $0xd0] sm:$0xff]  ;;  %v4504_v27 = vld [vmem:[#allocation3 + $0xd8] sm:$0xff] }
 0x2f5   : > { %v867_v55 = vpop.xlane.xlu1 %866  ;;  %5411 = vst [vmem:[#allocation96_spill] sm:$0xff] %v4500_v2  ;;  %5412 = vst [vmem:[#allocation97_spill] sm:$0xff] %v4504_v27 }
 0x2f6   : > { %5409 = vst [vmem:[#allocation94_spill] sm:$0xff] %v4485_v11  ;;  %2144 = vst.msk [vmem:[#allocation3 + $0xc0] sm:$0xff] %vm1558_vm1, %v4485_v11  ;;  %v4492_v59 = vmax.f32 %v4482_v8, %v867_v55 }
 0x2f7   : > { %1096 = vperm.xlu1 %2963, %v4405_v5   ;;  %1086 = vperm.xlu0 %2962, %v4387_v56   ;;  %v4526_v56 = vld [vmem:[#allocation3 + $0xe8] sm:$0xff] }
 0x2f8   : > { %5410 = vst [vmem:[#allocation95_spill] sm:$0xff] %v4492_v59  ;;  %2145 = vst.msk [vmem:[#allocation3 + $0xc8] sm:$0xff] %vm1558_vm1, %v4492_v59 }
 0x2f9   : > { %5415 = vst [vmem:[#allocation100_spill] sm:$0xff] %v4526_v56 }
 0x2fb   : > { %1121 = vperm.xlu1 %2963, %v4454_v4   ;;  %1091 = vperm.xlu0 %2962, %v4394_v42   ;;  %v870_v21 = vpop.xlane.xlu1 %869 }
 0x2fc   : > { %v4507_v55 = vmax.f32 %v4500_v2, %v870_v21  ;;  %v4522_v21 = vld [vmem:[#allocation3 + $0xe0] sm:$0xff] }
 0x2fd   : > { %v873_v5 = vpop.xlane.xlu0 %872  ;;  %5414 = vst [vmem:[#allocation99_spill] sm:$0xff] %v4522_v21 }
 0x2fe   : > { %2146 = vst.msk [vmem:[#allocation3 + $0xd0] sm:$0xff] %vm1558_vm1, %v4507_v55  ;;  %v4514_v14 = vmax.f32 %v4504_v27, %v873_v5 }
 0x2ff   : > { %1131 = vperm.xlu1 %2963, %v4472_v17   ;;  %1101 = vperm.xlu0 %2962, %v4412_v62  }
 0x300   : > { %5413 = vst [vmem:[#allocation98_spill] sm:$0xff] %v4514_v14  ;;  %2147 = vst.msk [vmem:[#allocation3 + $0xd8] sm:$0xff] %vm1558_vm1, %v4514_v14 }
 0x303   : > { %1141 = vperm.xlu1 %2963, %v4492_v59   ;;  %1106 = vperm.xlu0 %2962, %v4426_v1   ;;  %v876_v5 = vpop.xlane.xlu0 %875 }
 0x304   : > { %v4529_v2 = vmax.f32 %v4522_v21, %v876_v5 }
 0x305   : > { %v879_v17 = vpop.xlane.xlu1 %878 }
 0x306   : > { %v4532_v4 = vmax.f32 %v4526_v56, %v879_v17  ;;  %2148 = vst.msk [vmem:[#allocation3 + $0xe0] sm:$0xff] %vm1558_vm1, %v4529_v2 }
 0x307   : > { %1151 = vperm.xlu1 %2963, %v4514_v14   ;;  %1111 = vperm.xlu0 %2962, %v4433_v61  }
 0x308   : > { %5416 = vst [vmem:[#allocation101_spill] sm:$0xff] %v4532_v4  ;;  %2149 = vst.msk [vmem:[#allocation3 + $0xe8] sm:$0xff] %vm1558_vm1, %v4532_v4 }
 0x30b   : > { %1161 = vperm.xlu1 %2963, %v4532_v4   ;;  %1116 = vperm.xlu0 %2962, %v4444_v23  }
 0x30f   : > { %1126 = vperm.xlu0 %2962, %v4465_v57  }
 0x313   : > { %1136 = vperm.xlu0 %2962, %v4485_v11  }
 0x315   : > { %v1017_v17 = vpop.permute.xlu0 %1016 }
 0x316   : > { %v1174_v5 = vsub.f32 %v4020_v18, %v1017_v17  ;;  %v1175_v8 = vsub.f32 %v4022_v19, %v1017_v17 }
 0x317   : > { %1146 = vperm.xlu0 %2962, %v4507_v55  }
 0x318   : > { %v1238_v21 = vmul.f32 1.442695, %v1174_v5  ;;  %v1240_v27 = vmul.f32 1.442695, %v1175_v8 }
 0x319   : > { %v1022_v56 = vpop.permute.xlu1 %1021 }
 0x31a   : > { %2964 = vpow2.f32 %v1238_v21  ;;  %v1176_v14 = vsub.f32 %v4024_v20, %v1022_v56  ;;  %v1177_v4 = vsub.f32 %v4028_v22, %v1022_v56 }
 0x31b   : > { %2966 = vpow2.f32 %v1240_v27  ;;  %1156 = vperm.xlu0 %2962, %v4529_v2  }
 0x31c   : > { %v1242_v59 = vmul.f32 1.442695, %v1176_v14  ;;  %v1244_v11 = vmul.f32 1.442695, %v1177_v4 }
 0x31d   : > { %v1027_v57 = vpop.permute.xlu1 %1026 }
 0x31e   : > { %2968 = vpow2.f32 %v1242_v59  ;;  %v1178_v18 = vsub.f32 %v4032_v24, %v1027_v57  ;;  %v1179_v19 = vsub.f32 %v4034_v25, %v1027_v57 }
 0x31f   : > { %2970 = vpow2.f32 %v1244_v11 }
 0x320   : > { %v1246_v17 = vmul.f32 1.442695, %v1178_v18  ;;  %v1248_v8 = vmul.f32 1.442695, %v1179_v19 }
 0x321   : > { %v1032_v5 = vpop.permute.xlu1 %1031 }
 0x322   : > { %2972 = vpow2.f32 %v1246_v17  ;;  %v1180_v20 = vsub.f32 %v4036_v26, %v1032_v5  ;;  %v1181_v22 = vsub.f32 %v4040_v28, %v1032_v5 }
 0x323   : > { %2974 = vpow2.f32 %v1248_v8 }
 0x324   : > { %v2965_v56 = vpop.eup %2964  ;;  %v1250_v27 = vmul.f32 1.442695, %v1180_v20  ;;  %v1252_v14 = vmul.f32 1.442695, %v1181_v22 }
 0x325   : > { %v2967_v4 = vpop.eup %2966  ;;  %v1037_v21 = vpop.permute.xlu0 %1036 }
 0x326   : > { %2976 = vpow2.f32 %v1250_v27  ;;  %v1182_v24 = vsub.f32 %v4044_v30, %v1037_v21  ;;  %v1183_v25 = vsub.f32 %v4046_v31, %v1037_v21  ;;  %v4560_v59 = vadd.f32 %v2967_v4, %v2965_v56 }
 0x327   : > { %2978 = vpow2.f32 %v1252_v14 }
 0x328   : > { %v2969_v11 = vpop.eup %2968  ;;  %v1254_v57 = vmul.f32 1.442695, %v1182_v24  ;;  %v1256_v18 = vmul.f32 1.442695, %v1183_v25 }
 0x329   : > { %v2971_v26 = vpop.eup %2970  ;;  %v1042_v19 = vpop.permute.xlu0 %1041  ;;  %v1815_v28 = vpack.c.bf16 %v2969_v11, %v2965_v56 }
 0x32a   : > { %2980 = vpow2.f32 %v1254_v57  ;;  %v1184_v17 = vsub.f32 %v4048_v32, %v1042_v19  ;;  %v1185_v8 = vsub.f32 %v4052_v34, %v1042_v19  ;;  %v1816_v5 = vpack.c.bf16 %v2971_v26, %v2967_v4 }
 0x32b   : > { %2982 = vpow2.f32 %v1256_v18  ;;  %v4564_v20 = vadd.f32 %v2971_v26, %v2969_v11 }
 0x32c   : > { %v2973_v30 = vpop.eup %2972  ;;  %v1258_v31 = vmul.f32 1.442695, %v1184_v17  ;;  %v1260_v22 = vmul.f32 1.442695, %v1185_v8  ;;  %1927 = vmatprep.mubr.bf16.mxu1 %v1816_v5 }
 0x32d   : > { %v2975_v27 = vpop.eup %2974  ;;  %1928 = vmatmul.mubr.bf16.vlgmr.msra.gmra.mrb[0].mxu1 %v1815_v28  ;;  %v1047_v14 = vpop.permute.xlu1 %1046 }
 0x32e   : > { %2984 = vpow2.f32 %v1258_v31  ;;  %v1186_v21 = vsub.f32 %v4056_v37, %v1047_v14  ;;  %v1187_v56 = vsub.f32 %v4058_v38, %v1047_v14  ;;  %v4568_v24 = vadd.f32 %v2975_v27, %v2973_v30 }
 0x32f   : > { %2986 = vpow2.f32 %v1260_v22 }
 0x330   : > { %v2977_v32 = vpop.eup %2976  ;;  %v1262_v34 = vmul.f32 1.442695, %v1186_v21  ;;  %v1264_v4 = vmul.f32 1.442695, %v1187_v56 }
 0x331   : > { %v2979_v25 = vpop.eup %2978  ;;  %v1052_v11 = vpop.permute.xlu1 %1051  ;;  %v1817_v57 = vpack.c.bf16 %v2977_v32, %v2973_v30 }
 0x332   : > { %2988 = vpow2.f32 %v1262_v34  ;;  %v1188_v18 = vsub.f32 %v4060_v39, %v1052_v11  ;;  %v1189_v26 = vsub.f32 %v4064_v41, %v1052_v11  ;;  %v1818_v19 = vpack.c.bf16 %v2979_v25, %v2975_v27 }
 0x333   : > { %2990 = vpow2.f32 %v1264_v4  ;;  %v4572_v28 = vadd.f32 %v2979_v25, %v2977_v32 }
 0x334   : > { %v2981_v37 = vpop.eup %2980  ;;  %v1266_v38 = vmul.f32 1.442695, %v1188_v18  ;;  %v1268_v17 = vmul.f32 1.442695, %v1189_v26  ;;  %1935 = vmatprep.mubr.bf16.mxu1 %v1818_v19 }
 0x335   : > { %v2983_v8 = vpop.eup %2982  ;;  %1936 = vmatmul.mubr.bf16.gmra.mrb[4].mxu1 %v1817_v57  ;;  %v1057_v5 = vpop.permute.xlu0 %1056 }
 0x336   : > { %2992 = vpow2.f32 %v1266_v38  ;;  %v1190_v31 = vsub.f32 %v4068_v43, %v1057_v5  ;;  %v1191_v30 = vsub.f32 %v4070_v44, %v1057_v5  ;;  %v4576_v22 = vadd.f32 %v2983_v8, %v2981_v37 }
 0x337   : > { %2994 = vpow2.f32 %v1268_v17 }
 0x338   : > { %v2985_v39 = vpop.eup %2984  ;;  %v1270_v41 = vmul.f32 1.442695, %v1190_v31  ;;  %v1272_v27 = vmul.f32 1.442695, %v1191_v30 }
 0x339   : > { %v2987_v14 = vpop.eup %2986  ;;  %v1062_v21 = vpop.permute.xlu0 %1061  ;;  %v1819_v56 = vpack.c.bf16 %v2985_v39, %v2981_v37 }
 0x33a   : > { %2996 = vpow2.f32 %v1270_v41  ;;  %v1192_v32 = vsub.f32 %v4072_v45, %v1062_v21  ;;  %v1193_v34 = vsub.f32 %v4076_v47, %v1062_v21  ;;  %v1820_v4 = vpack.c.bf16 %v2987_v14, %v2983_v8 }
 0x33b   : > { %2998 = vpow2.f32 %v1272_v27  ;;  %v4580_v25 = vadd.f32 %v2987_v14, %v2985_v39 }
 0x33c   : > { %v2989_v43 = vpop.eup %2988  ;;  %v1274_v44 = vmul.f32 1.442695, %v1192_v32  ;;  %v1276_v11 = vmul.f32 1.442695, %v1193_v34  ;;  %1943 = vmatprep.mubr.bf16.mxu1 %v1820_v4 }
 0x33d   : > { %v2991_v57 = vpop.eup %2990  ;;  %1944 = vmatmul.mubr.bf16.gmra.mrb[8].mxu1 %v1819_v56  ;;  %v1067_v18 = vpop.permute.xlu1 %1066 }
 0x33e   : > { %3000 = vpow2.f32 %v1274_v44  ;;  %v1194_v26 = vsub.f32 %v4080_v49, %v1067_v18  ;;  %v1195_v19 = vsub.f32 %v4082_v50, %v1067_v18  ;;  %v4584_v37 = vadd.f32 %v2991_v57, %v2989_v43 }
 0x33f   : > { %3002 = vpow2.f32 %v1276_v11 }
 0x340   : > { %v2993_v45 = vpop.eup %2992  ;;  %v1278_v47 = vmul.f32 1.442695, %v1194_v26  ;;  %v1280_v38 = vmul.f32 1.442695, %v1195_v19 }
 0x341   : > { %v2995_v17 = vpop.eup %2994  ;;  %v1072_v8 = vpop.permute.xlu1 %1071  ;;  %v1821_v5 = vpack.c.bf16 %v2993_v45, %v2989_v43 }
 0x342   : > { %3004 = vpow2.f32 %v1278_v47  ;;  %v1196_v31 = vsub.f32 %v4084_v51, %v1072_v8  ;;  %v1197_v30 = vsub.f32 %v4088_v53, %v1072_v8  ;;  %v1822_v39 = vpack.c.bf16 %v2995_v17, %v2991_v57 }
 0x343   : > { %3006 = vpow2.f32 %v1280_v38  ;;  %v4588_v41 = vadd.f32 %v2995_v17, %v2993_v45  ;;  %v5417_v45 = vsub.f32 %v4220_v0, %v4227_v36  ;;  %v5418_v38 = vsub.f32 %v4229_v15, %v4241_v48 }
 0x344   : > { %v2997_v49 = vpop.eup %2996  ;;  %v1282_v50 = vmul.f32 1.442695, %v1196_v31  ;;  %v1284_v27 = vmul.f32 1.442695, %v1197_v30  ;;  %1951 = vmatprep.mubr.bf16.mxu1 %v1822_v39  ;;  %v5419_v8 = vsub.f32 %v4243_v33, %v4255_v54  ;;  %v5420_v31 = vsub.f32 %v4257_v16, %v4269_v13  ;;  %v4628_v13 = vld [vmem:[#allocation3 + $0xf8] sm:$0xff] }
 0x345   : > { %v2999_v14 = vpop.eup %2998  ;;  %1952 = vmatmul.mubr.bf16.gmra.mrb[12].mxu1 %v1821_v5  ;;  %v950_v47 = vmul.f32 1.442695, %v5417_v45  ;;  %v952_v17 = vmul.f32 1.442695, %v5418_v38  ;;  %v5421_v39 = vsub.f32 %v4271_v58, %v4285_v52  ;;  %v5422_v0 = vsub.f32 %v4280_v12, %v4292_v40  ;;  %v5427_v12 = vld [vmem:[#allocation71_spill] sm:$0xff] }
 0x346   : > { %3008 = vpow2.f32 %v1282_v50  ;;  %v4590_v21 = vadd.f32 %v2999_v14, %v2997_v49  ;;  %v954_v5 = vmul.f32 1.442695, %v5419_v8  ;;  %v956_v30 = vmul.f32 1.442695, %v5420_v31  ;;  %v5444_v8 = vld [vmem:[#allocation82_spill] sm:$0xff] }
 0x347   : > { %3010 = vpow2.f32 %v1284_v27  ;;  %v960_v36 = vmul.f32 1.442695, %v5422_v0  ;;  %v5423_v15 = vsub.f32 %v4303_v60, %v4309_v29  ;;  %v5424_v16 = vsub.f32 %v4306_v10, %v4316_v7  ;;  %v5428_v60 = vld [vmem:[#allocation73_spill] sm:$0xff]  ;;  %v5430_v10 = vld [vmem:[#allocation72_spill] sm:$0xff]  ;;  %v5431_v7 = vld [vmem:[#allocation74_spill] sm:$0xff] }
 0x348   : > { %v3001_v56 = vpop.eup %3000  ;;  %3012 = vpow2.f32 %v950_v47  ;;  %v5425_v52 = vsub.f32 %v4323_v46, %v4329_v6  ;;  %v5426_v40 = vsub.f32 %v4326_v9, %v4336_v35  ;;  %v5429_v29 = vsub.f32 %v5427_v12, %v5428_v60  ;;  %v5433_v6 = vld [vmem:[#allocation75_spill] sm:$0xff]  ;;  %v5435_v9 = vld [vmem:[#allocation76_spill] sm:$0xff] }
 0x349   : > { %v3003_v32 = vpop.eup %3002  ;;  %v1823_v34 = vpack.c.bf16 %v3001_v56, %v2997_v49  ;;  %v958_v49 = vmul.f32 1.442695, %v5421_v39  ;;  %3014 = vpow2.f32 %v952_v17  ;;  %v962_v48 = vmul.f32 1.442695, %v5423_v15  ;;  %v5443_v17 = vld [vmem:[#allocation80_spill] sm:$0xff]  ;;  %v5447_v39 = vld [vmem:[#allocation81_spill] sm:$0xff] }
 0x34a   : > { %v1824_v51 = vpack.c.bf16 %v3003_v32, %v2999_v14  ;;  %v4592_v4 = vadd.f32 %v3003_v32, %v3001_v56  ;;  %3016 = vpow2.f32 %v954_v5  ;;  %v964_v33 = vmul.f32 1.442695, %v5424_v16  ;;  %v5450_v15 = vld [vmem:[#allocation83_spill] sm:$0xff]  ;;  %v5457_v60 = vld [vmem:[#allocation32_spill] sm:$0xff] }
 0x34b   : > { %3018 = vpow2.f32 %v956_v30  ;;  %v966_v58 = vmul.f32 1.442695, %v5425_v52  ;;  %v968_v54 = vmul.f32 1.442695, %v5426_v40  ;;  %v970_v50 = vmul.f32 1.442695, %v5429_v29 }
 0x34c   : > { %v3005_v53 = vpop.eup %3004  ;;  %1959 = vmatprep.mubr.bf16.mxu1 %v1824_v51  ;;  %3020 = vpow2.f32 %v958_v49  ;;  %v5432_v27 = vsub.f32 %v5430_v10, %v5431_v7  ;;  %v5434_v46 = vsub.f32 %v5433_v6, %v4369_v3  ;;  %v5445_v5 = vsub.f32 %v5443_v17, %v5444_v8  ;;  %v5471_v8 = vld [vmem:[#allocation88_spill] sm:$0xff] }
 0x34d   : > { %v3007_v43 = vpop.eup %3006  ;;  %1960 = vmatmul.mubr.bf16.gmra.mrb[16].mxu1 %v1823_v34  ;;  %3022 = vpow2.f32 %v960_v36  ;;  %v5436_v34 = vsub.f32 %v5435_v9, %v4376_v63  ;;  %v5440_v63 = vld [vmem:[#allocation78_spill] sm:$0xff]  ;;  %v5448_v49 = vsub.f32 %v5447_v39, %v4412_v62  ;;  %v5456_v62 = vld [vmem:[#allocation31_spill] sm:$0xff] }
 0x34e   : > { %v4594_v44 = vadd.f32 %v3007_v43, %v3005_v53  ;;  %3024 = vpow2.f32 %v962_v48  ;;  %v972_v14 = vmul.f32 1.442695, %v5432_v27  ;;  %v974_v32 = vmul.f32 1.442695, %v5434_v46  ;;  %v5463_v46 = vld [vmem:[#allocation86_spill] sm:$0xff] }
 0x34f   : > { %3026 = vpow2.f32 %v964_v33  ;;  %v976_v51 = vmul.f32 1.442695, %v5436_v34  ;;  %v5441_v45 = vsub.f32 %v5440_v63, %v4394_v42  ;;  %v982_v31 = vmul.f32 1.442695, %v5445_v5  ;;  %v5453_v33 = vld [vmem:[#allocation84_spill] sm:$0xff]  ;;  %v5472_v5 = vld [vmem:[#allocation90_spill] sm:$0xff] }
 0x350   : > { %v3009_v11 = vpop.eup %3008  ;;  %3028 = vpow2.f32 %v966_v58  ;;  %v984_v0 = vmul.f32 1.442695, %v5448_v49  ;;  %v5451_v42 = vsub.f32 %v5450_v15, %v4426_v1  ;;  %v5454_v52 = vsub.f32 %v5453_v33, %v4433_v61  ;;  %v5459_v1 = vld [vmem:[#allocation85_spill] sm:$0xff] }
 0x351   : > { %v3011_v57 = vpop.eup %3010  ;;  %v1825_v18 = vpack.c.bf16 %v3009_v11, %v3005_v53  ;;  %3030 = vpow2.f32 %v968_v54  ;;  %v980_v47 = vmul.f32 1.442695, %v5441_v45  ;;  %v5460_v10 = vsub.f32 %v5459_v1, %v4444_v23  ;;  %v5467_v23 = vld [vmem:[#allocation33_spill] sm:$0xff] }
 0x352   : > { %v1826_v26 = vpack.c.bf16 %v3011_v57, %v3007_v43  ;;  %v4596_v19 = vadd.f32 %v3011_v57, %v3009_v11  ;;  %v4645_v53 = vpop.eup %3012  ;;  %3032 = vpow2.f32 %v970_v50  ;;  %v5437_v43 = vld [vmem:[#allocation77_spill] sm:$0xff]  ;;  %v5438_v11 = vld [vmem:[#allocation79_spill] sm:$0xff]  ;;  %v986_v48 = vmul.f32 1.442695, %v5451_v42 }
 0x353   : > { %v5439_v57 = vsub.f32 %v5437_v43, %v5438_v11  ;;  %v4655_v3 = vpop.eup %3014  ;;  %3034 = vpow2.f32 %v972_v14  ;;  %v988_v58 = vmul.f32 1.442695, %v5454_v52  ;;  %v990_v7 = vmul.f32 1.442695, %v5460_v10  ;;  %v5475_v42 = vld [vmem:[#allocation89_spill] sm:$0xff] }
 0x354   : > { %1967 = vmatprep.mubr.bf16.mxu1 %v1826_v26  ;;  %v4660_v38 = vpop.eup %3016  ;;  %3036 = vpow2.f32 %v974_v32  ;;  %v5464_v32 = vld [vmem:[#allocation87_spill] sm:$0xff] }
 0x355   : > { %1968 = vmatmul.mubr.bf16.gmra.mrb[20].mxu1 %v1825_v18  ;;  %v978_v18 = vmul.f32 1.442695, %v5439_v57  ;;  %5442 = vst [vmem:[#allocation71_spill] sm:$0xff] %v4660_v38  ;;  %v4665_v30 = vpop.eup %3018  ;;  %3038 = vpow2.f32 %v976_v51  ;;  %v5465_v9 = vsub.f32 %v5463_v46, %v5464_v32  ;;  %v5468_v57 = vld [vmem:[#allocation34_spill] sm:$0xff]  ;;  %v5483_v46 = vld [vmem:[#allocation40_spill] sm:$0xff] }
 0x356   : > { %5446 = vst [vmem:[#allocation73_spill] sm:$0xff] %v4665_v30  ;;  %v4670_v36 = vpop.eup %3020 }
 0x357   : > { %5449 = vst [vmem:[#allocation72_spill] sm:$0xff] %v4670_v36  ;;  %3040 = vpow2.f32 %v978_v18  ;;  %v4676_v16 = vpop.eup %3022  ;;  %v992_v34 = vmul.f32 1.442695, %v5465_v9 }
 0x358   : > { %5452 = vst [vmem:[#allocation74_spill] sm:$0xff] %v4676_v16  ;;  %3042 = vpow2.f32 %v980_v47  ;;  %v4681_v54 = vpop.eup %3024 }
 0x359   : > { %5455 = vst [vmem:[#allocation75_spill] sm:$0xff] %v4681_v54  ;;  %3044 = vpow2.f32 %v982_v31  ;;  %v4685_v50 = vpop.eup %3026  ;;  %v5473_v31 = vsub.f32 %v5471_v8, %v5472_v5  ;;  %v5486_v8 = vld [vmem:[#allocation37_spill] sm:$0xff] }
 0x35a   : > { %5458 = vst [vmem:[#allocation76_spill] sm:$0xff] %v4685_v50  ;;  %3046 = vpow2.f32 %v984_v0  ;;  %v4690_v27 = vpop.eup %3028 }
 0x35b   : > { %5461 = vst [vmem:[#allocation77_spill] sm:$0xff] %v4690_v27  ;;  %3048 = vpow2.f32 %v986_v48  ;;  %v4695_v6 = vpop.eup %3030  ;;  %v994_v39 = vmul.f32 1.442695, %v5473_v31  ;;  %v5476_v48 = vld [vmem:[#allocation91_spill] sm:$0xff]  ;;  %v5487_v31 = vld [vmem:[#allocation38_spill] sm:$0xff] }
 0x35c   : > { %5462 = vst [vmem:[#allocation79_spill] sm:$0xff] %v4695_v6  ;;  %3050 = vpow2.f32 %v988_v58  ;;  %v4700_v43 = vpop.eup %3032  ;;  %v5477_v33 = vsub.f32 %v5475_v42, %v5476_v48  ;;  %v5489_v42 = vld [vmem:[#allocation49_spill] sm:$0xff] }
 0x35d   : > { %5466 = vst [vmem:[#allocation78_spill] sm:$0xff] %v4700_v43  ;;  %v4704_v45 = vpop.eup %3034  ;;  %v5498_v58 = vld [vmem:[#allocation57_spill] sm:$0xff] }
 0x35e   : > { %5469 = vst [vmem:[#allocation80_spill] sm:$0xff] %v4704_v45  ;;  %v4709_v17 = vpop.eup %3036  ;;  %v996_v52 = vmul.f32 1.442695, %v5477_v33  ;;  %v5490_v33 = vld [vmem:[#allocation50_spill] sm:$0xff] }
 0x35f   : > { %5470 = vst [vmem:[#allocation82_spill] sm:$0xff] %v4709_v17  ;;  %v4715_v15 = vpop.eup %3038 }
 0x360   : > { %5474 = vst [vmem:[#allocation81_spill] sm:$0xff] %v4715_v15 }
 0x366   : > { %v885_v56 = vpop.xlane.xlu0 %884 }
 0x367   : > { %v4640_v35 = vmax.f32 %v4628_v13, %v885_v56  ;;  %v4693_v56 = vld [vmem:[#allocation3 + $0xf0] sm:$0xff] }
 0x369   : > { %2151 = vst.msk [vmem:[#allocation3 + $0xf8] sm:$0xff] %vm1558_vm1, %v4640_v35  ;;  %1171 = vperm.xlu1 %2963, %v4640_v35  }
 0x36d   : > { %1625 = vperm.xlu1 %2963, %v4645_v53  }
 0x36e   : > { %v1077_v40 = vpop.permute.xlu0 %1076 }
 0x36f   : > { %v1198_v12 = vsub.f32 %v5456_v62, %v1077_v40  ;;  %v1199_v29 = vsub.f32 %v5457_v60, %v1077_v40  ;;  %v4725_v62 = vpop.eup %3040 }
 0x370   : > { %5478 = vst [vmem:[#allocation83_spill] sm:$0xff] %v4725_v62 }
 0x371   : > { %v1286_v61 = vmul.f32 1.442695, %v1198_v12  ;;  %v1288_v14 = vmul.f32 1.442695, %v1199_v29  ;;  %1635 = vperm.xlu1 %2963, %v4660_v38   ;;  %v5479_v12 = vld [vmem:[#allocation35_spill] sm:$0xff]  ;;  %v5480_v29 = vld [vmem:[#allocation36_spill] sm:$0xff] }
 0x372   : > { %v1082_v51 = vpop.permute.xlu0 %1081 }
 0x373   : > { %3052 = vpow2.f32 %v1286_v61  ;;  %v1200_v11 = vsub.f32 %v5467_v23, %v1082_v51  ;;  %v1201_v18 = vsub.f32 %v5468_v57, %v1082_v51  ;;  %v882_v63 = vpop.xlane.xlu1 %881  ;;  %v5482_v61 = vld [vmem:[#allocation39_spill] sm:$0xff] }
 0x374   : > { %3054 = vpow2.f32 %v1288_v14  ;;  %v4707_v47 = vmax.f32 %v4693_v56, %v882_v63 }
 0x375   : > { %3056 = vpow2.f32 %v990_v7  ;;  %v1290_v49 = vmul.f32 1.442695, %v1200_v11  ;;  %v1292_v0 = vmul.f32 1.442695, %v1201_v18  ;;  %1640 = vperm.xlu1 %2963, %v4665_v30   ;;  %v4729_v7 = vpop.eup %3042 }
 0x376   : > { %3058 = vpow2.f32 %v992_v34  ;;  %2150 = vst.msk [vmem:[#allocation3 + $0xf0] sm:$0xff] %vm1558_vm1, %v4707_v47  ;;  %1166 = vperm.xlu0 %2962, %v4707_v47   ;;  %v1087_v40 = vpop.permute.xlu0 %1086  ;;  %5481 = vst [vmem:[#allocation84_spill] sm:$0xff] %v4729_v7  ;;  %v4733_v9 = vpop.eup %3044 }
 0x377   : > { %3060 = vpow2.f32 %v1290_v49  ;;  %v1202_v60 = vsub.f32 %v5479_v12, %v1087_v40  ;;  %v1203_v1 = vsub.f32 %v5480_v29, %v1087_v40  ;;  %v1097_v10 = vpop.permute.xlu1 %1096  ;;  %5484 = vst [vmem:[#allocation31_spill] sm:$0xff] %v4733_v9  ;;  %v4736_v23 = vpop.eup %3046 }
 0x378   : > { %3062 = vpow2.f32 %v1292_v0  ;;  %v1206_v14 = vsub.f32 %v5482_v61, %v1097_v10  ;;  %v1207_v32 = vsub.f32 %v5483_v46, %v1097_v10  ;;  %5485 = vst [vmem:[#allocation32_spill] sm:$0xff] %v4736_v23  ;;  %v4739_v63 = vpop.eup %3048  ;;  %v5491_v46 = vld [vmem:[#allocation41_spill] sm:$0xff] }
 0x379   : > { %3064 = vpow2.f32 %v994_v39  ;;  %v1294_v34 = vmul.f32 1.442695, %v1202_v60  ;;  %v1296_v51 = vmul.f32 1.442695, %v1203_v1  ;;  %1650 = vperm.xlu1 %2963, %v4676_v16   ;;  %v4743_v0 = vpop.eup %3050 }
 0x37a   : > { %3066 = vpow2.f32 %v996_v52  ;;  %v1302_v11 = vmul.f32 1.442695, %v1206_v14  ;;  %v1304_v57 = vmul.f32 1.442695, %v1207_v32  ;;  %1630 = vperm.xlu0 %2962, %v4655_v3   ;;  %v1092_v18 = vpop.permute.xlu0 %1091  ;;  %5488 = vst [vmem:[#allocation85_spill] sm:$0xff] %v4743_v0 }
 0x37b   : > { %3068 = vpow2.f32 %v1294_v34  ;;  %v1204_v5 = vsub.f32 %v5486_v8, %v1092_v18  ;;  %v1205_v49 = vsub.f32 %v5487_v31, %v1092_v18  ;;  %v1122_v39 = vpop.permute.xlu1 %1121  ;;  %v5492_v34 = vld [vmem:[#allocation42_spill] sm:$0xff] }
 0x37c   : > { %3070 = vpow2.f32 %v1296_v51  ;;  %v1216_v48 = vsub.f32 %v5489_v42, %v1122_v39  ;;  %v1217_v52 = vsub.f32 %v5490_v33, %v1122_v39  ;;  %v5495_v31 = vld [vmem:[#allocation54_spill] sm:$0xff] }
 0x37d   : > { %v3053_v40 = vpop.eup %3052  ;;  %3072 = vpow2.f32 %v1302_v11  ;;  %v1298_v12 = vmul.f32 1.442695, %v1204_v5  ;;  %v1300_v60 = vmul.f32 1.442695, %v1205_v49  ;;  %1660 = vperm.xlu1 %2963, %v4685_v50   ;;  %v5494_v5 = vld [vmem:[#allocation53_spill] sm:$0xff] }
 0x37e   : > { %v3055_v29 = vpop.eup %3054  ;;  %3074 = vpow2.f32 %v1304_v57  ;;  %v1322_v1 = vmul.f32 1.442695, %v1216_v48  ;;  %v1324_v10 = vmul.f32 1.442695, %v1217_v52  ;;  %1645 = vperm.xlu0 %2962, %v4670_v36   ;;  %v1102_v61 = vpop.permute.xlu0 %1101 }
 0x37f   : > { %v4749_v14 = vpop.eup %3056  ;;  %3076 = vpow2.f32 %v1298_v12  ;;  %v1208_v32 = vsub.f32 %v5491_v46, %v1102_v61  ;;  %v1209_v51 = vsub.f32 %v5492_v34, %v1102_v61  ;;  %v1132_v18 = vpop.permute.xlu1 %1131  ;;  %v4753_v11 = vadd.f32 %v3055_v29, %v3053_v40 }
 0x380   : > { %v4755_v8 = vpop.eup %3058  ;;  %3078 = vpow2.f32 %v1300_v60  ;;  %v1220_v57 = vsub.f32 %v5494_v5, %v1132_v18  ;;  %v1221_v49 = vsub.f32 %v5495_v31, %v1132_v18  ;;  %v5496_v60 = vld [vmem:[#allocation43_spill] sm:$0xff]  ;;  %v5497_v18 = vld [vmem:[#allocation44_spill] sm:$0xff] }
 0x381   : > { %5493 = vst [vmem:[#allocation86_spill] sm:$0xff] %v4755_v8  ;;  %v3061_v39 = vpop.eup %3060  ;;  %3080 = vpow2.f32 %v1322_v1  ;;  %v1306_v42 = vmul.f32 1.442695, %v1208_v32  ;;  %v1308_v48 = vmul.f32 1.442695, %v1209_v51  ;;  %1670 = vperm.xlu1 %2963, %v4695_v6  }
 0x382   : > { %v3063_v33 = vpop.eup %3062  ;;  %3082 = vpow2.f32 %v1324_v10  ;;  %v1330_v52 = vmul.f32 1.442695, %v1220_v57  ;;  %v1332_v12 = vmul.f32 1.442695, %v1221_v49  ;;  %1655 = vperm.xlu0 %2962, %v4681_v54   ;;  %v1107_v61 = vpop.permute.xlu0 %1106  ;;  %v1827_v46 = vpack.c.bf16 %v3061_v39, %v3053_v40  ;;  %v5499_v57 = vld [vmem:[#allocation58_spill] sm:$0xff] }
 0x383   : > { %v4761_v34 = vpop.eup %3064  ;;  %3084 = vpow2.f32 %v1306_v42  ;;  %v1210_v5 = vsub.f32 %v5496_v60, %v1107_v61  ;;  %v1211_v31 = vsub.f32 %v5497_v18, %v1107_v61  ;;  %v1142_v1 = vpop.permute.xlu1 %1141  ;;  %v1828_v32 = vpack.c.bf16 %v3063_v33, %v3055_v29  ;;  %v5501_v60 = vld [vmem:[#allocation46_spill] sm:$0xff] }
 0x384   : > { %v4765_v51 = vpop.eup %3066  ;;  %3086 = vpow2.f32 %v1308_v48  ;;  %v1224_v10 = vsub.f32 %v5498_v58, %v1142_v1  ;;  %v1225_v49 = vsub.f32 %v5499_v57, %v1142_v1  ;;  %v4769_v26 = vadd.f32 %v3063_v33, %v3061_v39  ;;  %v5500_v39 = vld [vmem:[#allocation45_spill] sm:$0xff] }
 0x385   : > { %v3069_v6 = vpop.eup %3068  ;;  %3088 = vpow2.f32 %v1330_v52  ;;  %v1310_v40 = vmul.f32 1.442695, %v1210_v5  ;;  %v1312_v50 = vmul.f32 1.442695, %v1211_v31  ;;  %1975 = vmatprep.mubr.bf16.mxu1 %v1828_v32  ;;  %1680 = vperm.xlu1 %2963, %v4704_v45   ;;  %v5502_v1 = vld [vmem:[#allocation61_spill] sm:$0xff]  ;;  %v5503_v32 = vld [vmem:[#allocation62_spill] sm:$0xff] }
 0x386   : > { %v3071_v42 = vpop.eup %3070  ;;  %3090 = vpow2.f32 %v1332_v12  ;;  %v1338_v61 = vmul.f32 1.442695, %v1224_v10  ;;  %v1340_v29 = vmul.f32 1.442695, %v1225_v49  ;;  %1976 = vmatmul.mubr.bf16.gmra.mrb[24].mxu1 %v1827_v46  ;;  %1665 = vperm.xlu0 %2962, %v4690_v27   ;;  %v1112_v48 = vpop.permute.xlu0 %1111  ;;  %v5506_v27 = vld [vmem:[#allocation65_spill] sm:$0xff] }
 0x387   : > { %v4773_v58 = vpop.eup %3072  ;;  %3092 = vpow2.f32 %v1310_v40  ;;  %v1212_v33 = vsub.f32 %v5500_v39, %v1112_v48  ;;  %v1213_v52 = vsub.f32 %v5501_v60, %v1112_v48  ;;  %v1152_v5 = vpop.permute.xlu1 %1151  ;;  %v4777_v18 = vadd.f32 %v3071_v42, %v3069_v6 }
 0x388   : > { %v3075_v31 = vpop.eup %3074  ;;  %3094 = vpow2.f32 %v1312_v50  ;;  %v1228_v12 = vsub.f32 %v5502_v1, %v1152_v5  ;;  %v1229_v10 = vsub.f32 %v5503_v32, %v1152_v5  ;;  %v5504_v5 = vld [vmem:[#allocation47_spill] sm:$0xff] }
 0x389   : > { %v3077_v46 = vpop.eup %3076  ;;  %3096 = vpow2.f32 %v1338_v61  ;;  %v1314_v57 = vmul.f32 1.442695, %v1212_v33  ;;  %v1316_v49 = vmul.f32 1.442695, %v1213_v52  ;;  %1690 = vperm.xlu1 %2963, %v4715_v15   ;;  %v4783_v40 = vadd.f32 %v3075_v31, %v4773_v58  ;;  %v5505_v33 = vld [vmem:[#allocation48_spill] sm:$0xff] }
 0x38a   : > { %v3079_v39 = vpop.eup %3078  ;;  %3098 = vpow2.f32 %v1340_v29  ;;  %v1346_v48 = vmul.f32 1.442695, %v1228_v12  ;;  %v1348_v60 = vmul.f32 1.442695, %v1229_v10  ;;  %1675 = vperm.xlu0 %2962, %v4700_v43   ;;  %v1117_v50 = vpop.permute.xlu0 %1116  ;;  %v1829_v45 = vpack.c.bf16 %v3077_v46, %v3069_v6  ;;  %v5507_v12 = vld [vmem:[#allocation66_spill] sm:$0xff] }
 0x38b   : > { %v4786_v1 = vpop.eup %3080  ;;  %3100 = vpow2.f32 %v1314_v57  ;;  %v1214_v61 = vsub.f32 %v5504_v5, %v1117_v50  ;;  %v1215_v52 = vsub.f32 %v5505_v33, %v1117_v50  ;;  %v1162_v32 = vpop.permute.xlu1 %1161  ;;  %v1830_v15 = vpack.c.bf16 %v3079_v39, %v3071_v42  ;;  %v5509_v5 = vld [vmem:[#allocation52_spill] sm:$0xff] }
 0x38c   : > { %v4790_v16 = vpop.eup %3082  ;;  %3102 = vpow2.f32 %v1316_v49  ;;  %v1232_v29 = vsub.f32 %v5506_v27, %v1162_v32  ;;  %v1233_v10 = vsub.f32 %v5507_v12, %v1162_v32  ;;  %v4794_v30 = vadd.f32 %v3079_v39, %v3077_v46  ;;  %v5510_v32 = vld [vmem:[#allocation92_spill] sm:$0xff] }
 0x38d   : > { %v3085_v43 = vpop.eup %3084  ;;  %3104 = vpow2.f32 %v1346_v48  ;;  %v1318_v6 = vmul.f32 1.442695, %v1214_v61  ;;  %v1320_v54 = vmul.f32 1.442695, %v1215_v52  ;;  %1983 = vmatprep.mubr.bf16.mxu1 %v1830_v15  ;;  %1700 = vperm.xlu1 %2963, %v4729_v7   ;;  %v4799_v57 = vadd.f32 %v4790_v16, %v4786_v1  ;;  %v5508_v15 = vld [vmem:[#allocation51_spill] sm:$0xff] }
 0x38e   : > { %v3087_v42 = vpop.eup %3086  ;;  %3106 = vpow2.f32 %v1348_v60  ;;  %v1354_v49 = vmul.f32 1.442695, %v1232_v29  ;;  %v1356_v50 = vmul.f32 1.442695, %v1233_v10  ;;  %1984 = vmatmul.mubr.bf16.gmra.mrb[28].mxu1 %v1829_v45  ;;  %1685 = vperm.xlu0 %2962, %v4709_v17   ;;  %v1127_v27 = vpop.permute.xlu0 %1126  ;;  %v1831_v46 = vpack.c.bf16 %v3085_v43, %v4773_v58  ;;  %v5511_v60 = vld [vmem:[#allocation94_spill] sm:$0xff] }
 0x38f   : > { %v4803_v39 = vpop.eup %3088  ;;  %3108 = vpow2.f32 %v1318_v6  ;;  %v1218_v48 = vsub.f32 %v5508_v15, %v1127_v27  ;;  %v1219_v61 = vsub.f32 %v5509_v5, %v1127_v27  ;;  %v1832_v33 = vpack.c.bf16 %v3087_v42, %v3075_v31  ;;  %v5513_v27 = vld [vmem:[#allocation93_spill] sm:$0xff]  ;;  %v5514_v15 = vld [vmem:[#allocation95_spill] sm:$0xff] }
 0x390   : > { %v4807_v52 = vpop.eup %3090  ;;  %v5512_v29 = vsub.f32 %v5510_v32, %v5511_v60  ;;  %3110 = vpow2.f32 %v1320_v54  ;;  %v4812_v45 = vadd.f32 %v3087_v42, %v3085_v43  ;;  %v5515_v5 = vsub.f32 %v5513_v27, %v5514_v15  ;;  %v5516_v42 = vld [vmem:[#allocation55_spill] sm:$0xff] }
 0x391   : > { %v4814_v10 = vpop.eup %3092  ;;  %3112 = vpow2.f32 %v1354_v49  ;;  %v1326_v58 = vmul.f32 1.442695, %v1218_v48  ;;  %v1328_v7 = vmul.f32 1.442695, %v1219_v61  ;;  %1991 = vmatprep.mubr.bf16.mxu1 %v1832_v33  ;;  %1710 = vperm.xlu1 %2963, %v4736_v23   ;;  %v4819_v31 = vadd.f32 %v4807_v52, %v4803_v39  ;;  %v5517_v48 = vld [vmem:[#allocation56_spill] sm:$0xff] }
 0x392   : > { %v998_v12 = vmul.f32 1.442695, %v5512_v29  ;;  %v3095_v6 = vpop.eup %3094  ;;  %v1000_v32 = vmul.f32 1.442695, %v5515_v5  ;;  %3114 = vpow2.f32 %v1356_v50  ;;  %1695 = vperm.xlu0 %2962, %v4725_v62   ;;  %v1137_v54 = vpop.permute.xlu0 %1136  ;;  %v5518_v5 = vld [vmem:[#allocation97_spill] sm:$0xff]  ;;  %v5522_v23 = vld [vmem:[#allocation60_spill] sm:$0xff] }
 0x393   : > { %v4825_v43 = vpop.eup %3096  ;;  %3116 = vpow2.f32 %v1326_v58  ;;  %v1222_v49 = vsub.f32 %v5516_v42, %v1137_v54  ;;  %v1223_v61 = vsub.f32 %v5517_v48, %v1137_v54  ;;  %v4830_v33 = vadd.f32 %v3095_v6, %v4814_v10  ;;  %v5519_v54 = vld [vmem:[#allocation98_spill] sm:$0xff] }
 0x394   : > { %v4832_v60 = vpop.eup %3098  ;;  %3118 = vpow2.f32 %v1328_v7  ;;  %v5520_v42 = vsub.f32 %v5518_v5, %v5519_v54 }
 0x395   : > { %v3101_v29 = vpop.eup %3100  ;;  %3120 = vpow2.f32 %v998_v12  ;;  %v1334_v27 = vmul.f32 1.442695, %v1222_v49  ;;  %v1336_v50 = vmul.f32 1.442695, %v1223_v61  ;;  %1720 = vperm.xlu1 %2963, %v4743_v0   ;;  %v4837_v15 = vadd.f32 %v4832_v60, %v4825_v43  ;;  %v5521_v61 = vld [vmem:[#allocation59_spill] sm:$0xff] }
 0x396   : > { %v3103_v58 = vpop.eup %3102  ;;  %3122 = vpow2.f32 %v1000_v32  ;;  %v1004_v48 = vmul.f32 1.442695, %v5520_v42  ;;  %1992 = vmatmul.mubr.bf16.gmra.mrb[32].mxu1 %v1831_v46  ;;  %1705 = vperm.xlu0 %2962, %v4733_v9   ;;  %v1147_v7 = vpop.permute.xlu0 %1146  ;;  %v1833_v12 = vpack.c.bf16 %v3101_v29, %v4814_v10  ;;  %v5523_v46 = vld [vmem:[#allocation96_spill] sm:$0xff] }
 0x397   : > { %v4844_v49 = vpop.eup %3104  ;;  %3124 = vpow2.f32 %v1334_v27  ;;  %v1226_v0 = vsub.f32 %v5521_v61, %v1147_v7  ;;  %v1227_v62 = vsub.f32 %v5522_v23, %v1147_v7  ;;  %v1834_v17 = vpack.c.bf16 %v3103_v58, %v3095_v6  ;;  %v5525_v6 = vld [vmem:[#allocation100_spill] sm:$0xff] }
 0x398   : > { %v4848_v38 = vpop.eup %3106  ;;  %3126 = vpow2.f32 %v1336_v50  ;;  %v4850_v32 = vadd.f32 %v3103_v58, %v3101_v29  ;;  %v5524_v54 = vsub.f32 %v5523_v46, %v4507_v55  ;;  %v5526_v50 = vld [vmem:[#allocation101_spill] sm:$0xff]  ;;  %v5529_v61 = vld [vmem:[#allocation64_spill] sm:$0xff] }
 0x399   : > { %v3109_v5 = vpop.eup %3108  ;;  %v1342_v9 = vmul.f32 1.442695, %v1226_v0  ;;  %v1344_v10 = vmul.f32 1.442695, %v1227_v62  ;;  %1999 = vmatprep.mubr.bf16.mxu1 %v1834_v17  ;;  %1730 = vperm.xlu1 %2963, %v4755_v8   ;;  %v4858_v27 = vadd.f32 %v4848_v38, %v4844_v49  ;;  %3128 = vpow2.f32 %v1004_v48  ;;  %v5528_v17 = vld [vmem:[#allocation63_spill] sm:$0xff] }
 0x39a   : > { %v1002_v42 = vmul.f32 1.442695, %v5524_v54  ;;  %v3111_v23 = vpop.eup %3110  ;;  %v5527_v29 = vsub.f32 %v5525_v6, %v5526_v50  ;;  %1715 = vperm.xlu0 %2962, %v4739_v63   ;;  %v1157_v7 = vpop.permute.xlu0 %1156  ;;  %v1835_v55 = vpack.c.bf16 %v4786_v1, %v3109_v5 }
 0x39b   : > { %v3113_v0 = vpop.eup %3112  ;;  %3130 = vpow2.f32 %v1342_v9  ;;  %v1230_v62 = vsub.f32 %v5528_v17, %v1157_v7  ;;  %v1231_v46 = vsub.f32 %v5529_v61, %v1157_v7  ;;  %v1836_v54 = vpack.c.bf16 %v4790_v16, %v3111_v23 }
 0x39c   : > { %v1008_v58 = vmul.f32 1.442695, %v5527_v29  ;;  %v3115_v8 = vpop.eup %3114  ;;  %3132 = vpow2.f32 %v1344_v10  ;;  %v4868_v48 = vadd.f32 %v3111_v23, %v3109_v5  ;;  %v5530_v10 = vld [vmem:[#allocation99_spill] sm:$0xff] }
 0x39d   : > { %v3117_v36 = vpop.eup %3116  ;;  %3134 = vpow2.f32 %v1002_v42  ;;  %v1350_v6 = vmul.f32 1.442695, %v1230_v62  ;;  %v1352_v50 = vmul.f32 1.442695, %v1231_v46  ;;  %1740 = vperm.xlu1 %2963, %v4765_v51   ;;  %v4871_v29 = vadd.f32 %v3115_v8, %v3113_v0 }
 0x39e   : > { %v3119_v1 = vpop.eup %3118  ;;  %3136 = vpow2.f32 %v1008_v58  ;;  %2000 = vmatmul.mubr.bf16.gmra.mrb[36].mxu1 %v1833_v12  ;;  %1725 = vperm.xlu0 %2962, %v4749_v14   ;;  %v1837_v9 = vpack.c.bf16 %v4803_v39, %v3117_v36  ;;  %v5531_v5 = vsub.f32 %v5530_v10, %v4529_v2 }
 0x39f   : > { %v4875_v16 = vpop.eup %3120  ;;  %3138 = vpow2.f32 %v1350_v6  ;;  %2007 = vmatprep.mubr.bf16.mxu1 %v1836_v54  ;;  %v1838_v42 = vpack.c.bf16 %v4807_v52, %v3119_v1  ;;  %v4881_v7 = vadd.f32 %v3119_v1, %v3117_v36 }
 0x3a0   : > { %v1006_v23 = vmul.f32 1.442695, %v5531_v5  ;;  %v4883_v17 = vpop.eup %3122  ;;  %3140 = vpow2.f32 %v1352_v50 }
 0x3a1   : > { %v3125_v12 = vpop.eup %3124  ;;  %1750 = vperm.xlu1 %2963, %v4883_v17  }
 0x3a2   : > { %v3127_v58 = vpop.eup %3126  ;;  %1735 = vperm.xlu0 %2962, %v4761_v34   ;;  %v1839_v39 = vpack.c.bf16 %v4825_v43, %v3125_v12  ;;  %3142 = vpow2.f32 %v1006_v23 }
 0x3a3   : > { %v1840_v2 = vpack.c.bf16 %v4832_v60, %v3127_v58  ;;  %v4889_v62 = vadd.f32 %v3127_v58, %v3125_v12  ;;  %v4891_v61 = vpop.eup %3128 }
 0x3a5   : > { %v3131_v36 = vpop.eup %3130  ;;  %1760 = vperm.xlu1 %2963, %v4891_v61  }
 0x3a6   : > { %v3133_v52 = vpop.eup %3132  ;;  %2008 = vmatmul.mubr.bf16.gmra.mrb[40].mxu1 %v1835_v55  ;;  %1745 = vperm.xlu0 %2962, %v4875_v16   ;;  %v1841_v46 = vpack.c.bf16 %v4844_v49, %v3131_v36 }
 0x3a7   : > { %v4896_v54 = vpop.eup %3134  ;;  %2015 = vmatprep.mubr.bf16.mxu1 %v1838_v42  ;;  %v1842_v43 = vpack.c.bf16 %v4848_v38, %v3133_v52  ;;  %v1508_v6 = vadd.f32 %v3133_v52, %v3131_v36 }
 0x3a8   : > { %v4899_v60 = vpop.eup %3136 }
 0x3a9   : > { %v3139_v50 = vpop.eup %3138  ;;  %1770 = vperm.xlu1 %2963, %v4899_v60  }
 0x3aa   : > { %v3141_v1 = vpop.eup %3140  ;;  %1755 = vperm.xlu0 %2962, %v4896_v54   ;;  %v1843_v10 = vpack.c.bf16 %v3113_v0, %v3139_v50 }
 0x3ab   : > { %v1844_v55 = vpack.c.bf16 %v3115_v8, %v3141_v1  ;;  %v1514_v5 = vadd.f32 %v3141_v1, %v3139_v50  ;;  %v5536_v1 = vsub.f32 %v4628_v13, %v4640_v35 }
 0x3ac   : > { %v4903_v23 = vpop.eup %3142 }
 0x3ae   : > { %2016 = vmatmul.mubr.bf16.gmra.mrb[44].mxu1 %v1837_v9  ;;  %1765 = vperm.xlu0 %2962, %v4903_v23  }
 0x3af   : > { %2023 = vmatprep.mubr.bf16.mxu1 %v1840_v2 }
 0x3b6   : > { %2024 = vmatmul.mubr.bf16.gmra.mrb[48].mxu1 %v1839_v39 }
 0x3b7   : > { %2031 = vmatprep.mubr.bf16.mxu1 %v1842_v43 }
 0x3be   : > { %2032 = vmatmul.mubr.bf16.gmra.mrb[52].mxu1 %v1841_v46  ;;  %v1593_v46 = vld [vmem:[#allocation5 + $0x10] sm:$0xff] }
 0x3bf   : > { %2039 = vmatprep.mubr.bf16.mxu1 %v1844_v55 }
 0x3c6   : > { %2040 = vmatmul.mubr.bf16.gmra.mrb[56].mxu1 %v1843_v10 }
 0x3cd   : > { %1431 = vadd.xlane.f32.xlu0 %v4560_v59  ;;  %1434 = vadd.xlane.f32.xlu1 %v4564_v20  ;;  %v5532_v20 = vld [vmem:[#allocation69_spill] sm:$0xff] }
 0x3d1   : > { %1437 = vadd.xlane.f32.xlu0 %v4568_v24  ;;  %1443 = vadd.xlane.f32.xlu1 %v4576_v22 }
 0x3d5   : > { %1440 = vadd.xlane.f32.xlu0 %v4572_v28  ;;  %1449 = vadd.xlane.f32.xlu1 %v4584_v37  ;;  %v5533_v28 = vld [vmem:[#allocation70_spill] sm:$0xff] }
 0x3d9   : > { %1446 = vadd.xlane.f32.xlu0 %v4580_v25  ;;  %1455 = vadd.xlane.f32.xlu1 %v4590_v21  ;;  %v5534_v21 = vld [vmem:[#allocation67_spill] sm:$0xff] }
 0x3dd   : > { %1452 = vadd.xlane.f32.xlu0 %v4588_v41  ;;  %1461 = vadd.xlane.f32.xlu1 %v4594_v44  ;;  %v5535_v44 = vld [vmem:[#allocation68_spill] sm:$0xff] }
 0x3e1   : > { %1458 = vadd.xlane.f32.xlu0 %v4592_v4  ;;  %1467 = vadd.xlane.f32.xlu1 %v4753_v11 }
 0x3e5   : > { %1464 = vadd.xlane.f32.xlu0 %v4596_v19  ;;  %1473 = vadd.xlane.f32.xlu1 %v4777_v18 }
 0x3e8   : > { %v1172_v59 = vpop.permute.xlu1 %1171 }
 0x3e9   : > { %v1236_v24 = vsub.f32 %v5532_v20, %v1172_v59  ;;  %v1237_v22 = vsub.f32 %v5533_v28, %v1172_v59  ;;  %1470 = vadd.xlane.f32.xlu0 %v4769_v26  ;;  %1479 = vadd.xlane.f32.xlu1 %v4783_v40  ;;  %v1591_v40 = vld [vmem:[#allocation5] sm:$0xff] }
 0x3eb   : > { %v1362_v25 = vmul.f32 1.442695, %v1236_v24  ;;  %v1364_v37 = vmul.f32 1.442695, %v1237_v22 }
 0x3ec   : > { %v1626_v18 = vpop.permute.xlu1 %1625 }
 0x3ed   : > { %3144 = vpow2.f32 %v1362_v25  ;;  %1476 = vadd.xlane.f32.xlu0 %v4794_v30  ;;  %1485 = vadd.xlane.f32.xlu1 %v4830_v33  ;;  %v1592_v33 = vld [vmem:[#allocation5 + $0x8] sm:$0xff]  ;;  %v1783_v0 = vmul.f32 %v1626_v18, %v1591_v40 }
 0x3ee   : > { %3146 = vpow2.f32 %v1364_v37  ;;  %v1595_v37 = vld [vmem:[#allocation5 + $0x20] sm:$0xff] }
 0x3f1   : > { %1482 = vadd.xlane.f32.xlu0 %v4812_v45  ;;  %1491 = vadd.xlane.f32.xlu1 %v4868_v48  ;;  %v1636_v48 = vpop.permute.xlu1 %1635 }
 0x3f2   : > { %v1785_v10 = vmul.f32 %v1636_v48, %v1593_v46 }
 0x3f5   : > { %1488 = vadd.xlane.f32.xlu0 %v4850_v32  ;;  %1497 = vadd.xlane.f32.xlu1 %v4881_v7  ;;  %v1167_v41 = vpop.permute.xlu0 %1166 }
 0x3f6   : > { %v1234_v4 = vsub.f32 %v5534_v21, %v1167_v41  ;;  %v1235_v19 = vsub.f32 %v5535_v44, %v1167_v41  ;;  %v1596_v21 = vld [vmem:[#allocation5 + $0x28] sm:$0xff] }
 0x3f7   : > { %v3145_v26 = vpop.eup %3144 }
 0x3f8   : > { %v3147_v38 = vpop.eup %3146  ;;  %v1358_v11 = vmul.f32 1.442695, %v1234_v4  ;;  %v1360_v30 = vmul.f32 1.442695, %v1235_v19 }
 0x3f9   : > { %1494 = vadd.xlane.f32.xlu0 %v4799_v57  ;;  %1503 = vadd.xlane.f32.xlu1 %v4889_v62  ;;  %v1523_v8 = vadd.f32 %v3147_v38, %v3145_v26  ;;  %v1631_v49 = vpop.permute.xlu0 %1630 }
 0x3fa   : > { %3148 = vpow2.f32 %v1358_v11  ;;  %v1784_v12 = vmul.f32 %v1631_v49, %v1592_v33  ;;  %v1597_v33 = vld [vmem:[#allocation5 + $0x30] sm:$0xff] }
 0x3fb   : > { %3150 = vpow2.f32 %v1360_v30 }
 0x3fd   : > { %1500 = vadd.xlane.f32.xlu0 %v4819_v31  ;;  %1509 = vadd.xlane.f32.xlu1 %v1508_v6  ;;  %v1594_v6 = vld [vmem:[#allocation5 + $0x18] sm:$0xff]  ;;  %v1646_v41 = vpop.permute.xlu0 %1645 }
 0x3fe   : > { %v1787_v13 = vmul.f32 %v1646_v41, %v1595_v37 }
 0x400   : > { %v2730_v45 = vpop.f32.mrb[0].mxu1 }
 0x401   : > { %v2731_v32 = vpop.f32.mrb[1].mxu1  ;;  %1506 = vadd.xlane.f32.xlu0 %v4837_v15  ;;  %1515 = vadd.xlane.f32.xlu1 %v1514_v5  ;;  %v1641_v15 = vpop.permute.xlu1 %1640 }
 0x402   : > { %v2732_v57 = vadd.f32 %v2731_v32, %v2730_v45  ;;  %v2733_v9 = vpop.f32.mrb[2].mxu1  ;;  %v1786_v20 = vmul.f32 %v1641_v15, %v1594_v6  ;;  %v1656_v40 = vpop.permute.xlu0 %1655 }
 0x403   : > { %v2734_v42 = vpop.f32.mrb[3].mxu1 }
 0x404   : > { %v3149_v7 = vpop.eup %3148  ;;  %v2056_v58 = vadd.f32 %v2732_v57, %v1783_v0  ;;  %v2735_v39 = vadd.f32 %v2734_v42, %v2733_v9  ;;  %v1598_v0 = vld [vmem:[#allocation5 + $0x38] sm:$0xff] }
 0x405   : > { %v3151_v2 = vpop.eup %3150  ;;  %1512 = vadd.xlane.f32.xlu0 %v4858_v27  ;;  %v1845_v31 = vpack.c.bf16 %v3145_v26, %v3149_v7  ;;  %v1012_v27 = vmul.f32 1.442695, %v5536_v1  ;;  %v1651_v22 = vpop.permute.xlu1 %1650  ;;  %v5537_v26 = vsub.f32 %v4693_v56, %v4707_v47  ;;  %v1789_v56 = vmul.f32 %v1656_v40, %v1597_v33 }
 0x406   : > { %2088 = vst [vmem:[#allocation5] sm:$0xff] %v2056_v58  ;;  %v2057_v62 = vadd.f32 %v2735_v39, %v1784_v12  ;;  %v1846_v36 = vpack.c.bf16 %v3147_v38, %v3151_v2  ;;  %v1520_v52 = vadd.f32 %v3151_v2, %v3149_v7  ;;  %v1788_v11 = vmul.f32 %v1651_v22, %v1596_v21  ;;  %v1666_v42 = vpop.permute.xlu0 %1665 }
 0x407   : > { %3152 = vpow2.f32 %v1012_v27  ;;  %v1010_v38 = vmul.f32 1.442695, %v5537_v26 }
 0x408   : > { %2089 = vst [vmem:[#allocation5 + $0x8] sm:$0xff] %v2057_v62  ;;  %v2736_v43 = vpop.f32.mrb[4].mxu1  ;;  %2047 = vmatprep.mubr.bf16.mxu1 %v1846_v36  ;;  %1521 = vadd.xlane.f32.xlu1 %v1520_v52  ;;  %v1600_v52 = vld [vmem:[#allocation5 + $0x48] sm:$0xff] }
 0x409   : > { %v2737_v50 = vpop.f32.mrb[5].mxu1  ;;  %2048 = vmatmul.mubr.bf16.gmra.mrb[60].mxu1 %v1845_v31  ;;  %1518 = vadd.xlane.f32.xlu0 %v4871_v29  ;;  %v1661_v30 = vpop.permute.xlu1 %1660  ;;  %3154 = vpow2.f32 %v1010_v38  ;;  %v1599_v31 = vld [vmem:[#allocation5 + $0x40] sm:$0xff] }
 0x40a   : > { %v2738_v55 = vadd.f32 %v2737_v50, %v2736_v43  ;;  %v2739_v5 = vpop.f32.mrb[6].mxu1  ;;  %v1790_v12 = vmul.f32 %v1661_v30, %v1598_v0  ;;  %v1676_v46 = vpop.permute.xlu0 %1675  ;;  %v1791_v6 = vmul.f32 %v1666_v42, %v1599_v31 }
 0x40b   : > { %v2740_v59 = vpop.f32.mrb[7].mxu1 }
 0x40c   : > { %v2058_v24 = vadd.f32 %v2738_v55, %v1785_v10  ;;  %v2741_v28 = vadd.f32 %v2740_v59, %v2739_v5 }
 0x40d   : > { %1524 = vadd.xlane.f32.xlu0 %v1523_v8  ;;  %v1671_v57 = vpop.permute.xlu1 %1670 }
 0x40e   : > { %2090 = vst [vmem:[#allocation5 + $0x10] sm:$0xff] %v2058_v24  ;;  %v2059_v25 = vadd.f32 %v2741_v28, %v1786_v20  ;;  %v1792_v10 = vmul.f32 %v1671_v57, %v1600_v52  ;;  %v1601_v24 = vld [vmem:[#allocation5 + $0x50] sm:$0xff]  ;;  %v1686_v28 = vpop.permute.xlu0 %1685  ;;  %v1370_v52 = vld [vmem:[#allocation4 + $0x20] sm:$0xff] }
 0x40f   : > { %v1793_v41 = vmul.f32 %v1676_v46, %v1601_v24 }
 0x410   : > { %2091 = vst [vmem:[#allocation5 + $0x18] sm:$0xff] %v2059_v25  ;;  %v2742_v29 = vpop.f32.mrb[8].mxu1  ;;  %v1602_v25 = vld [vmem:[#allocation5 + $0x58] sm:$0xff] }
 0x411   : > { %v2743_v4 = vpop.f32.mrb[9].mxu1  ;;  %v4944_v49 = vpop.eup %3152 }
 0x412   : > { %v2744_v35 = vadd.f32 %v2743_v4, %v2742_v29  ;;  %v2745_v44 = vpop.f32.mrb[10].mxu1  ;;  %v1681_v62 = vpop.permute.xlu1 %1680 }
 0x413   : > { %v2746_v19 = vpop.f32.mrb[11].mxu1  ;;  %v4947_v43 = vpop.eup %3154 }
 0x414   : > { %v2060_v8 = vadd.f32 %v2744_v35, %v1787_v13  ;;  %v2747_v18 = vadd.f32 %v2746_v19, %v2745_v44  ;;  %v1794_v13 = vmul.f32 %v1681_v62, %v1602_v25  ;;  %v1696_v26 = vpop.permute.xlu0 %1695 }
 0x416   : > { %2092 = vst [vmem:[#allocation5 + $0x20] sm:$0xff] %v2060_v8  ;;  %v2061_v45 = vadd.f32 %v2747_v18, %v1788_v11  ;;  %v1691_v59 = vpop.permute.xlu1 %1690 }
 0x418   : > { %2093 = vst [vmem:[#allocation5 + $0x28] sm:$0xff] %v2061_v45  ;;  %v2748_v32 = vpop.f32.mrb[12].mxu1  ;;  %v4954_v30 = vpop.permute.xlu0 %1705 }
 0x419   : > { %v2749_v48 = vpop.f32.mrb[13].mxu1  ;;  %1780 = vperm.xlu1 %2963, %v4944_v49  }
 0x41a   : > { %v2750_v47 = vadd.f32 %v2749_v48, %v2748_v32  ;;  %v2751_v9 = vpop.f32.mrb[14].mxu1  ;;  %v4950_v35 = vpop.permute.xlu1 %1700 }
 0x41b   : > { %v2752_v7 = vpop.f32.mrb[15].mxu1 }
 0x41c   : > { %v2062_v58 = vadd.f32 %v2750_v47, %v1789_v56  ;;  %v2753_v39 = vadd.f32 %v2752_v7, %v2751_v9  ;;  %v4958_v18 = vpop.permute.xlu0 %1715  ;;  %v1367_v9 = vld [vmem:[#allocation4 + $0x8] sm:$0xff]  ;;  %v1366_v7 = vld [vmem:[#allocation4] sm:$0xff] }
 0x41e   : > { %2094 = vst [vmem:[#allocation5 + $0x30] sm:$0xff] %v2062_v58  ;;  %v2063_v2 = vadd.f32 %v2753_v39, %v1790_v12  ;;  %v4952_v11 = vpop.permute.xlu1 %1710  ;;  %v1603_v12 = vld [vmem:[#allocation5 + $0x60] sm:$0xff]  ;;  %v1399_v39 = vmul.f32 %v4655_v3, %v1367_v9  ;;  %v5538_v3 = vld [vmem:[#allocation72_spill] sm:$0xff]  ;;  %v1606_v9 = vld [vmem:[#allocation5 + $0x78] sm:$0xff] }
 0x41f   : > { %v1795_v46 = vmul.f32 %v1686_v28, %v1603_v12  ;;  %v1372_v28 = vld [vmem:[#allocation4 + $0x30] sm:$0xff] }
 0x420   : > { %2095 = vst [vmem:[#allocation5 + $0x38] sm:$0xff] %v2063_v2  ;;  %v2754_v36 = vpop.f32.mrb[16].mxu1  ;;  %v4962_v45 = vpop.permute.xlu0 %1725  ;;  %v1604_v2 = vld [vmem:[#allocation5 + $0x68] sm:$0xff] }
 0x421   : > { %v2755_v15 = vpop.f32.mrb[17].mxu1 }
 0x422   : > { %v2756_v50 = vadd.f32 %v2755_v15, %v2754_v36  ;;  %v2757_v1 = vpop.f32.mrb[18].mxu1  ;;  %v4956_v8 = vpop.permute.xlu1 %1720  ;;  %v1398_v36 = vmul.f32 %v4645_v53, %v1366_v7  ;;  %v5539_v53 = vld [vmem:[#allocation71_spill] sm:$0xff] }
 0x423   : > { %v2758_v27 = vpop.f32.mrb[19].mxu1  ;;  %1775 = vperm.xlu0 %2962, %v4947_v43  }
 0x424   : > { %v2064_v55 = vadd.f32 %v2756_v50, %v1791_v6  ;;  %v2759_v5 = vadd.f32 %v2758_v27, %v2757_v1  ;;  %v4966_v32 = vpop.permute.xlu0 %1735  ;;  %v1368_v27 = vld [vmem:[#allocation4 + $0x10] sm:$0xff] }
 0x426   : > { %2096 = vst [vmem:[#allocation5 + $0x40] sm:$0xff] %v2064_v55  ;;  %v2065_v20 = vadd.f32 %v2759_v5, %v1792_v10  ;;  %v4960_v40 = vpop.permute.xlu1 %1730  ;;  %v1796_v5 = vmul.f32 %v1691_v59, %v1604_v2  ;;  %v1374_v2 = vld [vmem:[#allocation4 + $0x40] sm:$0xff] }
 0x428   : > { %2097 = vst [vmem:[#allocation5 + $0x48] sm:$0xff] %v2065_v20  ;;  %v2760_v22 = vpop.f32.mrb[20].mxu1  ;;  %v4970_v48 = vpop.permute.xlu0 %1745 }
 0x429   : > { %v2761_v37 = vpop.f32.mrb[21].mxu1 }
 0x42a   : > { %v2762_v29 = vadd.f32 %v2761_v37, %v2760_v22  ;;  %v2763_v21 = vpop.f32.mrb[22].mxu1  ;;  %v4964_v33 = vpop.permute.xlu1 %1740  ;;  %v1402_v22 = vmul.f32 %v5538_v3, %v1370_v52  ;;  %v1400_v37 = vmul.f32 %v5539_v53, %v1368_v27  ;;  %v1376_v3 = vld [vmem:[#allocation4 + $0x50] sm:$0xff] }
 0x42b   : > { %v2764_v4 = vpop.f32.mrb[23].mxu1 }
 0x42c   : > { %v2066_v44 = vadd.f32 %v2762_v29, %v1793_v41  ;;  %v2765_v19 = vadd.f32 %v2764_v4, %v2763_v21  ;;  %v4974_v56 = vpop.permute.xlu0 %1755  ;;  %v1369_v4 = vld [vmem:[#allocation4 + $0x18] sm:$0xff] }
 0x42e   : > { %2098 = vst [vmem:[#allocation5 + $0x50] sm:$0xff] %v2066_v44  ;;  %v2067_v38 = vadd.f32 %v2765_v19, %v1794_v13  ;;  %v4968_v0 = vpop.permute.xlu1 %1750  ;;  %v1605_v13 = vld [vmem:[#allocation5 + $0x70] sm:$0xff]  ;;  %v5540_v19 = vld [vmem:[#allocation75_spill] sm:$0xff] }
 0x430   : > { %2099 = vst [vmem:[#allocation5 + $0x58] sm:$0xff] %v2067_v38  ;;  %v4978_v42 = vpop.permute.xlu0 %1765  ;;  %v1404_v38 = vmul.f32 %v5540_v19, %v1372_v28  ;;  %v1607_v28 = vld [vmem:[#allocation5 + $0x80] sm:$0xff] }
 0x432   : > { %v4972_v57 = vpop.permute.xlu1 %1760 }
 0x436   : > { %v4976_v47 = vpop.permute.xlu1 %1770 }
 0x459   : > { %v2766_v58 = vpop.f32.mrb[24].mxu1 }
 0x45a   : > { %v2767_v31 = vpop.f32.mrb[25].mxu1  ;;  %v1435_v62 = vpop.xlane.xlu1 %1434 }
 0x45b   : > { %v2768_v15 = vadd.f32 %v2767_v31, %v2766_v58  ;;  %v1527_v6 = vadd.f32 %v1435_v62, %v1399_v39  ;;  %v2769_v50 = vpop.f32.mrb[26].mxu1  ;;  %v1432_v1 = vpop.xlane.xlu0 %1431  ;;  %v5541_v58 = vld [vmem:[#allocation73_spill] sm:$0xff]  ;;  %v1797_v31 = vmul.f32 %v1696_v26, %v1605_v13 }
 0x45c   : > { %v1526_v10 = vadd.f32 %v1432_v1, %v1398_v36  ;;  %v2770_v55 = vpop.f32.mrb[27].mxu1  ;;  %v1401_v39 = vmul.f32 %v5541_v58, %v1369_v4  ;;  %v1798_v1 = vmul.f32 %v4950_v35, %v1606_v9  ;;  %v1608_v4 = vld [vmem:[#allocation5 + $0x88] sm:$0xff]  ;;  %v1799_v9 = vmul.f32 %v4954_v30, %v1607_v28 }
 0x45d   : > { %v2068_v20 = vadd.f32 %v2768_v15, %v1795_v46  ;;  %1560 = vst.msk [vmem:[#allocation4 + $0x8] sm:$0xff] %vm1558_vm1, %v1527_v6  ;;  %v2771_v24 = vadd.f32 %v2770_v55, %v2769_v50  ;;  %v1371_v15 = vld [vmem:[#allocation4 + $0x28] sm:$0xff]  ;;  %v5542_v55 = vld [vmem:[#allocation77_spill] sm:$0xff] }
 0x45e   : > { %1559 = vst.msk [vmem:[#allocation4] sm:$0xff] %vm1558_vm1, %v1526_v10  ;;  %v1444_v25 = vpop.xlane.xlu1 %1443  ;;  %v5549_v28 = vld [vmem:[#allocation80_spill] sm:$0xff] }
 0x45f   : > { %2100 = vst [vmem:[#allocation5 + $0x60] sm:$0xff] %v2068_v20  ;;  %v2069_v41 = vadd.f32 %v2771_v24, %v1796_v5  ;;  %v1530_v29 = vadd.f32 %v1444_v25, %v1402_v22  ;;  %v1438_v21 = vpop.xlane.xlu0 %1437  ;;  %v1406_v5 = vmul.f32 %v5542_v55, %v1374_v2  ;;  %v5543_v24 = vld [vmem:[#allocation74_spill] sm:$0xff]  ;;  %v1375_v2 = vld [vmem:[#allocation4 + $0x48] sm:$0xff] }
 0x460   : > { %v1528_v44 = vadd.f32 %v1438_v21, %v1400_v37  ;;  %v1403_v26 = vmul.f32 %v5543_v24, %v1371_v15  ;;  %v1373_v37 = vld [vmem:[#allocation4 + $0x38] sm:$0xff]  ;;  %v1609_v24 = vld [vmem:[#allocation5 + $0x90] sm:$0xff] }
 0x461   : > { %2101 = vst [vmem:[#allocation5 + $0x68] sm:$0xff] %v2069_v41  ;;  %1563 = vst.msk [vmem:[#allocation4 + $0x20] sm:$0xff] %vm1558_vm1, %v1530_v29  ;;  %v2772_v59 = vpop.f32.mrb[28].mxu1  ;;  %v5544_v29 = vld [vmem:[#allocation78_spill] sm:$0xff] }
 0x462   : > { %1561 = vst.msk [vmem:[#allocation4 + $0x10] sm:$0xff] %vm1558_vm1, %v1528_v44  ;;  %v2773_v7 = vpop.f32.mrb[29].mxu1  ;;  %v1450_v12 = vpop.xlane.xlu1 %1449  ;;  %v1408_v21 = vmul.f32 %v5544_v29, %v1376_v3  ;;  %v5546_v15 = vld [vmem:[#allocation82_spill] sm:$0xff]  ;;  %v5548_v3 = vld [vmem:[#allocation83_spill] sm:$0xff]  ;;  %v1801_v29 = vmul.f32 %v4958_v18, %v1609_v24 }
 0x463   : > { %v2774_v62 = vadd.f32 %v2773_v7, %v2772_v59  ;;  %v1532_v36 = vadd.f32 %v1450_v12, %v1404_v38  ;;  %v2775_v52 = vpop.f32.mrb[30].mxu1  ;;  %v1441_v46 = vpop.xlane.xlu0 %1440  ;;  %v5545_v59 = vld [vmem:[#allocation76_spill] sm:$0xff]  ;;  %v1378_v38 = vld [vmem:[#allocation4 + $0x60] sm:$0xff] }
 0x464   : > { %v1529_v6 = vadd.f32 %v1441_v46, %v1401_v39  ;;  %v2776_v50 = vpop.f32.mrb[31].mxu1  ;;  %v1405_v19 = vmul.f32 %v5545_v59, %v1373_v37  ;;  %v1379_v59 = vld [vmem:[#allocation4 + $0x68] sm:$0xff] }
 0x465   : > { %v2070_v27 = vadd.f32 %v2774_v62, %v1797_v31  ;;  %1565 = vst.msk [vmem:[#allocation4 + $0x30] sm:$0xff] %vm1558_vm1, %v1532_v36  ;;  %v2777_v10 = vadd.f32 %v2776_v50, %v2775_v52  ;;  %v1800_v36 = vmul.f32 %v4952_v11, %v1608_v4 }
 0x466   : > { %1562 = vst.msk [vmem:[#allocation4 + $0x18] sm:$0xff] %vm1558_vm1, %v1529_v6  ;;  %v1456_v20 = vpop.xlane.xlu1 %1455  ;;  %v1410_v6 = vmul.f32 %v5546_v15, %v1378_v38  ;;  %v1381_v15 = vld [vmem:[#allocation4 + $0x78] sm:$0xff] }
 0x467   : > { %2102 = vst [vmem:[#allocation5 + $0x70] sm:$0xff] %v2070_v27  ;;  %v2071_v22 = vadd.f32 %v2777_v10, %v1798_v1  ;;  %v1534_v25 = vadd.f32 %v1456_v20, %v1406_v5  ;;  %v1447_v53 = vpop.xlane.xlu0 %1446  ;;  %v5547_v1 = vld [vmem:[#allocation79_spill] sm:$0xff]  ;;  %v1380_v27 = vld [vmem:[#allocation4 + $0x70] sm:$0xff]  ;;  %v1377_v20 = vld [vmem:[#allocation4 + $0x58] sm:$0xff] }
 0x468   : > { %v1531_v41 = vadd.f32 %v1447_v53, %v1403_v26  ;;  %v1407_v30 = vmul.f32 %v5547_v1, %v1375_v2 }
 0x469   : > { %2103 = vst [vmem:[#allocation5 + $0x78] sm:$0xff] %v2071_v22  ;;  %1567 = vst.msk [vmem:[#allocation4 + $0x40] sm:$0xff] %vm1558_vm1, %v1534_v25  ;;  %v2778_v35 = vpop.f32.mrb[32].mxu1  ;;  %v1412_v22 = vmul.f32 %v5548_v3, %v1380_v27  ;;  %v1610_v25 = vld [vmem:[#allocation5 + $0x98] sm:$0xff] }
 0x46a   : > { %1564 = vst.msk [vmem:[#allocation4 + $0x28] sm:$0xff] %vm1558_vm1, %v1531_v41  ;;  %v2779_v13 = vpop.f32.mrb[33].mxu1  ;;  %v1462_v44 = vpop.xlane.xlu1 %1461  ;;  %v1409_v41 = vmul.f32 %v5549_v28, %v1377_v20  ;;  %v1386_v20 = vld [vmem:[#allocation4 + $0xa0] sm:$0xff] }
 0x46b   : > { %v2780_v7 = vadd.f32 %v2779_v13, %v2778_v35  ;;  %v1536_v12 = vadd.f32 %v1462_v44, %v1408_v21  ;;  %v2781_v58 = vpop.f32.mrb[34].mxu1  ;;  %v1453_v39 = vpop.xlane.xlu0 %1452  ;;  %v1382_v35 = vld [vmem:[#allocation4 + $0x80] sm:$0xff] }
 0x46c   : > { %v1533_v31 = vadd.f32 %v1453_v39, %v1405_v19  ;;  %v2782_v62 = vpop.f32.mrb[35].mxu1 }
 0x46d   : > { %v2072_v52 = vadd.f32 %v2780_v7, %v1799_v9  ;;  %1569 = vst.msk [vmem:[#allocation4 + $0x50] sm:$0xff] %vm1558_vm1, %v1536_v12  ;;  %v2783_v46 = vadd.f32 %v2782_v62, %v2781_v58  ;;  %v1802_v9 = vmul.f32 %v4956_v8, %v1610_v25  ;;  %v5550_v58 = vld [vmem:[#allocation31_spill] sm:$0xff]  ;;  %v1384_v62 = vld [vmem:[#allocation4 + $0x90] sm:$0xff]  ;;  %v1383_v25 = vld [vmem:[#allocation4 + $0x88] sm:$0xff] }
 0x46e   : > { %1566 = vst.msk [vmem:[#allocation4 + $0x38] sm:$0xff] %vm1558_vm1, %v1533_v31  ;;  %v1468_v50 = vpop.xlane.xlu1 %1467  ;;  %v1414_v39 = vmul.f32 %v5550_v58, %v1382_v35  ;;  %v5551_v31 = vld [vmem:[#allocation81_spill] sm:$0xff]  ;;  %v1416_v1 = vmul.f32 %v4739_v63, %v1384_v62  ;;  %v1418_v35 = vmul.f32 %v4749_v14, %v1386_v20  ;;  %v1614_v14 = vld [vmem:[#allocation5 + $0xb8] sm:$0xff] }
 0x46f   : > { %2104 = vst [vmem:[#allocation5 + $0x80] sm:$0xff] %v2072_v52  ;;  %v2073_v10 = vadd.f32 %v2783_v46, %v1800_v36  ;;  %v1538_v55 = vadd.f32 %v1468_v50, %v1410_v6  ;;  %v1459_v5 = vpop.xlane.xlu0 %1458  ;;  %v1411_v18 = vmul.f32 %v5551_v31, %v1379_v59  ;;  %v1611_v6 = vld [vmem:[#allocation5 + $0xa0] sm:$0xff] }
 0x470   : > { %v1535_v26 = vadd.f32 %v1459_v5, %v1407_v30  ;;  %v1612_v30 = vld [vmem:[#allocation5 + $0xa8] sm:$0xff]  ;;  %v1803_v24 = vmul.f32 %v4962_v45, %v1611_v6  ;;  %v1390_v31 = vld [vmem:[#allocation4 + $0xc0] sm:$0xff] }
 0x471   : > { %2105 = vst [vmem:[#allocation5 + $0x88] sm:$0xff] %v2073_v10  ;;  %1571 = vst.msk [vmem:[#allocation4 + $0x60] sm:$0xff] %vm1558_vm1, %v1538_v55  ;;  %v2784_v11 = vpop.f32.mrb[36].mxu1  ;;  %v5552_v55 = vld [vmem:[#allocation84_spill] sm:$0xff]  ;;  %v1804_v28 = vmul.f32 %v4960_v40, %v1612_v30  ;;  %v1422_v30 = vmul.f32 %v4875_v16, %v1390_v31 }
 0x472   : > { %1568 = vst.msk [vmem:[#allocation4 + $0x48] sm:$0xff] %vm1558_vm1, %v1535_v26  ;;  %v2785_v53 = vpop.f32.mrb[37].mxu1  ;;  %v1474_v37 = vpop.xlane.xlu1 %1473  ;;  %v1413_v5 = vmul.f32 %v5552_v55, %v1381_v15  ;;  %v1387_v15 = vld [vmem:[#allocation4 + $0xa8] sm:$0xff]  ;;  %v1392_v55 = vld [vmem:[#allocation4 + $0xd0] sm:$0xff] }
 0x473   : > { %v2786_v21 = vadd.f32 %v2785_v53, %v2784_v11  ;;  %v1540_v4 = vadd.f32 %v1474_v37, %v1412_v22  ;;  %v2787_v13 = vpop.f32.mrb[38].mxu1  ;;  %v1465_v44 = vpop.xlane.xlu0 %1464  ;;  %v1616_v16 = vld [vmem:[#allocation5 + $0xc8] sm:$0xff] }
 0x474   : > { %v1537_v19 = vadd.f32 %v1465_v44, %v1409_v41  ;;  %v2788_v38 = vpop.f32.mrb[39].mxu1 }
 0x475   : > { %v2074_v7 = vadd.f32 %v2786_v21, %v1801_v29  ;;  %1573 = vst.msk [vmem:[#allocation4 + $0x70] sm:$0xff] %vm1558_vm1, %v1540_v4  ;;  %v2789_v12 = vadd.f32 %v2788_v38, %v2787_v13  ;;  %v5553_v21 = vld [vmem:[#allocation32_spill] sm:$0xff]  ;;  %v1388_v4 = vld [vmem:[#allocation4 + $0xb0] sm:$0xff] }
 0x476   : > { %1570 = vst.msk [vmem:[#allocation4 + $0x58] sm:$0xff] %vm1558_vm1, %v1537_v19  ;;  %v1480_v2 = vpop.xlane.xlu1 %1479  ;;  %v1415_v45 = vmul.f32 %v5553_v21, %v1383_v25  ;;  %v1385_v19 = vld [vmem:[#allocation4 + $0x98] sm:$0xff]  ;;  %v1613_v38 = vld [vmem:[#allocation5 + $0xb0] sm:$0xff] }
 0x477   : > { %2106 = vst [vmem:[#allocation5 + $0x90] sm:$0xff] %v2074_v7  ;;  %v2075_v36 = vadd.f32 %v2789_v12, %v1802_v9  ;;  %v1542_v52 = vadd.f32 %v1480_v2, %v1414_v39  ;;  %v1471_v46 = vpop.xlane.xlu0 %1470  ;;  %v1420_v7 = vmul.f32 %v4761_v34, %v1388_v4  ;;  %v5554_v39 = vld [vmem:[#allocation85_spill] sm:$0xff] }
 0x478   : > { %v1539_v50 = vadd.f32 %v1471_v46, %v1411_v18  ;;  %v1417_v2 = vmul.f32 %v5554_v39, %v1385_v19  ;;  %v1805_v18 = vmul.f32 %v4966_v32, %v1613_v38  ;;  %v1618_v39 = vld [vmem:[#allocation5 + $0xd8] sm:$0xff] }
 0x479   : > { %2107 = vst [vmem:[#allocation5 + $0x98] sm:$0xff] %v2075_v36  ;;  %1575 = vst.msk [vmem:[#allocation4 + $0x80] sm:$0xff] %vm1558_vm1, %v1542_v52  ;;  %v2790_v8 = vpop.f32.mrb[40].mxu1 }
 0x47a   : > { %1572 = vst.msk [vmem:[#allocation4 + $0x68] sm:$0xff] %vm1558_vm1, %v1539_v50  ;;  %v2791_v27 = vpop.f32.mrb[41].mxu1  ;;  %v1486_v10 = vpop.xlane.xlu1 %1485 }
 0x47b   : > { %v2792_v26 = vadd.f32 %v2791_v27, %v2790_v8  ;;  %v1544_v11 = vadd.f32 %v1486_v10, %v1416_v1  ;;  %v2793_v3 = vpop.f32.mrb[42].mxu1  ;;  %v1477_v22 = vpop.xlane.xlu0 %1476  ;;  %v1806_v8 = vmul.f32 %v4964_v33, %v1614_v14  ;;  %v5555_v10 = vld [vmem:[#allocation86_spill] sm:$0xff]  ;;  %v1617_v14 = vld [vmem:[#allocation5 + $0xd0] sm:$0xff] }
 0x47c   : > { %v1541_v53 = vadd.f32 %v1477_v22, %v1413_v5  ;;  %v2794_v37 = vpop.f32.mrb[43].mxu1  ;;  %v1419_v32 = vmul.f32 %v5555_v10, %v1387_v15  ;;  %v1424_v22 = vmul.f32 %v4896_v54, %v1392_v55  ;;  %v1619_v10 = vld [vmem:[#allocation5 + $0xe0] sm:$0xff]  ;;  %v1620_v55 = vld [vmem:[#allocation5 + $0xe8] sm:$0xff] }
 0x47d   : > { %v2076_v63 = vadd.f32 %v2792_v26, %v1803_v24  ;;  %1577 = vst.msk [vmem:[#allocation4 + $0x90] sm:$0xff] %vm1558_vm1, %v1544_v11  ;;  %v2795_v41 = vadd.f32 %v2794_v37, %v2793_v3  ;;  %v1389_v26 = vld [vmem:[#allocation4 + $0xb8] sm:$0xff]  ;;  %v1615_v11 = vld [vmem:[#allocation5 + $0xc0] sm:$0xff] }
 0x47e   : > { %1574 = vst.msk [vmem:[#allocation4 + $0x78] sm:$0xff] %vm1558_vm1, %v1541_v53  ;;  %v1492_v29 = vpop.xlane.xlu1 %1491  ;;  %v1421_v37 = vmul.f32 %v4765_v51, %v1389_v26 }
 0x47f   : > { %2108 = vst [vmem:[#allocation5 + $0xa0] sm:$0xff] %v2076_v63  ;;  %v2077_v13 = vadd.f32 %v2795_v41, %v1804_v28  ;;  %v1546_v44 = vadd.f32 %v1492_v29, %v1418_v35  ;;  %v1483_v59 = vpop.xlane.xlu0 %1482  ;;  %v1394_v28 = vld [vmem:[#allocation4 + $0xe0] sm:$0xff]  ;;  %v1807_v63 = vmul.f32 %v4970_v48, %v1615_v11 }
 0x480   : > { %v1543_v9 = vadd.f32 %v1483_v59, %v1415_v45  ;;  %v1391_v45 = vld [vmem:[#allocation4 + $0xc8] sm:$0xff]  ;;  %v1426_v19 = vmul.f32 %v4903_v23, %v1394_v28 }
 0x481   : > { %2109 = vst [vmem:[#allocation5 + $0xa8] sm:$0xff] %v2077_v13  ;;  %1579 = vst.msk [vmem:[#allocation4 + $0xa0] sm:$0xff] %vm1558_vm1, %v1546_v44  ;;  %v2796_v40 = vpop.f32.mrb[44].mxu1  ;;  %v1808_v44 = vmul.f32 %v4968_v0, %v1616_v16  ;;  %v1423_v48 = vmul.f32 %v4883_v17, %v1391_v45  ;;  %v1809_v17 = vmul.f32 %v4974_v56, %v1617_v14 }
 0x482   : > { %1576 = vst.msk [vmem:[#allocation4 + $0x88] sm:$0xff] %vm1558_vm1, %v1543_v9  ;;  %v2797_v12 = vpop.f32.mrb[45].mxu1  ;;  %v1498_v58 = vpop.xlane.xlu1 %1497 }
 0x483   : > { %v2798_v62 = vadd.f32 %v2797_v12, %v2796_v40  ;;  %v2799_v36 = vpop.f32.mrb[46].mxu1  ;;  %v1548_v52 = vadd.f32 %v1498_v58, %v1420_v7  ;;  %v1489_v46 = vpop.xlane.xlu0 %1488  ;;  %v1393_v7 = vld [vmem:[#allocation4 + $0xd8] sm:$0xff]  ;;  %v1396_v58 = vld [vmem:[#allocation4 + $0xf0] sm:$0xff] }
 0x484   : > { %v1545_v6 = vadd.f32 %v1489_v46, %v1417_v2  ;;  %v2800_v50 = vpop.f32.mrb[47].mxu1  ;;  %v1425_v2 = vmul.f32 %v4891_v61, %v1393_v7  ;;  %v1428_v15 = vmul.f32 %v4947_v43, %v1396_v58  ;;  %v2164_v58 = vld [vmem:[#allocation4 + $0x40] sm:$0xff] (!%p2659_p12) }
 0x485   : > { %v2078_v34 = vadd.f32 %v2798_v62, %v1805_v18  ;;  %1581 = vst.msk [vmem:[#allocation4 + $0xb0] sm:$0xff] %vm1558_vm1, %v1548_v52  ;;  %v2801_v1 = vadd.f32 %v2800_v50, %v2799_v36  ;;  %v1395_v36 = vld [vmem:[#allocation4 + $0xe8] sm:$0xff] }
 0x486   : > { %1578 = vst.msk [vmem:[#allocation4 + $0x98] sm:$0xff] %vm1558_vm1, %v1545_v6  ;;  %v1504_v27 = vpop.xlane.xlu1 %1503  ;;  %v1810_v6 = vmul.f32 %v4972_v57, %v1618_v39  ;;  %v1427_v61 = vmul.f32 %v4899_v60, %v1395_v36  ;;  %v2168_v36 = vld [vmem:[#allocation4 + $0x60] sm:$0xff] (!%p2659_p12) }
 0x487   : > { %2110 = vst [vmem:[#allocation5 + $0xb0] sm:$0xff] %v2078_v34  ;;  %v2079_v5 = vadd.f32 %v2801_v1, %v1806_v8  ;;  %v1550_v20 = vadd.f32 %v1504_v27, %v1422_v30  ;;  %v1495_v24 = vpop.xlane.xlu0 %1494  ;;  %v1397_v27 = vld [vmem:[#allocation4 + $0xf8] sm:$0xff] }
 0x488   : > { %v1547_v3 = vadd.f32 %v1495_v24, %v1419_v32 }
 0x489   : > { %2111 = vst [vmem:[#allocation5 + $0xb8] sm:$0xff] %v2079_v5  ;;  %1583 = vst.msk [vmem:[#allocation4 + $0xc0] sm:$0xff] %vm1558_vm1, %v1550_v20  ;;  %v2802_v33 = vpop.f32.mrb[48].mxu1  ;;  %v1429_v5 = vmul.f32 %v4944_v49, %v1397_v27  ;;  %v1811_v20 = vmul.f32 %v4978_v42, %v1619_v10  ;;  %v1622_v49 = vld [vmem:[#allocation5 + $0xf8] sm:$0xff]  ;;  %v2174_v27 = vld [vmem:[#allocation4 + $0x90] sm:$0xff] (!%p2659_p12) }
 0x48a   : > { %1580 = vst.msk [vmem:[#allocation4 + $0xa8] sm:$0xff] %vm1558_vm1, %v1547_v3  ;;  %v2803_v25 = vpop.f32.mrb[49].mxu1  ;;  %v1510_v53 = vpop.xlane.xlu1 %1509 }
 0x48b   : > { %v2804_v41 = vadd.f32 %v2803_v25, %v2802_v33  ;;  %v2805_v35 = vpop.f32.mrb[50].mxu1  ;;  %v1552_v29 = vadd.f32 %v1510_v53, %v1424_v22  ;;  %v1501_v21 = vpop.xlane.xlu0 %1500  ;;  %v1812_v33 = vmul.f32 %v4976_v47, %v1620_v55  ;;  %v1621_v53 = vld [vmem:[#allocation5 + $0xf0] sm:$0xff]  ;;  %v2176_v55 = vld [vmem:[#allocation4 + $0xa0] sm:$0xff] (!%p2659_p12) }
 0x48c   : > { %v1549_v4 = vadd.f32 %v1501_v21, %v1421_v37  ;;  %v2806_v13 = vpop.f32.mrb[51].mxu1 }
 0x48d   : > { %v2080_v54 = vadd.f32 %v2804_v41, %v1807_v63  ;;  %1585 = vst.msk [vmem:[#allocation4 + $0xd0] sm:$0xff] %vm1558_vm1, %v1552_v29  ;;  %v2807_v59 = vadd.f32 %v2806_v13, %v2805_v35 }
 0x48e   : > { %1582 = vst.msk [vmem:[#allocation4 + $0xb8] sm:$0xff] %vm1558_vm1, %v1549_v4  ;;  %v1516_v51 = vpop.xlane.xlu1 %1515 }
 0x48f   : > { %2112 = vst [vmem:[#allocation5 + $0xc0] sm:$0xff] %v2080_v54  ;;  %v2081_v38 = vadd.f32 %v2807_v59, %v1808_v44  ;;  %v1554_v9 = vadd.f32 %v1516_v51, %v1426_v19  ;;  %v1507_v40 = vpop.xlane.xlu0 %1506  ;;  %v2158_v44 = vld [vmem:[#allocation4 + $0x10] sm:$0xff] (!%p2659_p12)  ;;  %v2156_v54 = vld [vmem:[#allocation4] sm:$0xff] (!%p2659_p12)  ;;  %v2159_v59 = vld [vmem:[#allocation4 + $0x18] sm:$0xff] (!%p2659_p12)  ;;  %v3464_v19 = vmov (!%p2659_p12), 0  }
 0x490   : > { %v1551_v12 = vadd.f32 %v1507_v40, %v1423_v48  ;;  %3157 = vset.pattern.permute.xlu1 (!%p2659_p12), %v3464_v19  ;;  %3156 = vset.pattern.permute.xlu0 (!%p2659_p12), %v3464_v19  ;;  %3158 = vrcp.f32 (!%p2659_p12), %v2158_v44  ;;  %v2157_v51 = vld [vmem:[#allocation4 + $0x8] sm:$0xff] (!%p2659_p12)  ;;  %v2162_v40 = vld [vmem:[#allocation4 + $0x30] sm:$0xff] (!%p2659_p12) }
 0x491   : > { %2113 = vst [vmem:[#allocation5 + $0xc8] sm:$0xff] %v2081_v38  ;;  %1587 = vst.msk [vmem:[#allocation4 + $0xe0] sm:$0xff] %vm1558_vm1, %v1554_v9  ;;  %v2808_v0 = vpop.f32.mrb[52].mxu1  ;;  %3160 = vrcp.f32 (!%p2659_p12), %v2156_v54  ;;  %v2161_v48 = vld [vmem:[#allocation4 + $0x28] sm:$0xff] (!%p2659_p12)  ;;  %v2160_v38 = vld [vmem:[#allocation4 + $0x20] sm:$0xff] (!%p2659_p12) }
 0x492   : > { %1584 = vst.msk [vmem:[#allocation4 + $0xc8] sm:$0xff] %vm1558_vm1, %v1551_v12  ;;  %v2809_v23 = vpop.f32.mrb[53].mxu1  ;;  %3162 = vrcp.f32 (!%p2659_p12), %v2159_v59  ;;  %v2163_v9 = vld [vmem:[#allocation4 + $0x38] sm:$0xff] (!%p2659_p12)  ;;  %v2165_v12 = vld [vmem:[#allocation4 + $0x48] sm:$0xff] (!%p2659_p12)  ;;  %v2222_v54 = vld [vmem:[#allocation5 + $0x10] sm:$0xff] (!%p2659_p12) }
 0x493   : > { %v2810_v31 = vadd.f32 %v2809_v23, %v2808_v0  ;;  %v2811_v18 = vpop.f32.mrb[54].mxu1  ;;  %v1513_v62 = vpop.xlane.xlu0 %1512  ;;  %3164 = vrcp.f32 (!%p2659_p12), %v2157_v51  ;;  %v2167_v23 = vld [vmem:[#allocation4 + $0x58] sm:$0xff] (!%p2659_p12)  ;;  %v2220_v59 = vld [vmem:[#allocation5] sm:$0xff] (!%p2659_p12) }
 0x494   : > { %v1553_v52 = vadd.f32 %v1513_v62, %v1425_v2  ;;  %v2812_v46 = vpop.f32.mrb[55].mxu1  ;;  %3166 = vrcp.f32 (!%p2659_p12), %v2161_v48 }
 0x495   : > { %v2082_v50 = vadd.f32 %v2810_v31, %v1809_v17  ;;  %v2813_v8 = vadd.f32 %v2812_v46, %v2811_v18  ;;  %v1522_v34 = vpop.xlane.xlu1 %1521  ;;  %3168 = vrcp.f32 (!%p2659_p12), %v2160_v38  ;;  %v2166_v17 = vld [vmem:[#allocation4 + $0x50] sm:$0xff] (!%p2659_p12)  ;;  %v2169_v18 = vld [vmem:[#allocation4 + $0x68] sm:$0xff] (!%p2659_p12)  ;;  %v2171_v46 = vld [vmem:[#allocation4 + $0x78] sm:$0xff] (!%p2659_p12) }
 0x496   : > { %1586 = vst.msk [vmem:[#allocation4 + $0xd8] sm:$0xff] %vm1558_vm1, %v1553_v52  ;;  %v1556_v1 = vadd.f32 %v1522_v34, %v1428_v15  ;;  %3170 = vrcp.f32 (!%p2659_p12), %v2163_v9  ;;  %v2223_v9 = vld [vmem:[#allocation5 + $0x18] sm:$0xff] (!%p2659_p12) }
 0x497   : > { %2114 = vst [vmem:[#allocation5 + $0xd0] sm:$0xff] %v2082_v50  ;;  %v2083_v56 = vadd.f32 %v2813_v8, %v1810_v6  ;;  %v1519_v30 = vpop.xlane.xlu0 %1518  ;;  %3172 = vrcp.f32 (!%p2659_p12), %v2162_v40  ;;  %v2170_v6 = vld [vmem:[#allocation4 + $0x70] sm:$0xff] (!%p2659_p12)  ;;  %v2173_v8 = vld [vmem:[#allocation4 + $0x88] sm:$0xff] (!%p2659_p12) }
 0x498   : > { %1589 = vst.msk [vmem:[#allocation4 + $0xf0] sm:$0xff] %vm1558_vm1, %v1556_v1  ;;  %v1555_v32 = vadd.f32 %v1519_v30, %v1427_v61  ;;  %3174 = vrcp.f32 (!%p2659_p12), %v2165_v12  ;;  %v2172_v1 = vld [vmem:[#allocation4 + $0x80] sm:$0xff] (!%p2659_p12)  ;;  %v2221_v40 = vld [vmem:[#allocation5 + $0x8] sm:$0xff] (!%p2659_p12) }
 0x499   : > { %2115 = vst [vmem:[#allocation5 + $0xd8] sm:$0xff] %v2083_v56  ;;  %v2814_v43 = vpop.f32.mrb[56].mxu1  ;;  %v1781_v63 = vpop.permute.xlu1 %1780  ;;  %3176 = vrcp.f32 (!%p2659_p12), %v2164_v58  ;;  %v2175_v56 = vld [vmem:[#allocation4 + $0x98] sm:$0xff] (!%p2659_p12)  ;;  %v2225_v58 = vld [vmem:[#allocation5 + $0x28] sm:$0xff] (!%p2659_p12) }
 0x49a   : > { %1588 = vst.msk [vmem:[#allocation4 + $0xe8] sm:$0xff] %vm1558_vm1, %v1555_v32  ;;  %v2815_v57 = vpop.f32.mrb[57].mxu1  ;;  %v1814_v45 = vmul.f32 %v1781_v63, %v1622_v49  ;;  %v3159_v7 = vpop.eup (!%p2659_p12), %3158  ;;  %3178 = vrcp.f32 (!%p2659_p12), %v2167_v23  ;;  %v2177_v32 = vld [vmem:[#allocation4 + $0xa8] sm:$0xff] (!%p2659_p12)  ;;  %v2184_v49 = vld [vmem:[#allocation4 + $0xe0] sm:$0xff] (!%p2659_p12) }
 0x49b   : > { %v2816_v24 = vadd.f32 %v2815_v57, %v2814_v43  ;;  %v2817_v60 = vpop.f32.mrb[58].mxu1  ;;  %v1525_v26 = vpop.xlane.xlu0 %1524  ;;  %2264 = vperm.xlu1 (!%p2659_p12), %3157, %v3159_v7   ;;  %3180 = vrcp.f32 (!%p2659_p12), %v2166_v17 }
 0x49c   : > { %v1557_v11 = vadd.f32 %v1525_v26, %v1429_v5  ;;  %v2818_v3 = vpop.f32.mrb[59].mxu1  ;;  %v3161_v14 = vpop.eup (!%p2659_p12), %3160  ;;  %3182 = vrcp.f32 (!%p2659_p12), %v2169_v18  ;;  %v2179_v5 = vld [vmem:[#allocation4 + $0xb8] sm:$0xff] (!%p2659_p12)  ;;  %v2181_v26 = vld [vmem:[#allocation4 + $0xc8] sm:$0xff] (!%p2659_p12) }
 0x49d   : > { %v2084_v22 = vadd.f32 %v2816_v24, %v1811_v20  ;;  %v2819_v16 = vadd.f32 %v2818_v3, %v2817_v60  ;;  %v3163_v0 = vpop.eup (!%p2659_p12), %3162  ;;  %2254 = vperm.xlu0 (!%p2659_p12), %3156, %v3161_v14   ;;  %3184 = vrcp.f32 (!%p2659_p12), %v2168_v36  ;;  %v2178_v24 = vld [vmem:[#allocation4 + $0xb0] sm:$0xff] (!%p2659_p12)  ;;  %v2180_v3 = vld [vmem:[#allocation4 + $0xc0] sm:$0xff] (!%p2659_p12)  ;;  %v2227_v18 = vld [vmem:[#allocation5 + $0x38] sm:$0xff] (!%p2659_p12) }
 0x49e   : > { %1590 = vst.msk [vmem:[#allocation4 + $0xf8] sm:$0xff] %vm1558_vm1, %v1557_v11  ;;  %v3165_v39 = vpop.eup (!%p2659_p12), %3164  ;;  %3186 = vrcp.f32 (!%p2659_p12), %v2171_v46 }
 0x49f   : > { %2116 = vst [vmem:[#allocation5 + $0xe0] sm:$0xff] %v2084_v22  ;;  %v2085_v25 = vadd.f32 %v2819_v16, %v1812_v33  ;;  %2269 = vperm.xlu1 (!%p2659_p12), %3157, %v3163_v0   ;;  %v3167_v2 = vpop.eup (!%p2659_p12), %3166  ;;  %3188 = vrcp.f32 (!%p2659_p12), %v2170_v6  ;;  %v2183_v22 = vld [vmem:[#allocation4 + $0xd8] sm:$0xff] (!%p2659_p12)  ;;  %v2229_v6 = vld [vmem:[#allocation5 + $0x48] sm:$0xff] (!%p2659_p12) }
 0x4a0   : > { %v3169_v31 = vpop.eup (!%p2659_p12), %3168  ;;  %3190 = vrcp.f32 (!%p2659_p12), %v2173_v8 }
 0x4a1   : > { %2117 = vst [vmem:[#allocation5 + $0xe8] sm:$0xff] %v2085_v25  ;;  %2259 = vperm.xlu0 (!%p2659_p12), %3156, %v3165_v39   ;;  %v3171_v62 = vpop.eup (!%p2659_p12), %3170  ;;  %3192 = vrcp.f32 (!%p2659_p12), %v2172_v1  ;;  %v2182_v25 = vld [vmem:[#allocation4 + $0xd0] sm:$0xff] (!%p2659_p12)  ;;  %v2224_v39 = vld [vmem:[#allocation5 + $0x20] sm:$0xff] (!%p2659_p12) }
 0x4a2   : > { %v1776_v37 = vpop.permute.xlu0 %1775  ;;  %v3173_v52 = vpop.eup (!%p2659_p12), %3172  ;;  %3194 = vrcp.f32 (!%p2659_p12), %v2175_v56  ;;  %v2231_v56 = vld [vmem:[#allocation5 + $0x58] sm:$0xff] (!%p2659_p12) }
 0x4a3   : > { %v1813_v41 = vmul.f32 %v1776_v37, %v1621_v53  ;;  %2279 = vperm.xlu1 (!%p2659_p12), %3157, %v3167_v2   ;;  %v3175_v15 = vpop.eup (!%p2659_p12), %3174  ;;  %3196 = vrcp.f32 (!%p2659_p12), %v2174_v27  ;;  %v2185_v37 = vld [vmem:[#allocation4 + $0xe8] sm:$0xff] (!%p2659_p12) }
 0x4a4   : > { %v3177_v50 = vpop.eup (!%p2659_p12), %3176  ;;  %3198 = vrcp.f32 (!%p2659_p12), %v2177_v32 }
 0x4a5   : > { %2274 = vperm.xlu0 (!%p2659_p12), %3156, %v3169_v31   ;;  %v3179_v34 = vpop.eup (!%p2659_p12), %3178  ;;  %3200 = vrcp.f32 (!%p2659_p12), %v2176_v55  ;;  %v2233_v55 = vld [vmem:[#allocation5 + $0x68] sm:$0xff] (!%p2659_p12) }
 0x4a6   : > { %v3181_v61 = vpop.eup (!%p2659_p12), %3180  ;;  %3202 = vrcp.f32 (!%p2659_p12), %v2179_v5 }
 0x4a7   : > { %2289 = vperm.xlu1 (!%p2659_p12), %3157, %v3171_v62   ;;  %v3183_v30 = vpop.eup (!%p2659_p12), %3182  ;;  %3204 = vrcp.f32 (!%p2659_p12), %v2178_v24  ;;  %v2226_v62 = vld [vmem:[#allocation5 + $0x30] sm:$0xff] (!%p2659_p12) }
 0x4a8   : > { %v3185_v10 = vpop.eup (!%p2659_p12), %3184  ;;  %3206 = vrcp.f32 (!%p2659_p12), %v2181_v26  ;;  %v2235_v26 = vld [vmem:[#allocation5 + $0x78] sm:$0xff] (!%p2659_p12) }
 0x4a9   : > { %2284 = vperm.xlu0 (!%p2659_p12), %3156, %v3173_v52   ;;  %v3187_v43 = vpop.eup (!%p2659_p12), %3186  ;;  %3208 = vrcp.f32 (!%p2659_p12), %v2180_v3 }
 0x4aa   : > { %v3189_v57 = vpop.eup (!%p2659_p12), %3188  ;;  %3210 = vrcp.f32 (!%p2659_p12), %v2183_v22 }
 0x4ab   : > { %2299 = vperm.xlu1 (!%p2659_p12), %3157, %v3175_v15   ;;  %v3191_v20 = vpop.eup (!%p2659_p12), %3190  ;;  %3212 = vrcp.f32 (!%p2659_p12), %v2182_v25  ;;  %v2237_v25 = vld [vmem:[#allocation5 + $0x88] sm:$0xff] (!%p2659_p12) }
 0x4ac   : > { %v3193_v60 = vpop.eup (!%p2659_p12), %3192  ;;  %3214 = vrcp.f32 (!%p2659_p12), %v2185_v37 }
 0x4ad   : > { %2294 = vperm.xlu0 (!%p2659_p12), %3156, %v3177_v50   ;;  %v3195_v11 = vpop.eup (!%p2659_p12), %3194  ;;  %3216 = vrcp.f32 (!%p2659_p12), %v2184_v49  ;;  %v2228_v50 = vld [vmem:[#allocation5 + $0x40] sm:$0xff] (!%p2659_p12) }
 0x4ae   : > { %v3197_v33 = vpop.eup (!%p2659_p12), %3196 }
 0x4af   : > { %2309 = vperm.xlu1 (!%p2659_p12), %3157, %v3179_v34   ;;  %v3199_v16 = vpop.eup (!%p2659_p12), %3198 }
 0x4b0   : > { %v3201_v53 = vpop.eup (!%p2659_p12), %3200 }
 0x4b1   : > { %2304 = vperm.xlu0 (!%p2659_p12), %3156, %v3181_v61  }
 0x4b3   : > { %2319 = vperm.xlu1 (!%p2659_p12), %3157, %v3183_v30   ;;  %v2230_v30 = vld [vmem:[#allocation5 + $0x50] sm:$0xff] (!%p2659_p12) }
 0x4b5   : > { %2314 = vperm.xlu0 (!%p2659_p12), %3156, %v3185_v10  }
 0x4b7   : > { %2329 = vperm.xlu1 (!%p2659_p12), %3157, %v3187_v43  }
 0x4b9   : > { %2324 = vperm.xlu0 (!%p2659_p12), %3156, %v3189_v57   ;;  %v2232_v57 = vld [vmem:[#allocation5 + $0x60] sm:$0xff] (!%p2659_p12) }
 0x4bb   : > { %2339 = vperm.xlu1 (!%p2659_p12), %3157, %v3191_v20  }
 0x4bd   : > { %2334 = vperm.xlu0 (!%p2659_p12), %3156, %v3193_v60  }
 0x4bf   : > { %2349 = vperm.xlu1 (!%p2659_p12), %3157, %v3195_v11   ;;  %v2234_v11 = vld [vmem:[#allocation5 + $0x70] sm:$0xff] (!%p2659_p12) }
 0x4c1   : > { %2344 = vperm.xlu0 (!%p2659_p12), %3156, %v3197_v33  }
 0x4c3   : > { %2359 = vperm.xlu1 (!%p2659_p12), %3157, %v3199_v16  }
 0x4c5   : > { %2354 = vperm.xlu0 (!%p2659_p12), %3156, %v3201_v53   ;;  %v2236_v53 = vld [vmem:[#allocation5 + $0x80] sm:$0xff] (!%p2659_p12) }
 0x4dc   : > { %v2820_v28 = vpop.f32.mrb[60].mxu1 }
 0x4dd   : > { %v2821_v42 = vpop.f32.mrb[61].mxu1 }
 0x4de   : > { %v2822_v35 = vadd.f32 %v2821_v42, %v2820_v28  ;;  %v2823_v29 = vpop.f32.mrb[62].mxu1  ;;  %2155 = sbr.rel (%p2659_p12) target bundleno = 1395 (0x573), region = 52  ;;  %v3203_v28 = vpop.eup (!%p2659_p12), %3202  ;;  %v2187_v42 = vld [vmem:[#allocation4 + $0xf8] sm:$0xff] (!%p2659_p12) }
 0x4df   : > { %v2824_v21 = vpop.f32.mrb[63].mxu1  ;;  %v3205_v63 = vpop.eup (!%p2659_p12), %3204  ;;  %2369 = vperm.xlu1 (!%p2659_p12), %3157, %v3203_v28   ;;  %3218 = vrcp.f32 (!%p2659_p12), %v2187_v42  ;;  %v2239_v42 = vld [vmem:[#allocation5 + $0x98] sm:$0xff] (!%p2659_p12) }
 0x4e0   : > { %v2086_v4 = vadd.f32 %v2822_v35, %v1813_v41  ;;  %v2825_v47 = vadd.f32 %v2824_v21, %v2823_v29  ;;  %v3207_v41 = vpop.eup (!%p2659_p12), %3206  ;;  %2364 = vperm.xlu0 (!%p2659_p12), %3156, %v3205_v63   ;;  %v2186_v35 = vld [vmem:[#allocation4 + $0xf0] sm:$0xff] (!%p2659_p12) }
 0x4e1   : > { %v3209_v29 = vpop.eup (!%p2659_p12), %3208  ;;  %3220 = vrcp.f32 (!%p2659_p12), %v2186_v35 }
 0x4e2   : > { %2118 = vst [vmem:[#allocation5 + $0xf0] sm:$0xff] %v2086_v4  ;;  %v2087_v13 = vadd.f32 %v2825_v47, %v1814_v45  ;;  %v3211_v21 = vpop.eup (!%p2659_p12), %3210 }
 0x4e3   : > { %2379 = vperm.xlu1 (!%p2659_p12), %3157, %v3207_v41   ;;  %v3213_v45 = vpop.eup (!%p2659_p12), %3212  ;;  %v2238_v41 = vld [vmem:[#allocation5 + $0x90] sm:$0xff] (!%p2659_p12) }
 0x4e4   : > { %2119 = vst [vmem:[#allocation5 + $0xf8] sm:$0xff] %v2087_v13  ;;  %2374 = vperm.xlu0 (!%p2659_p12), %3156, %v3209_v29   ;;  %v3215_v4 = vpop.eup (!%p2659_p12), %3214 }
 0x4e5   : > { %v3217_v47 = vpop.eup %3216 }
 0x4e7   : > { %2389 = vperm.xlu1 %3157, %v3211_v21  }
 0x4e8   : > { %2384 = vperm.xlu0 %3156, %v3213_v45  }
 0x4e9   : > { %v3219_v13 = vpop.eup %3218 }
 0x4eb   : > { %2399 = vperm.xlu1 %3157, %v3215_v4   ;;  %v3221_v44 = vpop.eup %3220  ;;  %v2241_v4 = vld [vmem:[#allocation5 + $0xa8] sm:$0xff] }
 0x4ec   : > { %2394 = vperm.xlu0 %3156, %v3217_v47   ;;  %v2240_v47 = vld [vmem:[#allocation5 + $0xa0] sm:$0xff] }
 0x4ef   : > { %2409 = vperm.xlu1 %3157, %v3219_v13  }
 0x4f0   : > { %2404 = vperm.xlu0 %3156, %v3221_v44  }
 0x51a   : > { %v2265_v19 = vpop.permute.xlu1 %2264 }
 0x51b   : > { %v2414_v51 = vmul.f32 %v2265_v19, %v2222_v54  ;;  %v2243_v19 = vld [vmem:[#allocation5 + $0xb8] sm:$0xff] }
 0x51c   : > { %v2255_v48 = vpop.permute.xlu0 %2254 }
 0x51d   : > { %v2412_v38 = vmul.f32 %v2255_v48, %v2220_v59  ;;  %2446 = vst [vmem:[%s3816_s22 + $0x10] sm:$0xff] %v2414_v51  ;;  %v2242_v51 = vld [vmem:[#allocation5 + $0xb0] sm:$0xff] }
 0x51e   : > { %v2270_v7 = vpop.permute.xlu1 %2269 }
 0x51f   : > { %2444 = vst [vmem:[%s3816_s22] sm:$0xff] %v2412_v38  ;;  %v2415_v14 = vmul.f32 %v2270_v7, %v2223_v9  ;;  %v2245_v7 = vld [vmem:[#allocation5 + $0xc8] sm:$0xff] }
 0x520   : > { %v2260_v12 = vpop.permute.xlu0 %2259 }
 0x521   : > { %v2413_v0 = vmul.f32 %v2260_v12, %v2221_v40  ;;  %2447 = vst [vmem:[%s3816_s22 + $0x18] sm:$0xff] %v2415_v14  ;;  %v2244_v14 = vld [vmem:[#allocation5 + $0xc0] sm:$0xff] }
 0x522   : > { %v2280_v23 = vpop.permute.xlu1 %2279 }
 0x523   : > { %2445 = vst [vmem:[%s3816_s22 + $0x8] sm:$0xff] %v2413_v0  ;;  %v2417_v2 = vmul.f32 %v2280_v23, %v2225_v58  ;;  %v2247_v23 = vld [vmem:[#allocation5 + $0xd8] sm:$0xff] }
 0x524   : > { %v2275_v17 = vpop.permute.xlu0 %2274 }
 0x525   : > { %v2416_v31 = vmul.f32 %v2275_v17, %v2224_v39  ;;  %2449 = vst [vmem:[%s3816_s22 + $0x28] sm:$0xff] %v2417_v2  ;;  %v2246_v2 = vld [vmem:[#allocation5 + $0xd0] sm:$0xff] }
 0x526   : > { %v2290_v36 = vpop.permute.xlu1 %2289 }
 0x527   : > { %2448 = vst [vmem:[%s3816_s22 + $0x20] sm:$0xff] %v2416_v31  ;;  %v2419_v52 = vmul.f32 %v2290_v36, %v2227_v18  ;;  %v2249_v36 = vld [vmem:[#allocation5 + $0xe8] sm:$0xff] }
 0x528   : > { %v2285_v46 = vpop.permute.xlu0 %2284 }
 0x529   : > { %v2418_v15 = vmul.f32 %v2285_v46, %v2226_v62  ;;  %2451 = vst [vmem:[%s3816_s22 + $0x38] sm:$0xff] %v2419_v52  ;;  %v2248_v52 = vld [vmem:[#allocation5 + $0xe0] sm:$0xff] }
 0x52a   : > { %v2300_v8 = vpop.permute.xlu1 %2299 }
 0x52b   : > { %2450 = vst [vmem:[%s3816_s22 + $0x30] sm:$0xff] %v2418_v15  ;;  %v2421_v34 = vmul.f32 %v2300_v8, %v2229_v6  ;;  %v2251_v8 = vld [vmem:[#allocation5 + $0xf8] sm:$0xff] }
 0x52c   : > { %v2295_v1 = vpop.permute.xlu0 %2294 }
 0x52d   : > { %v2420_v61 = vmul.f32 %v2295_v1, %v2228_v50  ;;  %2453 = vst [vmem:[%s3816_s22 + $0x48] sm:$0xff] %v2421_v34  ;;  %v2250_v34 = vld [vmem:[#allocation5 + $0xf0] sm:$0xff] }
 0x52e   : > { %v2310_v27 = vpop.permute.xlu1 %2309 }
 0x52f   : > { %2452 = vst [vmem:[%s3816_s22 + $0x40] sm:$0xff] %v2420_v61  ;;  %v2423_v10 = vmul.f32 %v2310_v27, %v2231_v56 }
 0x530   : > { %v2305_v32 = vpop.permute.xlu0 %2304 }
 0x531   : > { %v2422_v43 = vmul.f32 %v2305_v32, %v2230_v30  ;;  %2455 = vst [vmem:[%s3816_s22 + $0x58] sm:$0xff] %v2423_v10 }
 0x532   : > { %v2320_v5 = vpop.permute.xlu1 %2319 }
 0x533   : > { %2454 = vst [vmem:[%s3816_s22 + $0x50] sm:$0xff] %v2422_v43  ;;  %v2425_v20 = vmul.f32 %v2320_v5, %v2233_v55 }
 0x534   : > { %v2315_v24 = vpop.permute.xlu0 %2314 }
 0x535   : > { %v2424_v60 = vmul.f32 %v2315_v24, %v2232_v57  ;;  %2457 = vst [vmem:[%s3816_s22 + $0x68] sm:$0xff] %v2425_v20 }
 0x536   : > { %v2330_v3 = vpop.permute.xlu1 %2329 }
 0x537   : > { %2456 = vst [vmem:[%s3816_s22 + $0x60] sm:$0xff] %v2424_v60  ;;  %v2427_v33 = vmul.f32 %v2330_v3, %v2235_v26 }
 0x538   : > { %v2325_v22 = vpop.permute.xlu0 %2324 }
 0x539   : > { %v2426_v16 = vmul.f32 %v2325_v22, %v2234_v11  ;;  %2459 = vst [vmem:[%s3816_s22 + $0x78] sm:$0xff] %v2427_v33 }
 0x53a   : > { %v2340_v37 = vpop.permute.xlu1 %2339 }
 0x53b   : > { %2458 = vst [vmem:[%s3816_s22 + $0x70] sm:$0xff] %v2426_v16  ;;  %v2429_v28 = vmul.f32 %v2340_v37, %v2237_v25 }
 0x53c   : > { %v2335_v49 = vpop.permute.xlu0 %2334 }
 0x53d   : > { %v2428_v63 = vmul.f32 %v2335_v49, %v2236_v53  ;;  %2461 = vst [vmem:[%s3816_s22 + $0x88] sm:$0xff] %v2429_v28 }
 0x53e   : > { %v2350_v35 = vpop.permute.xlu1 %2349 }
 0x53f   : > { %2460 = vst [vmem:[%s3816_s22 + $0x80] sm:$0xff] %v2428_v63  ;;  %v2431_v29 = vmul.f32 %v2350_v35, %v2239_v42 }
 0x540   : > { %v2345_v21 = vpop.permute.xlu0 %2344 }
 0x541   : > { %v2430_v45 = vmul.f32 %v2345_v21, %v2238_v41  ;;  %2463 = vst [vmem:[%s3816_s22 + $0x98] sm:$0xff] %v2431_v29 }
 0x542   : > { %v2360_v13 = vpop.permute.xlu1 %2359 }
 0x543   : > { %2462 = vst [vmem:[%s3816_s22 + $0x90] sm:$0xff] %v2430_v45  ;;  %v2433_v44 = vmul.f32 %v2360_v13, %v2241_v4 }
 0x544   : > { %v2355_v54 = vpop.permute.xlu0 %2354 }
 0x545   : > { %v2432_v59 = vmul.f32 %v2355_v54, %v2240_v47  ;;  %2465 = vst [vmem:[%s3816_s22 + $0xa8] sm:$0xff] %v2433_v44 }
 0x547   : > { %2464 = vst [vmem:[%s3816_s22 + $0xa0] sm:$0xff] %v2432_v59 }
 0x55e   : > { %v2370_v48 = vpop.permute.xlu1 %2369 }
 0x55f   : > { %v2435_v38 = vmul.f32 %v2370_v48, %v2243_v19  ;;  %v2365_v9 = vpop.permute.xlu0 %2364 }
 0x560   : > { %v2434_v40 = vmul.f32 %v2365_v9, %v2242_v51 }
 0x561   : > { %2467 = vst [vmem:[%s3816_s22 + $0xb8] sm:$0xff] %v2435_v38 }
 0x562   : > { %2466 = vst [vmem:[%s3816_s22 + $0xb0] sm:$0xff] %v2434_v40  ;;  %v2380_v12 = vpop.permute.xlu1 %2379 }
 0x563   : > { %v2437_v0 = vmul.f32 %v2380_v12, %v2245_v7  ;;  %v2375_v58 = vpop.permute.xlu0 %2374 }
 0x564   : > { %v2436_v39 = vmul.f32 %v2375_v58, %v2244_v14 }
 0x565   : > { %2469 = vst [vmem:[%s3816_s22 + $0xc8] sm:$0xff] %v2437_v0 }
 0x566   : > { %2468 = vst [vmem:[%s3816_s22 + $0xc0] sm:$0xff] %v2436_v39  ;;  %v2390_v17 = vpop.permute.xlu1 %2389 }
 0x567   : > { %v2439_v31 = vmul.f32 %v2390_v17, %v2247_v23  ;;  %v2385_v18 = vpop.permute.xlu0 %2384 }
 0x568   : > { %v2438_v62 = vmul.f32 %v2385_v18, %v2246_v2 }
 0x569   : > { %2471 = vst [vmem:[%s3816_s22 + $0xd8] sm:$0xff] %v2439_v31 }
 0x56a   : > { %2470 = vst [vmem:[%s3816_s22 + $0xd0] sm:$0xff] %v2438_v62  ;;  %v2400_v46 = vpop.permute.xlu1 %2399 }
 0x56b   : > { %v2441_v15 = vmul.f32 %v2400_v46, %v2249_v36  ;;  %v2395_v6 = vpop.permute.xlu0 %2394 }
 0x56c   : > { %v2440_v50 = vmul.f32 %v2395_v6, %v2248_v52 }
 0x56d   : > { %2473 = vst [vmem:[%s3816_s22 + $0xe8] sm:$0xff] %v2441_v15 }
 0x56e   : > { %2472 = vst [vmem:[%s3816_s22 + $0xe0] sm:$0xff] %v2440_v50  ;;  %v2410_v1 = vpop.permute.xlu1 %2409 }
 0x56f   : > { %v2443_v61 = vmul.f32 %v2410_v1, %v2251_v8  ;;  %v2405_v56 = vpop.permute.xlu0 %2404 }
 0x570   : > { %v2442_v30 = vmul.f32 %v2405_v56, %v2250_v34 }
 0x571   : > { %2475 = vst [vmem:[%s3816_s22 + $0xf8] sm:$0xff] %v2443_v61 }
 0x572   : > { %2474 = vst [vmem:[%s3816_s22 + $0xf0] sm:$0xff] %v2442_v30 }
 0x573 PF: > { %s5557_s3 = sld [smem:[#allocation20_spill]]  ;;  %s5558_s28 = sld [smem:[#allocation21_spill]] }
 0x574   : > { %s5559_s10 = sld [smem:[#allocation28_spill]]  ;;  %s2492_s9 = sshll.u32 %s3816_s22, 4  ;;  %s5095_s9 = int_to_ptr.vmem [resolvable:$true] %s2492_s9 }
 0x575   : > { %s5560_s18 = sld [smem:[#allocation103_spill]]  ;;  %s2477_s30 = scalar_lea.sflag [#allocation8], %s3796_s11 }
 0x576   : > { %s3312_s1 = scalar_lea.vmem %s5095_s9, 4096  ;;  %s3465_s13 = smov [#allocation12]  }
 0x577   : > { %p3313_p0 = scmp.ne.s32.totalorder %s5095_s9, %s3312_s1  ;;  %s3316_s12 = sshll.u32 %s3465_s13, 4  ;;  %s3317_s12 = int_to_ptr.vmem [resolvable:$false] %s3316_s12 }
 0x578   : > { %s3318_s22 = scalar_lea.vmem %s3317_s12, 8192  ;;  %p3319_p5 = scmp.lt.s32.totalorder %s5095_s9, %s3317_s12 }
 0x579   : > { %s2661_s20 = sshll.u32 %s5557_s3, 5  ;;  %s2662_s27 = sshll.u32 %s5558_s28, 6 }
 0x57a   : > { %s2489_s4 = sadd.s32 %s2662_s27, %s2661_s20  ;;  %p5562_p1 = scmp.ne.s32.totalorder %s5559_s10, 0 }
 0x57b   : > { %s2663_s7 = sshll.u32 %s2489_s4, 7  ;;  %s5561_s6 = smov %s5560_s18 }
 0x57c   : > { %s5100_s8 = scalar_lea.hbm %s5560_s18, %s2663_s7  ;;  %p3314_p7 = pnand %p3313_p0, %p5562_p1 }
 0x57d   : > { %p3320_p10 = scmp.lt.s32.totalorder %s3318_s22, %s3312_s1 }
 0x57e   : > { %p3315_p9 = pneg %p3314_p7 }
 0x57f   : > { %p3321_p13 = por %p3320_p10, %p3319_p5 }
 0x581   : > { %p3322_p2 = pnand %p3321_p13, %p3315_p9 }
 0x583   : > { %3325 = shalt.err (!%p3322_p2)
}
 0x584   : > { %s3326_s19 = scalar_lea.hbm %s5100_s8, 4096  ;;  %s3330_s28 = scalar_lea.hbm %s5561_s6, 65536 }
 0x585   : > { %p3327_p8 = scmp.ne.s32.totalorder %s5100_s8, %s3326_s19  ;;  %p3331_p11 = scmp.lt.u32.totalorder %s5100_s8, %s5561_s6 }
 0x586   : > { %p3332_p3 = scmp.lt.u32.totalorder %s3330_s28, %s3326_s19  ;;  %p3334_p0 = scmp.lt.u32.totalorder %s3326_s19, %s5100_s8 }
 0x587   : > { %p3328_p6 = pnand %p3327_p8, %p5562_p1 }
 0x588   : > { %p3333_p12 = por %p3332_p3, %p3331_p11 }
 0x589   : > { %p3329_p4 = pneg %p3328_p6 }
 0x58a   : > { %p3335_p7 = por %p3334_p0, %p3333_p12 }
 0x58c   : > { %p3336_p9 = pnand %p3335_p7, %p3329_p4 }
 0x58e   : > { %3339 = shalt.err (!%p3336_p9)
}
 0x58f   : > { %s3466_s4 = smov 128   ;;  %s3467_s7 = smov 8  }
 0x590   : > { %2832 = dma.vmem_to_hbm [thread:$0]  (%p5562_p1), %s5095_s9, 4096, %s5100_s8, %s2477_s30, %s3466_s4, %s3466_s4, %s3467_s7  }
 0x591 PF: > { %s5563_s15 = sld [smem:[#allocation17_spill]]  ;;  %s5564_s16 = sld [smem:[#allocation30_spill]] }
 0x592   : > { %p2849_p5 = scmp.ge.s32.totalorder %s3454_s24, 2 }
 0x597   : > { %s2507_s18 = sand.u32 1, %s5563_s15   ;;  %p5565_p10 = scmp.ne.s32.totalorder %s5564_s16, 0 }
 0x598   : > { %s2508_s1 = scalar_lea.sflag [#allocation8], %s2507_s18 }
 0x599   : > { %p2845_p13 = pnand %p2849_p5, %p5565_p10 }
 0x59b   : > { %3401 = dma.done.wait (!%p2845_p13), %s2508_s1, 4096  }
 0x59c   : > { %3403 = vsyncadd (!%p2845_p13), %s2508_s1, 4294963200  ;;  %s22_s24 = sadd.s32 1, %s3454_s24   ;;  %s5567_s12 = sld [smem:[#allocation16_spill]] }
 0x59d   : > { %p5131_p2 = scmp.ge.s32.totalorder %s22_s24, 34   ;;  %s5568_s15 = sld [smem:[#allocation18_spill]] }
 0x59e   : > { %s5569_s19 = sld [smem:[#allocation22_spill]]  ;;  %s5570_s22 = sld [smem:[#allocation27_spill]] }
 0x59f   : > { %s5571_s11 = sld [smem:[#allocation29_spill]]  ;;  %s5573_s13 = smov %s3414_s14 }
 0x5a0   : > { %s5574_s14 = smov %s3716_s29  ;;  %s5575_s16 = smov %s3426_s17 }
 0x5a1   : > { %s5576_s17 = smov %s3711_s25  ;;  %s5577_s18 = smov %s3442_s21 }
 0x5a2   : > { %s5578_s20 = smov %s3450_s23  ;;  %s5579_s21 = smov %s5582_s26 }
 0x5a3   :  { %21 = sbr.rel (!%p5131_p2) target bundleno = 15 (0xf), region = 109 }
 0x5a5   : > { %s5580_s23 = smov %s5571_s11 }
 0x5aa   :  { %2513 = vsyncpa [#allocation7], 1 }
 0x5ab   :  { %2515 = vsyncpa [#allocation7 + $0x1], 1 }
 0x5ac   :  { %2516 = vsyncpa [#allocation10], 1 }
 0x5ad   :  { %2518 = vsyncpa [#allocation10 + $0x1], 1 }
 0x5ae   :  { %2519 = vsyncpa [#allocation8], 1 }
 0x5af   :  { %2521 = vsyncpa [#allocation8 + $0x1], 1 }

</bundles_post_ra>
